<compile_context>
chip_gen: v6e
topology: v6e:2x2x1
jax: 0.10.0
libtpu: 0.0.40
codegen_flags: <defaults>
</compile_context>

<pallas_src>
import jax
import jax.numpy as jnp
from jax import lax
from jax.experimental import pallas as pl
from jax.experimental.pallas import tpu as pltpu

EPS = 1e-5
HID = 64      # hidden channels of the module
GROUPS = 8    # GroupNorm groups


def _gn_silu(h, gavg, gamma, beta, inv_n, act_dtype):
    """GroupNorm + SiLU.

    h        : [rows, L] f32 activations (L = HID or 4*HID in the frame-grouped layout).
    gavg     : [L, L] f32 with 1/channels_per_group where two lanes' channels share a group.
    inv_n    : 1 / (elements per channel) -- static Python float.
    act_dtype: dtype of the returned activation (bf16 -> feeds the bf16 MXU matmuls directly).

    Stats accumulate in f32 (one pass of column sums + a tiny group-averaging matmul);
    SiLU uses the tanh form (1 EUP op per element instead of exp + reciprocal).
    """
    s1 = jnp.sum(h, axis=0, keepdims=True) * inv_n            # per-lane mean
    s2 = jnp.sum(h * h, axis=0, keepdims=True) * inv_n        # per-lane E[x^2]
    mean = jnp.dot(s1, gavg, preferred_element_type=jnp.float32)   # per-group mean (bcast to lanes)
    ex2 = jnp.dot(s2, gavg, preferred_element_type=jnp.float32)    # per-group E[x^2]
    # TODO(synk): E[x^2]-mean^2 can cancel if activations develop mean >> std; move to
    #             centered per-tile partial sums when the stats/apply split lands.
    inv_std = lax.rsqrt(ex2 - mean * mean + EPS)
    hn = ((h - mean) * (inv_std * gamma) + beta).astype(act_dtype)
    # SiLU: x * sigmoid(x) == 0.5 * x * (1 + tanh(x/2))
    return hn * (0.5 * (jnp.tanh(0.5 * hn) + 1.0))


def temporal_encoder_kernel(x_ref, w1_ref, b1_ref, g1_ref, be1_ref,
                            w2_ref, b2_ref, g2_ref, be2_ref,
                            w3_ref, b3_ref, gavg1_ref, gavg2_ref, o_ref):
    # x_ref block: [1, T4*S, 6*Cin] bf16 (6-frame window per stride-4 output, built in wrapper)
    x = x_ref[0]                                              # [rows, 6*Cin] bf16
    rows = x.shape[0]

    # ---- conv1 (temporal k=3, pad 1) for all 4 frames of one conv2 window:
    #      a single bf16 MXU matmul against a banded [6*Cin, 4*HID] weight.
    h1 = jnp.dot(x, w1_ref[...], preferred_element_type=jnp.float32) + b1_ref[...]   # [rows, 256]

    # ---- GroupNorm(8, 64) + SiLU (T*S = 4*rows elements per channel) ----
    h1a = _gn_silu(h1, gavg1_ref[...], g1_ref[...], be1_ref[...],
                   1.0 / (4 * rows), jnp.bfloat16)                                    # bf16

    # ---- conv2 (temporal k=4, stride 4): fused K = 4*HID = 256 bf16 matmul ----
    h2 = jnp.dot(h1a, w2_ref[...], preferred_element_type=jnp.float32) + b2_ref[...]  # [rows, 64]

    # ---- GroupNorm(8, 64) + SiLU ----
    h2a = _gn_silu(h2, gavg2_ref[...], g2_ref[...], be2_ref[...],
                   1.0 / rows, jnp.bfloat16)

    # ---- conv3: 1x1x1 ----
    out = jnp.dot(h2a, w3_ref[...], preferred_element_type=jnp.float32) + b3_ref[...]  # [rows, Cout]
    o_ref[0] = out.astype(o_ref.dtype)


def temporal_encoder(x, params, out_dtype=jnp.float32):
    """x: [B, T, S, Cin] channels-last (S = H*W). Returns [B, T//4, S, Cout]."""
    B, T, S, Cin = x.shape
    assert T % 4 == 0, "stride-4 temporal conv requires T % 4 == 0"
    assert S % 8 == 0, "spatial size H*W must be sublane-aligned (multiple of 8)"
    T4 = T // 4
    rows = T4 * S
    Kwin = 6 * Cin
    cg = HID // GROUPS
    Cout = params["w3"].shape[1]

    # ---------- XLA-side layout prep (cheap; kernel input is bf16 & only 1.5x raw) ----------
    # 6-frame window per stride-4 output row: window frame w of group tp = input frame
    # 4*tp - 1 + w (w = 0..5), with zero temporal padding at both ends.
    zero = jnp.zeros((B, 1, S, Cin), x.dtype)
    x_pad = jnp.concatenate([zero, x, zero], axis=1)                     # [B, T+2, S, Cin]
    x_win = jnp.concatenate([x_pad[:, w:w + T - 3:4] for w in range(6)],
                            axis=-1)                                     # [B, T4, S, 6*Cin]
    x_win = x_win.reshape(B, rows, Kwin).astype(jnp.bfloat16)

    # conv1 weight as a banded [6*Cin, 4*HID] matrix: output-frame block k (lanes k*HID..)
    # reads window frames k, k+1, k+2 with taps w1[0], w1[1], w1[2].
    w1 = params["w1"].astype(jnp.float32)                                # [3, Cin, HID]
    w1big = jnp.zeros((Kwin, 4 * HID), jnp.float32)
    for k in range(4):
        for tap in range(3):
            w = k + tap
            w1big = w1big.at[w * Cin:(w + 1) * Cin, k * HID:(k + 1) * HID].set(w1[tap])
    w1big = w1big.astype(jnp.bfloat16)
    b1t = jnp.tile(params["b1"].astype(jnp.float32), (1, 4))             # [1, 256]
    g1t = jnp.tile(params["g1"].astype(jnp.float32), (1, 4))
    be1t = jnp.tile(params["be1"].astype(jnp.float32), (1, 4))

    # conv2 weight fused along K = 4 taps * 64 channels; conv3 weight; both bf16 for the MXU.
    w2f = params["w2"].reshape(4 * HID, HID).astype(jnp.bfloat16)        # [256, 64]
    w3b = params["w3"].astype(jnp.bfloat16)                              # [64, Cout]

    # group-averaging matrices for GroupNorm (value 1/cg where two lanes share a group).
    grp64 = jnp.arange(HID) // cg
    gavg2 = (grp64[:, None] == grp64[None, :]).astype(jnp.float32) / cg           # [64, 64]
    grp256 = (jnp.arange(4 * HID) % HID) // cg
    gavg1 = (grp256[:, None] == grp256[None, :]).astype(jnp.float32) / cg         # [256, 256]

    w_args = (w1big, b1t, g1t, be1t,
              w2f, params["b2"].astype(jnp.float32),
              params["g2"].astype(jnp.float32), params["be2"].astype(jnp.float32),
              w3b, params["b3"].astype(jnp.float32), gavg1, gavg2)

    def full_spec(a):
        nd = a.ndim
        return pl.BlockSpec(a.shape, lambda b, _nd=nd: (0,) * _nd)

    # ---- advisory cost estimate (conv1/conv2 dominate FLOPs; one tanh per activation elem) ----
    flops = B * rows * 2 * (Kwin * 4 * HID + 4 * HID * HID + HID * Cout)
    transcendentals = B * rows * (4 * HID + HID)
    weight_bytes = sum(int(a.size) * a.dtype.itemsize for a in w_args)
    bytes_accessed = (int(x_win.size) * 2
                      + B * rows * Cout * jnp.dtype(out_dtype).itemsize
                      + weight_bytes)

    # ---- explicit VMEM budget sized from T4*S, clamped so it stays legal on v7x (64 MiB) ----
    bytes_per_row = (2 * Kwin * 2            # x tile, double-buffered, bf16
                     + 2 * Cout * 4          # out tile, double-buffered
                     + 4 * HID * (4 + 2)     # h1 f32 + bf16 activation
                     + HID * (4 + 2)         # h2 f32 + bf16 activation
                     + Cout * 4)             # conv3 result
    vmem_limit = int(min(64 * 2 ** 20,
                         max(8 * 2 ** 20, 1.5 * (rows * bytes_per_row + weight_bytes))))

    out = pl.pallas_call(
        temporal_encoder_kernel,
        out_shape=jax.ShapeDtypeStruct((B, rows, Cout), out_dtype),
        grid=(B,),
        in_specs=[pl.BlockSpec((1, rows, Kwin), lambda b: (b, 0, 0))]
                 + [full_spec(a) for a in w_args],
        out_specs=pl.BlockSpec((1, rows, Cout), lambda b: (b, 0, 0)),
        compiler_params=pltpu.CompilerParams(
            dimension_semantics=("parallel",),
            vmem_limit_bytes=vmem_limit),
        cost_estimate=pl.CostEstimate(flops=flops, transcendentals=transcendentals,
                                      bytes_accessed=bytes_accessed),
    )(x_win, *w_args)
    return out.reshape(B, T4, S, Cout)


# ---------------- pure-JAX reference (PyTorch NCTHW semantics) ----------------
def _group_norm_ref(x, gamma, beta, groups):
    B, C, T, H, W = x.shape
    xg = x.reshape(B, groups, C // groups, T, H, W)
    m = xg.mean(axis=(2, 3, 4, 5), keepdims=True)
    v = xg.var(axis=(2, 3, 4, 5), keepdims=True)
    xn = ((xg - m) / jnp.sqrt(v + EPS)).reshape(B, C, T, H, W)
    return xn * gamma.reshape(1, -1, 1, 1, 1) + beta.reshape(1, -1, 1, 1, 1)


def reference(x_ncthw, params):
    dn = ("NCDHW", "OIDHW", "NCDHW")
    w1 = jnp.transpose(params["w1"], (2, 1, 0))[..., None, None]       # [64, Cin, 3, 1, 1]
    w2 = jnp.transpose(params["w2"], (2, 1, 0))[..., None, None]       # [64, 64, 4, 1, 1]
    w3 = jnp.transpose(params["w3"], (1, 0))[..., None, None, None]    # [Cout, 64, 1, 1, 1]

    h = lax.conv_general_dilated(x_ncthw, w1, (1, 1, 1),
                                 ((1, 1), (0, 0), (0, 0)), dimension_numbers=dn)
    h = h + params["b1"].reshape(1, -1, 1, 1, 1)
    h = _group_norm_ref(h, params["g1"][0], params["be1"][0], GROUPS)
    h = jax.nn.silu(h)
    h = lax.conv_general_dilated(h, w2, (4, 1, 1),
                                 ((0, 0), (0, 0), (0, 0)), dimension_numbers=dn)
    h = h + params["b2"].reshape(1, -1, 1, 1, 1)
    h = _group_norm_ref(h, params["g2"][0], params["be2"][0], GROUPS)
    h = jax.nn.silu(h)
    h = lax.conv_general_dilated(h, w3, (1, 1, 1),
                                 ((0, 0), (0, 0), (0, 0)), dimension_numbers=dn)
    h = h + params["b3"].reshape(1, -1, 1, 1, 1)
    return h


if __name__ == "__main__":
    key = jax.random.PRNGKey(0)
    B, Cin, T, H, W = 2, 4, 8, 16, 16
    Cout = 4
    keys = jax.random.split(key, 10)

    x = jax.random.normal(keys[0], (B, Cin, T, H, W), jnp.float32)     # PyTorch NCTHW input
    params = {
        # conv weights stored as [k_t, C_in, C_out] (torch Conv3d weight is [C_out, C_in, k_t, 1, 1])
        "w1": 0.2 * jax.random.normal(keys[1], (3, Cin, HID), jnp.float32),
        "b1": 0.1 * jax.random.normal(keys[2], (1, HID), jnp.float32),
        "g1": 1.0 + 0.1 * jax.random.normal(keys[3], (1, HID), jnp.float32),
        "be1": 0.1 * jax.random.normal(keys[4], (1, HID), jnp.float32),
        "w2": 0.1 * jax.random.normal(keys[5], (4, HID, HID), jnp.float32),
        "b2": 0.1 * jax.random.normal(keys[6], (1, HID), jnp.float32),
        "g2": 1.0 + 0.1 * jax.random.normal(keys[7], (1, HID), jnp.float32),
        "be2": 0.1 * jax.random.normal(keys[8], (1, HID), jnp.float32),
        "w3": 0.2 * jax.random.normal(keys[9], (HID, Cout), jnp.float32),
        "b3": 0.1 * jnp.arange(Cout, dtype=jnp.float32)[None, :],
    }

    # layout: convert NCTHW -> [B, T, S=H*W, C] for the kernel wrapper
    x_k = jnp.transpose(x, (0, 2, 3, 4, 1)).reshape(B, T, H * W, Cin)

    out_k = temporal_encoder(x_k, params)            # [B, T//4, S, Cout]
    out_k = jax.block_until_ready(out_k)

    # check against the pure-JAX NCTHW reference (f32); the kernel uses bf16 MXU operands
    # for all three convs and bf16 SiLU activations, so compare with a bf16-appropriate
    # tolerance relative to output scale.
    ref = reference(x, params)                       # [B, Cout, T//4, H, W]
    ref_k = jnp.transpose(ref, (0, 2, 3, 4, 1)).reshape(B, T // 4, H * W, Cout)
    max_err = float(jnp.max(jnp.abs(out_k.astype(jnp.float32) - ref_k)))
    scale = max(1.0, float(jnp.max(jnp.abs(ref_k))))
    assert max_err / scale < 3e-2, f"mismatch vs reference: abs {max_err}, scale {scale}"

    print("KERNEL_OK")
</pallas_src>

<mosaic_0001>
module attributes {stable_mosaic.version = 11 : i64} {
  func.func @temporal_encoder_kernel(%arg0: i32, %arg1: memref<1x512x24xbf16, #tpu.memory_space<vmem>>, %arg2: memref<24x256xbf16, #tpu.memory_space<vmem>>, %arg3: memref<1x256xf32, #tpu.memory_space<vmem>>, %arg4: memref<1x256xf32, #tpu.memory_space<vmem>>, %arg5: memref<1x256xf32, #tpu.memory_space<vmem>>, %arg6: memref<256x64xbf16, #tpu.memory_space<vmem>>, %arg7: memref<1x64xf32, #tpu.memory_space<vmem>>, %arg8: memref<1x64xf32, #tpu.memory_space<vmem>>, %arg9: memref<1x64xf32, #tpu.memory_space<vmem>>, %arg10: memref<64x4xbf16, #tpu.memory_space<vmem>>, %arg11: memref<1x4xf32, #tpu.memory_space<vmem>>, %arg12: memref<256x256xf32, #tpu.memory_space<vmem>>, %arg13: memref<64x64xf32, #tpu.memory_space<vmem>>, %arg14: memref<1x512x4xf32, #tpu.memory_space<vmem>>) attributes {dimension_semantics = [#tpu.dimension_semantics<parallel>], iteration_bounds = array<i64: 2>, scalar_prefetch = 0 : i64, scratch_operands = 0 : i64, tpu.core_type = #tpu.core_type<tc>, window_params = [{transform_indices = @transform_0, window_bounds = array<i64: 1, 512, 24>}, {pipeline_mode = #tpu.pipeline_mode<synchronous>, transform_indices = @transform_1, window_bounds = array<i64: 24, 256>}, {pipeline_mode = #tpu.pipeline_mode<synchronous>, transform_indices = @transform_2, window_bounds = array<i64: 1, 256>}, {pipeline_mode = #tpu.pipeline_mode<synchronous>, transform_indices = @transform_3, window_bounds = array<i64: 1, 256>}, {pipeline_mode = #tpu.pipeline_mode<synchronous>, transform_indices = @transform_4, window_bounds = array<i64: 1, 256>}, {pipeline_mode = #tpu.pipeline_mode<synchronous>, transform_indices = @transform_5, window_bounds = array<i64: 256, 64>}, {pipeline_mode = #tpu.pipeline_mode<synchronous>, transform_indices = @transform_6, window_bounds = array<i64: 1, 64>}, {pipeline_mode = #tpu.pipeline_mode<synchronous>, transform_indices = @transform_7, window_bounds = array<i64: 1, 64>}, {pipeline_mode = #tpu.pipeline_mode<synchronous>, transform_indices = @transform_8, window_bounds = array<i64: 1, 64>}, {pipeline_mode = #tpu.pipeline_mode<synchronous>, transform_indices = @transform_9, window_bounds = array<i64: 64, 4>}, {pipeline_mode = #tpu.pipeline_mode<synchronous>, transform_indices = @transform_10, window_bounds = array<i64: 1, 4>}, {pipeline_mode = #tpu.pipeline_mode<synchronous>, transform_indices = @transform_11, window_bounds = array<i64: 256, 256>}, {pipeline_mode = #tpu.pipeline_mode<synchronous>, transform_indices = @transform_12, window_bounds = array<i64: 64, 64>}, {transform_indices = @transform_13, window_bounds = array<i64: 1, 512, 4>}]} {
    %c0 = arith.constant 0 : index
    %c0_0 = arith.constant 0 : index
    %c0_1 = arith.constant 0 : index
    %0 = vector.load %arg1[%c0, %c0_0, %c0_1] : memref<1x512x24xbf16, #tpu.memory_space<vmem>>, vector<1x512x24xbf16>
    %1 = vector.shape_cast %0 : vector<1x512x24xbf16> to vector<512x24xbf16>
    %c0_2 = arith.constant 0 : index
    %c0_3 = arith.constant 0 : index
    %2 = vector.load %arg2[%c0_2, %c0_3] : memref<24x256xbf16, #tpu.memory_space<vmem>>, vector<24x256xbf16>
    %cst = arith.constant dense<0.000000e+00> : vector<512x256xf32>
    %3 = tpu.matmul %1, %2, %cst {dimension_numbers = #tpu.dot_dimension_numbers<[1], [0], [0], [1], [0, 0, 1, 1], [], []>} : vector<512x24xbf16>, vector<24x256xbf16>, vector<512x256xf32> -> vector<512x256xf32>
    %c0_4 = arith.constant 0 : index
    %c0_5 = arith.constant 0 : index
    %4 = vector.load %arg3[%c0_4, %c0_5] : memref<1x256xf32, #tpu.memory_space<vmem>>, vector<1x256xf32>
    %5 = vector.broadcast %4 : vector<1x256xf32> to vector<512x256xf32>
    %6 = arith.addf %3, %5 : vector<512x256xf32>
    %c0_6 = arith.constant 0 : index
    %c0_7 = arith.constant 0 : index
    %7 = vector.load %arg12[%c0_6, %c0_7] : memref<256x256xf32, #tpu.memory_space<vmem>>, vector<256x256xf32>
    %c0_8 = arith.constant 0 : index
    %c0_9 = arith.constant 0 : index
    %8 = vector.load %arg4[%c0_8, %c0_9] : memref<1x256xf32, #tpu.memory_space<vmem>>, vector<1x256xf32>
    %c0_10 = arith.constant 0 : index
    %c0_11 = arith.constant 0 : index
    %9 = vector.load %arg5[%c0_10, %c0_11] : memref<1x256xf32, #tpu.memory_space<vmem>>, vector<1x256xf32>
    %cst_12 = arith.constant dense<0.000000e+00> : vector<256xf32>
    %10 = vector.multi_reduction <add>, %6, %cst_12 [0] : vector<512x256xf32> to vector<256xf32>
    %11 = vector.shape_cast %10 : vector<256xf32> to vector<1x256xf32>
    %cst_13 = arith.constant 4.8828125E-4 : f32
    %12 = vector.broadcast %cst_13 : f32 to vector<1x256xf32>
    %13 = arith.mulf %11, %12 : vector<1x256xf32>
    %14 = arith.mulf %6, %6 : vector<512x256xf32>
    %cst_14 = arith.constant dense<0.000000e+00> : vector<256xf32>
    %15 = vector.multi_reduction <add>, %14, %cst_14 [0] : vector<512x256xf32> to vector<256xf32>
    %16 = vector.shape_cast %15 : vector<256xf32> to vector<1x256xf32>
    %cst_15 = arith.constant 4.8828125E-4 : f32
    %17 = vector.broadcast %cst_15 : f32 to vector<1x256xf32>
    %18 = arith.mulf %16, %17 : vector<1x256xf32>
    %cst_16 = arith.constant dense<0.000000e+00> : vector<1x256xf32>
    %19 = tpu.matmul %13, %7, %cst_16 {dimension_numbers = #tpu.dot_dimension_numbers<[1], [0], [0], [1], [0, 0, 1, 1], [], []>} : vector<1x256xf32>, vector<256x256xf32>, vector<1x256xf32> -> vector<1x256xf32>
    %cst_17 = arith.constant dense<0.000000e+00> : vector<1x256xf32>
    %20 = tpu.matmul %18, %7, %cst_17 {dimension_numbers = #tpu.dot_dimension_numbers<[1], [0], [0], [1], [0, 0, 1, 1], [], []>} : vector<1x256xf32>, vector<256x256xf32>, vector<1x256xf32> -> vector<1x256xf32>
    %21 = arith.mulf %19, %19 : vector<1x256xf32>
    %22 = arith.subf %20, %21 : vector<1x256xf32>
    %cst_18 = arith.constant 9.99999974E-6 : f32
    %23 = vector.broadcast %cst_18 : f32 to vector<1x256xf32>
    %24 = arith.addf %22, %23 : vector<1x256xf32>
    %25 = math.rsqrt %24 : vector<1x256xf32>
    %26 = vector.broadcast %19 : vector<1x256xf32> to vector<512x256xf32>
    %27 = arith.subf %6, %26 : vector<512x256xf32>
    %28 = arith.mulf %25, %8 : vector<1x256xf32>
    %29 = vector.broadcast %28 : vector<1x256xf32> to vector<512x256xf32>
    %30 = arith.mulf %27, %29 : vector<512x256xf32>
    %31 = vector.broadcast %9 : vector<1x256xf32> to vector<512x256xf32>
    %32 = arith.addf %30, %31 : vector<512x256xf32>
    %33 = arith.truncf %32 : vector<512x256xf32> to vector<512x256xbf16>
    %cst_19 = arith.constant 5.000000e-01 : bf16
    %34 = vector.broadcast %cst_19 : bf16 to vector<512x256xbf16>
    %35 = arith.mulf %34, %33 : vector<512x256xbf16>
    %36 = math.tanh %35 : vector<512x256xbf16>
    %cst_20 = arith.constant 1.000000e+00 : bf16
    %37 = vector.broadcast %cst_20 : bf16 to vector<512x256xbf16>
    %38 = arith.addf %36, %37 : vector<512x256xbf16>
    %cst_21 = arith.constant 5.000000e-01 : bf16
    %39 = vector.broadcast %cst_21 : bf16 to vector<512x256xbf16>
    %40 = arith.mulf %39, %38 : vector<512x256xbf16>
    %41 = arith.mulf %33, %40 : vector<512x256xbf16>
    %c0_22 = arith.constant 0 : index
    %c0_23 = arith.constant 0 : index
    %42 = vector.load %arg6[%c0_22, %c0_23] : memref<256x64xbf16, #tpu.memory_space<vmem>>, vector<256x64xbf16>
    %cst_24 = arith.constant dense<0.000000e+00> : vector<512x64xf32>
    %43 = tpu.matmul %41, %42, %cst_24 {dimension_numbers = #tpu.dot_dimension_numbers<[1], [0], [0], [1], [0, 0, 1, 1], [], []>} : vector<512x256xbf16>, vector<256x64xbf16>, vector<512x64xf32> -> vector<512x64xf32>
    %c0_25 = arith.constant 0 : index
    %c0_26 = arith.constant 0 : index
    %44 = vector.load %arg7[%c0_25, %c0_26] : memref<1x64xf32, #tpu.memory_space<vmem>>, vector<1x64xf32>
    %45 = vector.broadcast %44 : vector<1x64xf32> to vector<512x64xf32>
    %46 = arith.addf %43, %45 : vector<512x64xf32>
    %c0_27 = arith.constant 0 : index
    %c0_28 = arith.constant 0 : index
    %47 = vector.load %arg13[%c0_27, %c0_28] : memref<64x64xf32, #tpu.memory_space<vmem>>, vector<64x64xf32>
    %c0_29 = arith.constant 0 : index
    %c0_30 = arith.constant 0 : index
    %48 = vector.load %arg8[%c0_29, %c0_30] : memref<1x64xf32, #tpu.memory_space<vmem>>, vector<1x64xf32>
    %c0_31 = arith.constant 0 : index
    %c0_32 = arith.constant 0 : index
    %49 = vector.load %arg9[%c0_31, %c0_32] : memref<1x64xf32, #tpu.memory_space<vmem>>, vector<1x64xf32>
    %cst_33 = arith.constant dense<0.000000e+00> : vector<64xf32>
    %50 = vector.multi_reduction <add>, %46, %cst_33 [0] : vector<512x64xf32> to vector<64xf32>
    %51 = vector.shape_cast %50 : vector<64xf32> to vector<1x64xf32>
    %cst_34 = arith.constant 0.001953125 : f32
    %52 = vector.broadcast %cst_34 : f32 to vector<1x64xf32>
    %53 = arith.mulf %51, %52 : vector<1x64xf32>
    %54 = arith.mulf %46, %46 : vector<512x64xf32>
    %cst_35 = arith.constant dense<0.000000e+00> : vector<64xf32>
    %55 = vector.multi_reduction <add>, %54, %cst_35 [0] : vector<512x64xf32> to vector<64xf32>
    %56 = vector.shape_cast %55 : vector<64xf32> to vector<1x64xf32>
    %cst_36 = arith.constant 0.001953125 : f32
    %57 = vector.broadcast %cst_36 : f32 to vector<1x64xf32>
    %58 = arith.mulf %56, %57 : vector<1x64xf32>
    %cst_37 = arith.constant dense<0.000000e+00> : vector<1x64xf32>
    %59 = tpu.matmul %53, %47, %cst_37 {dimension_numbers = #tpu.dot_dimension_numbers<[1], [0], [0], [1], [0, 0, 1, 1], [], []>} : vector<1x64xf32>, vector<64x64xf32>, vector<1x64xf32> -> vector<1x64xf32>
    %cst_38 = arith.constant dense<0.000000e+00> : vector<1x64xf32>
    %60 = tpu.matmul %58, %47, %cst_38 {dimension_numbers = #tpu.dot_dimension_numbers<[1], [0], [0], [1], [0, 0, 1, 1], [], []>} : vector<1x64xf32>, vector<64x64xf32>, vector<1x64xf32> -> vector<1x64xf32>
    %61 = arith.mulf %59, %59 : vector<1x64xf32>
    %62 = arith.subf %60, %61 : vector<1x64xf32>
    %cst_39 = arith.constant 9.99999974E-6 : f32
    %63 = vector.broadcast %cst_39 : f32 to vector<1x64xf32>
    %64 = arith.addf %62, %63 : vector<1x64xf32>
    %65 = math.rsqrt %64 : vector<1x64xf32>
    %66 = vector.broadcast %59 : vector<1x64xf32> to vector<512x64xf32>
    %67 = arith.subf %46, %66 : vector<512x64xf32>
    %68 = arith.mulf %65, %48 : vector<1x64xf32>
    %69 = vector.broadcast %68 : vector<1x64xf32> to vector<512x64xf32>
    %70 = arith.mulf %67, %69 : vector<512x64xf32>
    %71 = vector.broadcast %49 : vector<1x64xf32> to vector<512x64xf32>
    %72 = arith.addf %70, %71 : vector<512x64xf32>
    %73 = arith.truncf %72 : vector<512x64xf32> to vector<512x64xbf16>
    %cst_40 = arith.constant 5.000000e-01 : bf16
    %74 = vector.broadcast %cst_40 : bf16 to vector<512x64xbf16>
    %75 = arith.mulf %74, %73 : vector<512x64xbf16>
    %76 = math.tanh %75 : vector<512x64xbf16>
    %cst_41 = arith.constant 1.000000e+00 : bf16
    %77 = vector.broadcast %cst_41 : bf16 to vector<512x64xbf16>
    %78 = arith.addf %76, %77 : vector<512x64xbf16>
    %cst_42 = arith.constant 5.000000e-01 : bf16
    %79 = vector.broadcast %cst_42 : bf16 to vector<512x64xbf16>
    %80 = arith.mulf %79, %78 : vector<512x64xbf16>
    %81 = arith.mulf %73, %80 : vector<512x64xbf16>
    %c0_43 = arith.constant 0 : index
    %c0_44 = arith.constant 0 : index
    %82 = vector.load %arg10[%c0_43, %c0_44] : memref<64x4xbf16, #tpu.memory_space<vmem>>, vector<64x4xbf16>
    %cst_45 = arith.constant dense<0.000000e+00> : vector<512x4xf32>
    %83 = tpu.matmul %81, %82, %cst_45 {dimension_numbers = #tpu.dot_dimension_numbers<[1], [0], [0], [1], [0, 0, 1, 1], [], []>} : vector<512x64xbf16>, vector<64x4xbf16>, vector<512x4xf32> -> vector<512x4xf32>
    %c0_46 = arith.constant 0 : index
    %c0_47 = arith.constant 0 : index
    %84 = vector.load %arg11[%c0_46, %c0_47] : memref<1x4xf32, #tpu.memory_space<vmem>>, vector<1x4xf32>
    %85 = vector.broadcast %84 : vector<1x4xf32> to vector<512x4xf32>
    %86 = arith.addf %83, %85 : vector<512x4xf32>
    %c0_48 = arith.constant 0 : index
    %c0_49 = arith.constant 0 : index
    %c0_50 = arith.constant 0 : index
    %87 = vector.load %arg14[%c0_48, %c0_49, %c0_50] : memref<1x512x4xf32, #tpu.memory_space<vmem>>, vector<1x512x4xf32>
    %88 = vector.shape_cast %87 : vector<1x512x4xf32> to vector<512x4xf32>
    %89 = vector.shape_cast %86 : vector<512x4xf32> to vector<1x512x4xf32>
    tpu.vector_store %arg14[%c0_48, %c0_49, %c0_50], %89 {strides = array<i32>} : memref<1x512x4xf32, #tpu.memory_space<vmem>>, vector<1x512x4xf32>,
    return
  }
  func.func @transform_0(%arg0: i32) -> (i32, i32, i32) {
    %c0_i32 = arith.constant 0 : i32
    %c0_i32_0 = arith.constant 0 : i32
    %c0_i32_1 = arith.constant 0 : i32
    return %arg0, %c0_i32, %c0_i32_0 : i32, i32, i32
  }
  func.func @transform_1(%arg0: i32) -> (i32, i32) {
    %c0_i32 = arith.constant 0 : i32
    %c0_i32_0 = arith.constant 0 : i32
    %c0_i32_1 = arith.constant 0 : i32
    return %c0_i32, %c0_i32_0 : i32, i32
  }
  func.func @transform_2(%arg0: i32) -> (i32, i32) {
    %c0_i32 = arith.constant 0 : i32
    %c0_i32_0 = arith.constant 0 : i32
    %c0_i32_1 = arith.constant 0 : i32
    return %c0_i32, %c0_i32_0 : i32, i32
  }
  func.func @transform_3(%arg0: i32) -> (i32, i32) {
    %c0_i32 = arith.constant 0 : i32
    %c0_i32_0 = arith.constant 0 : i32
    %c0_i32_1 = arith.constant 0 : i32
    return %c0_i32, %c0_i32_0 : i32, i32
  }
  func.func @transform_4(%arg0: i32) -> (i32, i32) {
    %c0_i32 = arith.constant 0 : i32
    %c0_i32_0 = arith.constant 0 : i32
    %c0_i32_1 = arith.constant 0 : i32
    return %c0_i32, %c0_i32_0 : i32, i32
  }
  func.func @transform_5(%arg0: i32) -> (i32, i32) {
    %c0_i32 = arith.constant 0 : i32
    %c0_i32_0 = arith.constant 0 : i32
    %c0_i32_1 = arith.constant 0 : i32
    return %c0_i32, %c0_i32_0 : i32, i32
  }
  func.func @transform_6(%arg0: i32) -> (i32, i32) {
    %c0_i32 = arith.constant 0 : i32
    %c0_i32_0 = arith.constant 0 : i32
    %c0_i32_1 = arith.constant 0 : i32
    return %c0_i32, %c0_i32_0 : i32, i32
  }
  func.func @transform_7(%arg0: i32) -> (i32, i32) {
    %c0_i32 = arith.constant 0 : i32
    %c0_i32_0 = arith.constant 0 : i32
    %c0_i32_1 = arith.constant 0 : i32
    return %c0_i32, %c0_i32_0 : i32, i32
  }
  func.func @transform_8(%arg0: i32) -> (i32, i32) {
    %c0_i32 = arith.constant 0 : i32
    %c0_i32_0 = arith.constant 0 : i32
    %c0_i32_1 = arith.constant 0 : i32
    return %c0_i32, %c0_i32_0 : i32, i32
  }
  func.func @transform_9(%arg0: i32) -> (i32, i32) {
    %c0_i32 = arith.constant 0 : i32
    %c0_i32_0 = arith.constant 0 : i32
    %c0_i32_1 = arith.constant 0 : i32
    return %c0_i32, %c0_i32_0 : i32, i32
  }
  func.func @transform_10(%arg0: i32) -> (i32, i32) {
    %c0_i32 = arith.constant 0 : i32
    %c0_i32_0 = arith.constant 0 : i32
    %c0_i32_1 = arith.constant 0 : i32
    return %c0_i32, %c0_i32_0 : i32, i32
  }
  func.func @transform_11(%arg0: i32) -> (i32, i32) {
    %c0_i32 = arith.constant 0 : i32
    %c0_i32_0 = arith.constant 0 : i32
    %c0_i32_1 = arith.constant 0 : i32
    return %c0_i32, %c0_i32_0 : i32, i32
  }
  func.func @transform_12(%arg0: i32) -> (i32, i32) {
    %c0_i32 = arith.constant 0 : i32
    %c0_i32_0 = arith.constant 0 : i32
    %c0_i32_1 = arith.constant 0 : i32
    return %c0_i32, %c0_i32_0 : i32, i32
  }
  func.func @transform_13(%arg0: i32) -> (i32, i32, i32) {
    %c0_i32 = arith.constant 0 : i32
    %c0_i32_0 = arith.constant 0 : i32
    %c0_i32_1 = arith.constant 0 : i32
    return %arg0, %c0_i32, %c0_i32_0 : i32, i32, i32
  }
}

</mosaic_0001>

<bundles_post_ra>
// kernel: tpu_custom_call.1
= control target key start
LH: loop header
LB: loop body
LE: loop exit
PB: predicated region body
PF: predicated region fallthrough
CT: control target
= control target key end

     0   :  { %s5105_s25 = smov 0   ;;  %s9410_s0 = inlined_call_operand.vmem [shape: bf16[2,512,24], index: 0, kind: input, shape index: {}]   ;;  %s9411_s1 = inlined_call_operand.vmem [shape: bf16[24,256], index: 1, kind: input, shape index: {}]   ;;  %s9412_s2 = inlined_call_operand.vmem [shape: f32[1,256], index: 2, kind: input, shape index: {}]   ;;  %s9413_s3 = inlined_call_operand.vmem [shape: f32[1,256], index: 3, kind: input, shape index: {}]   ;;  %s9414_s4 = inlined_call_operand.vmem [shape: f32[1,256], index: 4, kind: input, shape index: {}]   ;;  %s9415_s5 = inlined_call_operand.vmem [shape: bf16[256,64], index: 5, kind: input, shape index: {}]   ;;  %s9416_s6 = inlined_call_operand.vmem [shape: f32[1,64], index: 6, kind: input, shape index: {}]   ;;  %s9417_s7 = inlined_call_operand.vmem [shape: f32[1,64], index: 7, kind: input, shape index: {}]   ;;  %s9418_s8 = inlined_call_operand.vmem [shape: f32[1,64], index: 8, kind: input, shape index: {}]   ;;  %s9419_s9 = inlined_call_operand.vmem [shape: bf16[64,4], index: 9, kind: input, shape index: {}]   ;;  %s9420_s10 = inlined_call_operand.vmem [shape: f32[1,4], index: 10, kind: input, shape index: {}]   ;;  %s9421_s11 = inlined_call_operand.vmem [shape: f32[256,256], index: 11, kind: input, shape index: {}]   ;;  %s9422_s12 = inlined_call_operand.vmem [shape: f32[64,64], index: 12, kind: input, shape index: {}]   ;;  %s9423_s13 = inlined_call_operand.vmem [shape: f32[2,512,4], index: 13, kind: output, shape index: {}]  }
   0x1 LB: > { %s4447_s26 = sadd.s32 4294967295, %s5030_s25   ;;  %p4451_p0 = scmp.ge.s32.totalorder %s5030_s25, 1  ;;  %s5030_s25 = sphi %s5105_s25, %s23_s25  }
   0x2   : > { %p387_p1 = scmp.lt.s32.totalorder %s5030_s25, 3 }
   0x4   : > { %p388_p2 = pnand %p4451_p0, %p387_p1 }
   0x6   : > { %391 = sbr.rel (%p388_p2) target bundleno = 1857 (0x741), region = 72 }
   0xb   : > { %v510_v0 = vld [vmem:[%s9411_s1 + $0x10] sm:$0xff]  ;;  %vm795_vm0 = vcmask 1043456   ;;  %p431_p3 = scmp.lt.s32.totalorder %s4447_s26, 1  ;;  %v4771_v3 = vld [vmem:[%s9411_s1 + $0x4] ss:$8 sps:$4 sm:$0xff]   ;;  %v9424_v4 = vmov 0  }
   0xc   : > { %v4491_v1 = vcombine.high %v510_v0, %v510_v0  ;;  %v4490_v2 = vcombine.low %v510_v0, %v510_v0  ;;  %834 = vmatprep.mubr.bf16.mxu0 %v9424_v4  ;;  %v4773_v5 = vld [vmem:[%s9411_s1] ss:$8 sps:$4 sm:$0xff]   ;;  %vm698_vm1 = vcmask 195584   ;;  %v1186_v19 = vld [vmem:[%s9421_s11 + $0xf8] sm:$0xff]  ;;  %v1185_v20 = vld [vmem:[%s9421_s11 + $0xf0] sm:$0xff]  ;;  %vm3021_vm2 = vcmask 523264  }
   0xd   : > { %s10196_s26 = smov (!%p431_p3, %s4447_s26), 1  ;;  %1700 = vmatprep.subr.mxu1 %v1186_v19  ;;  %v1184_v22 = vld [vmem:[%s9421_s11 + $0xe8] sm:$0xff]  ;;  %v1183_v23 = vld [vmem:[%s9421_s11 + $0xe0] sm:$0xff]  ;;  %v1182_v25 = vld [vmem:[%s9421_s11 + $0xd8] sm:$0xff]  ;;  %vm5034_vm3 = vmmov 0   ;;  %vm4327_vm4 = vcmask 31744  }
   0xe   : > { %4492 = vmatprep.subr.msk.bf16.mxu0 %vm795_vm0, %v4491_v1  ;;  %v797_v6 = vsel %vm795_vm0, %v4490_v2, 0  ;;  %s4584_s16 = sshll.u32 %s10196_s26, 8  ;;  %1701 = vmatpush1.msra.mxu1 %v1185_v20  ;;  %v1181_v26 = vld [vmem:[%s9421_s11 + $0xd0] sm:$0xff]  ;;  %v1180_v28 = vld [vmem:[%s9421_s11 + $0xc8] sm:$0xff]  ;;  %v1179_v29 = vld [vmem:[%s9421_s11 + $0xc0] sm:$0xff]  ;;  %s4585_s28 = sshll.u32 %s10196_s26, 9 }
   0xf   : > { %815 = vmatpush1.bf16.msra.mxu0 %v797_v6  ;;  %s5129_s19 = scalar_lea.vmem %s9410_s0, %s4584_s16  ;;  %1702 = vmatprep.subr.mxu1 %v1184_v22  ;;  %v1178_v31 = vld [vmem:[%s9421_s11 + $0xb8] sm:$0xff]  ;;  %v1177_v32 = vld [vmem:[%s9421_s11 + $0xb0] sm:$0xff]  ;;  %v1176_v34 = vld [vmem:[%s9421_s11 + $0xa8] sm:$0xff]  ;;  %s9213_s16 = scalar_lea.vmem %s9423_s13, %s4585_s28 }
  0x10   : > { %816 = vmatprep.subr.bf16.mxu0 %v4771_v3  ;;  %v4774_v7 = vld [vmem:[%s5129_s19] sm:$0xff]   ;;  %v4775_v8 = vld [vmem:[%s5129_s19 + $0x8] sm:$0xff]   ;;  %v4776_v9 = vld [vmem:[%s5129_s19 + $0x10] sm:$0xff]   ;;  %1703 = vmatpush1.msra.mxu1 %v1183_v23 }
  0x11   : > { %v4777_v10 = vld [vmem:[%s5129_s19 + $0x18] sm:$0xff]   ;;  %v4778_v11 = vld [vmem:[%s5129_s19 + $0x20] sm:$0xff]   ;;  %v4779_v12 = vld [vmem:[%s5129_s19 + $0x28] sm:$0xff]   ;;  %1704 = vmatprep.subr.mxu1 %v1182_v25 }
  0x12   : > { %v4780_v13 = vld [vmem:[%s5129_s19 + $0x30] sm:$0xff]   ;;  %v4781_v14 = vld [vmem:[%s5129_s19 + $0x38] sm:$0xff]   ;;  %v4782_v15 = vld [vmem:[%s5129_s19 + $0x40] sm:$0xff]   ;;  %1705 = vmatpush1.msra.mxu1 %v1181_v26 }
  0x13   : > { %817 = vmatpush1.bf16.msra.mxu0 %v4773_v5  ;;  %v4783_v16 = vld [vmem:[%s5129_s19 + $0x48] sm:$0xff]   ;;  %v4784_v17 = vld [vmem:[%s5129_s19 + $0x50] sm:$0xff]   ;;  %v4785_v18 = vld [vmem:[%s5129_s19 + $0x58] sm:$0xff]   ;;  %1706 = vmatprep.subr.mxu1 %v1180_v28 }
  0x14   : > { %1629 = vmatprep.subr.mxu0 %v1186_v19  ;;  %v4786_v21 = vld [vmem:[%s5129_s19 + $0x60] sm:$0xff]   ;;  %v4787_v24 = vld [vmem:[%s5129_s19 + $0x68] sm:$0xff]   ;;  %v4788_v27 = vld [vmem:[%s5129_s19 + $0x70] sm:$0xff]   ;;  %1707 = vmatpush1.msra.mxu1 %v1179_v29 }
  0x15   : > { %v4789_v30 = vld [vmem:[%s5129_s19 + $0x78] sm:$0xff]   ;;  %1708 = vmatprep.subr.mxu1 %v1178_v31  ;;  %v4790_v33 = vld [vmem:[%s5129_s19 + $0x80] sm:$0xff]   ;;  %v4791_v36 = vld [vmem:[%s5129_s19 + $0x88] sm:$0xff]  }
  0x16   : > { %4493 = vmatmul.mubr.msk.bf16.vlgmr.msra.gmra.mxu0 %vm698_vm1, %v4774_v7  ;;  %1709 = vmatpush1.msra.mxu1 %v1177_v32  ;;  %v1175_v35 = vld [vmem:[%s9421_s11 + $0xa0] sm:$0xff]  ;;  %v1174_v37 = vld [vmem:[%s9421_s11 + $0x98] sm:$0xff]  ;;  %v1173_v38 = vld [vmem:[%s9421_s11 + $0x90] sm:$0xff] }
  0x17   : > { %844 = vmatprep.mubr.bf16.mxu0 %v9424_v4  ;;  %1630 = vmatpush1.msra.mxu0 %v1185_v20  ;;  %v4792_v39 = vld [vmem:[%s5129_s19 + $0x90] sm:$0xff]   ;;  %v1172_v40 = vld [vmem:[%s9421_s11 + $0x88] sm:$0xff]  ;;  %v1171_v41 = vld [vmem:[%s9421_s11 + $0x80] sm:$0xff] }
  0x18   : > { %1631 = vmatprep.subr.mxu0 %v1184_v22  ;;  %1710 = vmatprep.subr.mxu1 %v1176_v34  ;;  %v4793_v42 = vld [vmem:[%s5129_s19 + $0x98] sm:$0xff]   ;;  %v1169_v44 = vld [vmem:[%s9421_s11 + $0x70] sm:$0xff]  ;;  %v4794_v45 = vld [vmem:[%s5129_s19 + $0xa0] sm:$0xff]  }
  0x19   : > { %1632 = vmatpush1.msra.mxu0 %v1183_v23  ;;  %1711 = vmatpush1.msra.mxu1 %v1175_v35  ;;  %v1170_v43 = vld [vmem:[%s9421_s11 + $0x78] sm:$0xff]  ;;  %v1168_v46 = vld [vmem:[%s9421_s11 + $0x68] sm:$0xff]  ;;  %v1167_v47 = vld [vmem:[%s9421_s11 + $0x60] sm:$0xff] }
  0x1a   : > { %1633 = vmatprep.subr.mxu0 %v1182_v25  ;;  %1712 = vmatprep.subr.mxu1 %v1174_v37  ;;  %v4795_v48 = vld [vmem:[%s5129_s19 + $0xa8] sm:$0xff]   ;;  %v1166_v49 = vld [vmem:[%s9421_s11 + $0x58] sm:$0xff]  ;;  %v1165_v50 = vld [vmem:[%s9421_s11 + $0x50] sm:$0xff] }
  0x1b   : > { %1634 = vmatpush1.msra.mxu0 %v1181_v26  ;;  %1713 = vmatpush1.msra.mxu1 %v1173_v38  ;;  %v4796_v51 = vld [vmem:[%s5129_s19 + $0xb0] sm:$0xff]   ;;  %v1164_v52 = vld [vmem:[%s9421_s11 + $0x48] sm:$0xff]  ;;  %v1163_v53 = vld [vmem:[%s9421_s11 + $0x40] sm:$0xff] }
  0x1c   : > { %1635 = vmatprep.subr.mxu0 %v1180_v28  ;;  %1714 = vmatprep.subr.mxu1 %v1172_v40  ;;  %v4797_v54 = vld [vmem:[%s5129_s19 + $0xb8] sm:$0xff]   ;;  %v1161_v56 = vld [vmem:[%s9421_s11 + $0x30] sm:$0xff]  ;;  %v4798_v57 = vld [vmem:[%s5129_s19 + $0xc0] sm:$0xff]  }
  0x1d   : > { %1636 = vmatpush1.msra.mxu0 %v1179_v29  ;;  %1715 = vmatpush1.msra.mxu1 %v1171_v41  ;;  %v1162_v55 = vld [vmem:[%s9421_s11 + $0x38] sm:$0xff]  ;;  %v1160_v58 = vld [vmem:[%s9421_s11 + $0x28] sm:$0xff]  ;;  %v1159_v59 = vld [vmem:[%s9421_s11 + $0x20] sm:$0xff] }
  0x1e   : > { %4494 = vmatmul.mubr.msk.bf16.gmra.mxu0 %vm698_vm1, %v4775_v8  ;;  %1637 = vmatprep.subr.mxu0 %v1178_v31  ;;  %v4799_v63 = vld [vmem:[%s5129_s19 + $0xc8] sm:$0xff]   ;;  %v1158_v0 = vld [vmem:[%s9421_s11 + $0x18] sm:$0xff]  ;;  %v1157_v2 = vld [vmem:[%s9421_s11 + $0x10] sm:$0xff] }
  0x1f   : > { %854 = vmatprep.mubr.bf16.mxu0 %v9424_v4  ;;  %1638 = vmatpush1.msra.mxu0 %v1177_v32  ;;  %v4800_v7 = vld [vmem:[%s5129_s19 + $0xd0] sm:$0xff]   ;;  %v1156_v8 = vld [vmem:[%s9421_s11 + $0x8] sm:$0xff]  ;;  %v1214_v29 = vld [vmem:[%s9421_s11 + $0x1d8] sm:$0xff] }
  0x20   : > { %1639 = vmatprep.subr.mxu0 %v1176_v34  ;;  %1716 = vmatprep.subr.mxu1 %v1170_v43  ;;  %v1216_v22 = vld [vmem:[%s9421_s11 + $0x1e8] sm:$0xff]  ;;  %v1213_v31 = vld [vmem:[%s9421_s11 + $0x1d0] sm:$0xff] }
  0x21   : > { %1640 = vmatpush1.msra.mxu0 %v1175_v35  ;;  %1717 = vmatpush1.msra.mxu1 %v1169_v44  ;;  %v4803_v28 = vld [vmem:[%s5129_s19 + $0xe8] sm:$0xff]   ;;  %v4804_v35 = vld [vmem:[%s5129_s19 + $0xf0] sm:$0xff]  }
  0x22   : > { %1641 = vmatprep.subr.mxu0 %v1174_v37  ;;  %1718 = vmatprep.subr.mxu1 %v1168_v46 }
  0x23   : > { %1642 = vmatpush1.msra.mxu0 %v1173_v38  ;;  %1719 = vmatpush1.msra.mxu1 %v1167_v47  ;;  %v1211_v38 = vld [vmem:[%s9421_s11 + $0x1c0] sm:$0xff] }
  0x24   : > { %1643 = vmatprep.subr.mxu0 %v1172_v40  ;;  %1720 = vmatprep.subr.mxu1 %v1166_v49 }
  0x25   : > { %1644 = vmatpush1.msra.mxu0 %v1171_v41  ;;  %1721 = vmatpush1.msra.mxu1 %v1165_v50 }
  0x26   : > { %4495 = vmatmul.mubr.msk.bf16.gmra.mxu0 %vm698_vm1, %v4776_v9  ;;  %1645 = vmatprep.subr.mxu0 %v1170_v43  ;;  %v1210_v43 = vld [vmem:[%s9421_s11 + $0x1b8] sm:$0xff] }
  0x27   : > { %864 = vmatprep.mubr.bf16.mxu0 %v9424_v4  ;;  %1646 = vmatpush1.msra.mxu0 %v1169_v44 }
  0x28   : > { %1647 = vmatprep.subr.mxu0 %v1168_v46  ;;  %1722 = vmatprep.subr.mxu1 %v1164_v52 }
  0x29   : > { %1648 = vmatpush1.msra.mxu0 %v1167_v47  ;;  %1723 = vmatpush1.msra.mxu1 %v1163_v53 }
  0x2a   : > { %1649 = vmatprep.subr.mxu0 %v1166_v49  ;;  %1724 = vmatprep.subr.mxu1 %v1162_v55  ;;  %v1208_v49 = vld [vmem:[%s9421_s11 + $0x1a8] sm:$0xff] }
  0x2b   : > { %1650 = vmatpush1.msra.mxu0 %v1165_v50  ;;  %1725 = vmatpush1.msra.mxu1 %v1161_v56 }
  0x2c   : > { %1651 = vmatprep.subr.mxu0 %v1164_v52  ;;  %1726 = vmatprep.subr.mxu1 %v1160_v58 }
  0x2d   : > { %1652 = vmatpush1.msra.mxu0 %v1163_v53  ;;  %1727 = vmatpush1.msra.mxu1 %v1159_v59 }
  0x2e   : > { %4496 = vmatmul.mubr.msk.bf16.gmra.mxu0 %vm698_vm1, %v4777_v10  ;;  %1653 = vmatprep.subr.mxu0 %v1162_v55  ;;  %v1155_v10 = vld [vmem:[%s9421_s11] sm:$0xff]  ;;  %v1206_v55 = vld [vmem:[%s9421_s11 + $0x198] sm:$0xff] }
  0x2f   : > { %874 = vmatprep.mubr.bf16.mxu0 %v9424_v4  ;;  %1654 = vmatpush1.msra.mxu0 %v1161_v56 }
  0x30   : > { %1655 = vmatprep.subr.mxu0 %v1160_v58  ;;  %1728 = vmatprep.subr.mxu1 %v1158_v0 }
  0x31   : > { %1656 = vmatpush1.msra.mxu0 %v1159_v59  ;;  %1729 = vmatpush1.msra.mxu1 %v1157_v2 }
  0x32   : > { %1657 = vmatprep.subr.mxu0 %v1158_v0  ;;  %1730 = vmatprep.subr.mxu1 %v1156_v8  ;;  %v1204_v0 = vld [vmem:[%s9421_s11 + $0x188] sm:$0xff] }
  0x33   : > { %1658 = vmatpush1.msra.mxu0 %v1157_v2  ;;  %1731 = vmatpush1.msra.mxu1 %v1155_v10 }
  0x34   : > { %1659 = vmatprep.subr.mxu0 %v1156_v8 }
  0x35   : > { %1660 = vmatpush1.msra.mxu0 %v1155_v10 }
  0x36   : > { %4497 = vmatmul.mubr.msk.bf16.gmra.mxu0 %vm698_vm1, %v4778_v11 }
  0x37   : > { %884 = vmatprep.mubr.bf16.mxu0 %v9424_v4 }
  0x3e   : > { %4498 = vmatmul.mubr.msk.bf16.gmra.mxu0 %vm698_vm1, %v4779_v12 }
  0x3f   : > { %894 = vmatprep.mubr.bf16.mxu0 %v9424_v4 }
  0x46   : > { %4499 = vmatmul.mubr.msk.bf16.gmra.mxu0 %vm698_vm1, %v4780_v13 }
  0x47   : > { %904 = vmatprep.mubr.bf16.mxu0 %v9424_v4 }
  0x4e   : > { %4500 = vmatmul.mubr.msk.bf16.gmra.mxu0 %vm698_vm1, %v4781_v14  ;;  %v4801_v14 = vld [vmem:[%s5129_s19 + $0xd8] sm:$0xff]  }
  0x4f   : > { %914 = vmatprep.mubr.bf16.mxu0 %v9424_v4 }
  0x56   : > { %4501 = vmatmul.mubr.msk.bf16.gmra.mxu0 %vm698_vm1, %v4782_v15  ;;  %v1218_v15 = vld [vmem:[%s9421_s11 + $0x1f8] sm:$0xff] }
  0x57   : > { %924 = vmatprep.mubr.bf16.mxu0 %v9424_v4  ;;  %1661 = vmatprep.subr.mxu0 %v1218_v15 }
  0x58   : > { %1732 = vmatprep.subr.mxu1 %v1218_v15  ;;  %v1202_v15 = vld [vmem:[%s9421_s11 + $0x178] sm:$0xff] }
  0x5e   : > { %4502 = vmatmul.mubr.msk.bf16.gmra.mxu0 %vm698_vm1, %v4783_v16 }
  0x5f   : > { %934 = vmatprep.mubr.bf16.mxu0 %v9424_v4 }
  0x66   : > { %4503 = vmatmul.mubr.msk.bf16.gmra.mxu0 %vm698_vm1, %v4784_v17  ;;  %v1217_v17 = vld [vmem:[%s9421_s11 + $0x1f0] sm:$0xff] }
  0x67   : > { %944 = vmatprep.mubr.bf16.mxu0 %v9424_v4  ;;  %1733 = vmatpush2.msra.mxu1 %v1217_v17 }
  0x68   : > { %1662 = vmatpush2.msra.mxu0 %v1217_v17  ;;  %1734 = vmatprep.subr.mxu1 %v1216_v22 }
  0x69   : > { %1663 = vmatprep.subr.mxu0 %v1216_v22 }
  0x6e   : > { %4504 = vmatmul.mubr.msk.bf16.gmra.mxu0 %vm698_vm1, %v4785_v18 }
  0x6f   : > { %954 = vmatprep.mubr.bf16.mxu0 %v9424_v4 }
  0x76   : > { %4505 = vmatmul.mubr.msk.bf16.gmra.mxu0 %vm698_vm1, %v4786_v21  ;;  %v4802_v21 = vld [vmem:[%s5129_s19 + $0xe0] sm:$0xff]  }
  0x77   : > { %964 = vmatprep.mubr.bf16.mxu0 %v9424_v4 }
  0x7e   : > { %4506 = vmatmul.mubr.msk.bf16.gmra.mxu0 %vm698_vm1, %v4787_v24  ;;  %v1215_v24 = vld [vmem:[%s9421_s11 + $0x1e0] sm:$0xff] }
  0x7f   : > { %974 = vmatprep.mubr.bf16.mxu0 %v9424_v4  ;;  %1735 = vmatpush2.msra.mxu1 %v1215_v24 }
  0x80   : > { %1664 = vmatpush2.msra.mxu0 %v1215_v24  ;;  %1736 = vmatprep.subr.mxu1 %v1214_v29 }
  0x81   : > { %1665 = vmatprep.subr.mxu0 %v1214_v29  ;;  %1737 = vmatpush2.msra.mxu1 %v1213_v31  ;;  %v1200_v29 = vld [vmem:[%s9421_s11 + $0x168] sm:$0xff] }
  0x82   : > { %1666 = vmatpush2.msra.mxu0 %v1213_v31 }
  0x86   : > { %4507 = vmatmul.mubr.msk.bf16.gmra.mxu0 %vm698_vm1, %v4788_v27 }
  0x87   : > { %984 = vmatprep.mubr.bf16.mxu0 %v9424_v4 }
  0x8e   : > { %4508 = vmatmul.mubr.msk.bf16.gmra.mxu0 %vm698_vm1, %v4789_v30 }
  0x8f   : > { %994 = vmatprep.mubr.bf16.mxu0 %v9424_v4 }
  0x96   : > { %4509 = vmatmul.mubr.msk.bf16.gmra.mxu0 %vm698_vm1, %v4790_v33 }
  0x97   : > { %1004 = vmatprep.mubr.bf16.mxu0 %v9424_v4 }
  0x9e   : > { %4510 = vmatmul.mubr.msk.bf16.gmra.mxu0 %vm698_vm1, %v4791_v36  ;;  %v1212_v36 = vld [vmem:[%s9421_s11 + $0x1c8] sm:$0xff] }
  0x9f   : > { %1014 = vmatprep.mubr.bf16.mxu0 %v9424_v4  ;;  %1667 = vmatprep.subr.mxu0 %v1212_v36 }
  0xa0   : > { %1738 = vmatprep.subr.mxu1 %v1212_v36  ;;  %1668 = vmatpush2.msra.mxu0 %v1211_v38 }
  0xa1   : > { %1739 = vmatpush2.msra.mxu1 %v1211_v38  ;;  %1669 = vmatprep.subr.mxu0 %v1210_v43 }
  0xa2   : > { %1740 = vmatprep.subr.mxu1 %v1210_v43  ;;  %v1198_v43 = vld [vmem:[%s9421_s11 + $0x158] sm:$0xff] }
  0xa6   : > { %4511 = vmatmul.mubr.msk.bf16.gmra.mxu0 %vm698_vm1, %v4792_v39 }
  0xa7   : > { %1024 = vmatprep.mubr.bf16.mxu0 %v9424_v4 }
  0xae   : > { %4512 = vmatmul.mubr.msk.bf16.gmra.mxu0 %vm698_vm1, %v4793_v42  ;;  %v4805_v42 = vld [vmem:[%s5129_s19 + $0xf8] sm:$0xff]  }
  0xaf   : > { %1034 = vmatprep.mubr.bf16.mxu0 %v9424_v4 }
  0xb6   : > { %4513 = vmatmul.mubr.msk.bf16.gmra.mxu0 %vm698_vm1, %v4794_v45  ;;  %v1209_v45 = vld [vmem:[%s9421_s11 + $0x1b0] sm:$0xff] }
  0xb7   : > { %1044 = vmatprep.mubr.bf16.mxu0 %v9424_v4  ;;  %1741 = vmatpush2.msra.mxu1 %v1209_v45 }
  0xb8   : > { %1670 = vmatpush2.msra.mxu0 %v1209_v45  ;;  %1742 = vmatprep.subr.mxu1 %v1208_v49 }
  0xb9   : > { %1671 = vmatprep.subr.mxu0 %v1208_v49  ;;  %v1197_v49 = vld [vmem:[%s9421_s11 + $0x150] sm:$0xff] }
  0xbe   : > { %4514 = vmatmul.mubr.msk.bf16.gmra.mxu0 %vm698_vm1, %v4795_v48 }
  0xbf   : > { %1054 = vmatprep.mubr.bf16.mxu0 %v9424_v4 }
  0xc6   : > { %4515 = vmatmul.mubr.msk.bf16.gmra.mxu0 %vm698_vm1, %v4796_v51  ;;  %v1207_v51 = vld [vmem:[%s9421_s11 + $0x1a0] sm:$0xff] }
  0xc7   : > { %1064 = vmatprep.mubr.bf16.mxu0 %v9424_v4  ;;  %1672 = vmatpush2.msra.mxu0 %v1207_v51 }
  0xc8   : > { %1743 = vmatpush2.msra.mxu1 %v1207_v51  ;;  %1673 = vmatprep.subr.mxu0 %v1206_v55 }
  0xc9   : > { %1744 = vmatprep.subr.mxu1 %v1206_v55 }
  0xce   : > { %4516 = vmatmul.mubr.msk.bf16.gmra.mxu0 %vm698_vm1, %v4797_v54 }
  0xcf   : > { %1074 = vmatprep.mubr.bf16.mxu0 %v9424_v4 }
  0xd6   : > { %v5288_v60 = vpop.f32.mrf.mxu0  ;;  %4517 = vmatmul.mubr.msk.bf16.gmra.mxu0 %vm698_vm1, %v4798_v57  ;;  %v1205_v57 = vld [vmem:[%s9421_s11 + $0x190] sm:$0xff] }
  0xd7   : > { %1084 = vmatprep.mubr.bf16.mxu0 %v9424_v4  ;;  %1674 = vmatpush2.msra.mxu0 %v1205_v57 }
  0xd8   : > { %v5292_v61 = vpop.f32.mrf.mxu0  ;;  %1745 = vmatpush2.msra.mxu1 %v1205_v57  ;;  %1675 = vmatprep.subr.mxu0 %v1204_v0  ;;  %v513_v57 = vlaneseq }
  0xd9   : > { %1746 = vmatprep.subr.mxu1 %v1204_v0 }
  0xda   : > { %v5294_v62 = vpop.f32.mrf.mxu0 }
  0xdc   : > { %v5300_v1 = vpop.f32.mrf.mxu0 }
  0xde   : > { %v5305_v3 = vpop.f32.mrf.mxu0  ;;  %4518 = vmatmul.mubr.msk.bf16.gmra.mxu0 %vm698_vm1, %v4799_v63 }
  0xdf   : > { %1094 = vmatprep.mubr.bf16.mxu0 %v9424_v4 }
  0xe0   : > { %v5309_v5 = vpop.f32.mrf.mxu0 }
  0xe2   : > { %v5311_v6 = vpop.f32.mrf.mxu0 }
  0xe4   : > { %v5317_v9 = vpop.f32.mrf.mxu0 }
  0xe6   : > { %v5322_v11 = vpop.f32.mrf.mxu0  ;;  %4519 = vmatmul.mubr.msk.bf16.gmra.mxu0 %vm698_vm1, %v4800_v7  ;;  %v1203_v7 = vld [vmem:[%s9421_s11 + $0x180] sm:$0xff] }
  0xe7   : > { %1104 = vmatprep.mubr.bf16.mxu0 %v9424_v4  ;;  %1676 = vmatpush2.msra.mxu0 %v1203_v7 }
  0xe8   : > { %v5326_v12 = vpop.f32.mrf.mxu0  ;;  %1747 = vmatpush2.msra.mxu1 %v1203_v7  ;;  %1677 = vmatprep.subr.mxu0 %v1202_v15  ;;  %v1196_v7 = vld [vmem:[%s9421_s11 + $0x148] sm:$0xff] }
  0xe9   : > { %1748 = vmatprep.subr.mxu1 %v1202_v15 }
  0xea   : > { %v5328_v13 = vpop.f32.mrf.mxu0 }
  0xec   : > { %v5334_v16 = vpop.f32.mrf.mxu0 }
  0xee   : > { %v5339_v18 = vpop.f32.mrf.mxu0  ;;  %4520 = vmatmul.mubr.msk.bf16.gmra.mxu0 %vm698_vm1, %v4801_v14 }
  0xef   : > { %1114 = vmatprep.mubr.bf16.mxu0 %v9424_v4 }
  0xf0   : > { %v5343_v19 = vpop.f32.mrf.mxu0 }
  0xf2   : > { %v5345_v20 = vpop.f32.mrf.mxu0 }
  0xf4   : > { %v5351_v23 = vpop.f32.mrf.mxu0 }
  0xf6   : > { %v5356_v25 = vpop.f32.mrf.mxu0  ;;  %4521 = vmatmul.mubr.msk.bf16.gmra.mxu0 %vm698_vm1, %v4802_v21  ;;  %v1201_v21 = vld [vmem:[%s9421_s11 + $0x170] sm:$0xff] }
  0xf7   : > { %1124 = vmatprep.mubr.bf16.mxu0 %v9424_v4  ;;  %1678 = vmatpush2.msra.mxu0 %v1201_v21 }
  0xf8   : > { %v5360_v26 = vpop.f32.mrf.mxu0  ;;  %1749 = vmatpush2.msra.mxu1 %v1201_v21  ;;  %1679 = vmatprep.subr.mxu0 %v1200_v29  ;;  %v1195_v21 = vld [vmem:[%s9421_s11 + $0x140] sm:$0xff] }
  0xf9   : > { %1750 = vmatprep.subr.mxu1 %v1200_v29  ;;  %v514_v29 = vshrl.u32 %v513_v57, 7  ;;  %v1194_v57 = vld [vmem:[%s9421_s11 + $0x138] sm:$0xff] }
  0xfa   : > { %v5362_v27 = vpop.f32.mrf.mxu0 }
  0xfc   : > { %v5368_v30 = vpop.f32.mrf.mxu0 }
  0xfe   : > { %v5373_v32 = vpop.f32.mrf.mxu0  ;;  %4522 = vmatmul.mubr.msk.bf16.gmra.mxu0 %vm698_vm1, %v4803_v28 }
  0xff   : > { %1134 = vmatprep.mubr.bf16.mxu0 %v9424_v4 }
 0x100   : > { %v5377_v33 = vpop.f32.mrf.mxu0 }
 0x102   : > { %v5379_v34 = vpop.f32.mrf.mxu0 }
 0x104   : > { %v5385_v37 = vpop.f32.mrf.mxu0 }
 0x106   : > { %v5390_v39 = vpop.f32.mrf.mxu0  ;;  %4523 = vmatmul.mubr.msk.bf16.gmra.mxu0 %vm698_vm1, %v4804_v35  ;;  %v1199_v35 = vld [vmem:[%s9421_s11 + $0x160] sm:$0xff] }
 0x107   : > { %1144 = vmatprep.mubr.bf16.mxu0 %v9424_v4  ;;  %1680 = vmatpush2.msra.mxu0 %v1199_v35 }
 0x108   : > { %v5394_v40 = vpop.f32.mrf.mxu0  ;;  %1751 = vmatpush2.msra.mxu1 %v1199_v35  ;;  %1681 = vmatprep.subr.mxu0 %v1198_v43 }
 0x109   : > { %1752 = vmatprep.subr.mxu1 %v1198_v43  ;;  %1682 = vmatpush2.msra.mxu0 %v1197_v49 }
 0x10a   : > { %v5396_v41 = vpop.f32.mrf.mxu0  ;;  %1753 = vmatpush2.msra.mxu1 %v1197_v49  ;;  %1683 = vmatprep.subr.mxu0 %v1196_v7  ;;  %v5510_v49 = vsub.s32 0, %v514_v29 }
 0x10b   : > { %1754 = vmatprep.subr.mxu1 %v1196_v7  ;;  %1684 = vmatpush2.msra.mxu0 %v1195_v21  ;;  %v5517_v7 = vsub.s32 1, %v514_v29 }
 0x10c   : > { %v5402_v44 = vpop.f32.mrf.mxu0  ;;  %1755 = vmatpush2.msra.mxu1 %v1195_v21  ;;  %9634 = vst [vmem:[#allocation11_spill] sm:$0xff] %v5510_v49  ;;  %1685 = vmatprep.subr.mxu0 %v1194_v57  ;;  %v1193_v21 = vld [vmem:[%s9421_s11 + $0x130] sm:$0xff] }
 0x10d   : > { %9636 = vst [vmem:[#allocation13_spill] sm:$0xff] %v5517_v7  ;;  %1756 = vmatprep.subr.mxu1 %v1194_v57  ;;  %1686 = vmatpush2.msra.mxu0 %v1193_v21 }
 0x10e   : > { %v5407_v46 = vpop.f32.mrf.mxu0  ;;  %4524 = vmatmul.mubr.msk.bf16.gmra.mxu0 %vm698_vm1, %v4805_v42  ;;  %1757 = vmatpush2.msra.mxu1 %v1193_v21 }
 0x110   : > { %v5410_v47 = vpop.f32.mrf.mxu0 }
 0x112   : > { %v5412_v48 = vpop.f32.mrf.mxu0 }
 0x114   : > { %v5417_v50 = vpop.f32.mrf.mxu0 }
 0x116   : > { %v5422_v52 = vpop.f32.mrf.mxu0 }
 0x118   : > { %v5424_v53 = vpop.f32.mrf.mxu0 }
 0x11a   : > { %v5426_v54 = vpop.f32.mrf.mxu0 }
 0x11c   : > { %v5431_v56 = vpop.f32.mrf.mxu0 }
 0x11e   : > { %v5436_v58 = vpop.f32.mrf.mxu0 }
 0x120   : > { %v5438_v59 = vpop.f32.mrf.mxu0 }
 0x122   : > { %v5440_v63 = vpop.f32.mrf.mxu0 }
 0x124   : > { %v5445_v2 = vpop.f32.mrf.mxu0 }
 0x126   : > { %v5450_v8 = vpop.f32.mrf.mxu0 }
 0x128   : > { %v5452_v10 = vpop.f32.mrf.mxu0 }
 0x12a   : > { %v5454_v14 = vpop.f32.mrf.mxu0 }
 0x12c   : > { %v5459_v17 = vpop.f32.mrf.mxu0 }
 0x12e   : > { %v5464_v22 = vpop.f32.mrf.mxu0 }
 0x130   : > { %v5466_v24 = vpop.f32.mrf.mxu0 }
 0x132   : > { %v5468_v28 = vpop.f32.mrf.mxu0 }
 0x134   : > { %v5473_v31 = vpop.f32.mrf.mxu0 }
 0x136   : > { %v5478_v36 = vpop.f32.mrf.mxu0 }
 0x138   : > { %v5480_v38 = vpop.f32.mrf.mxu0 }
 0x139   : > { %9625 = vst [vmem:[#allocation2_spill] sm:$0xff] %v5480_v38 }
 0x13a   : > { %v5482_v42 = vpop.f32.mrf.mxu0 }
 0x13b   : > { %9626 = vst [vmem:[#allocation3_spill] sm:$0xff] %v5482_v42 }
 0x13c   : > { %v5487_v45 = vpop.f32.mrf.mxu0 }
 0x13d   : > { %9627 = vst [vmem:[#allocation4_spill] sm:$0xff] %v5487_v45 }
 0x13e   : > { %v5492_v51 = vpop.f32.mrf.mxu0 }
 0x13f   : > { %9628 = vst [vmem:[#allocation5_spill] sm:$0xff] %v5492_v51 }
 0x140   : > { %v5494_v55 = vpop.f32.mrf.mxu0 }
 0x141   : > { %9629 = vst [vmem:[#allocation6_spill] sm:$0xff] %v5494_v55 }
 0x142   : > { %v5496_v0 = vpop.f32.mrf.mxu0 }
 0x143   : > { %9630 = vst [vmem:[#allocation7_spill] sm:$0xff] %v5496_v0 }
 0x144   : > { %v5501_v15 = vpop.f32.mrf.mxu0 }
 0x145   : > { %9631 = vst [vmem:[#allocation8_spill] sm:$0xff] %v5501_v15  ;;  %v511_v15 = vld [vmem:[%s9412_s2] sm:$0x3] }
 0x146   : > { %v5506_v35 = vpop.f32.mrf.mxu0  ;;  %v5533_v29 = vrot.slane %v511_v15, %v5517_v7 }
 0x147   : > { %9632 = vst [vmem:[#allocation9_spill] sm:$0xff] %v5506_v35 }
 0x148   : > { %v5508_v43 = vpop.f32.mrf.mxu0  ;;  %v5543_v57 = vadd.f32 %v5300_v1, %v5533_v29  ;;  %v5561_v7 = vadd.f32 %v5309_v5, %v5533_v29  ;;  %v1192_v1 = vld [vmem:[%s9421_s11 + $0x128] sm:$0xff]  ;;  %v5578_v5 = vadd.f32 %v5317_v9, %v5533_v29  ;;  %v5601_v45 = vadd.f32 %v5326_v12, %v5533_v29 }
 0x149   : > { %9633 = vst [vmem:[#allocation10_spill] sm:$0xff] %v5508_v43  ;;  %1687 = vmatprep.subr.mxu0 %v1192_v1  ;;  %1758 = vmatprep.subr.mxu1 %v1192_v1 }
 0x14a   : > { %v5512_v4 = vpop.f32.mrf.mxu0  ;;  %9641 = vst [vmem:[#allocation18_spill] sm:$0xff] %v5543_v57  ;;  %9646 = vst [vmem:[#allocation23_spill] sm:$0xff] %v5561_v7  ;;  %v1366_v51 = vmul.f32 %v5561_v7, %v5561_v7  ;;  %v1368_v12 = vmul.f32 %v5578_v5, %v5578_v5 }
 0x14b   : > { %9635 = vst [vmem:[#allocation12_spill] sm:$0xff] %v5512_v4  ;;  %v5528_v4 = vrot.slane %v511_v15, %v5510_v49  ;;  %9649 = vst [vmem:[#allocation26_spill] sm:$0xff] %v5578_v5 }
 0x14c   : > { %v5522_v0 = vpop.f32.mrf.mxu0  ;;  %9652 = vst [vmem:[#allocation29_spill] sm:$0xff] %v5601_v45 }
 0x14d   : > { %9637 = vst [vmem:[#allocation14_spill] sm:$0xff] %v5522_v0  ;;  %v5537_v35 = vadd.f32 %v5294_v62, %v5528_v4  ;;  %v5547_v49 = vadd.f32 %v5288_v60, %v5528_v4  ;;  %v5551_v21 = vadd.f32 %v5305_v3, %v5528_v4  ;;  %v5557_v62 = vadd.f32 %v5292_v61, %v5533_v29 }
 0x14e   : > { %v5530_v43 = vpop.f32.mrf.mxu0  ;;  %v5570_v3 = vadd.f32 %v5311_v6, %v5528_v4  ;;  %v1364_v61 = vmul.f32 %v5543_v57, %v5543_v57  ;;  %v5589_v1 = vadd.f32 %v5322_v11, %v5528_v4 }
 0x14f   : > { %9638 = vst [vmem:[#allocation15_spill] sm:$0xff] %v5530_v43  ;;  %9639 = vst [vmem:[#allocation16_spill] sm:$0xff] %v5537_v35  ;;  %v1363_v60 = vmul.f32 %v5537_v35, %v5537_v35  ;;  %v1361_v43 = vmul.f32 %v5547_v49, %v5547_v49  ;;  %v1365_v6 = vmul.f32 %v5551_v21, %v5551_v21 }
 0x150   : > { %v5539_v0 = vpop.f32.mrf.mxu0  ;;  %9642 = vst [vmem:[#allocation19_spill] sm:$0xff] %v5547_v49  ;;  %9643 = vst [vmem:[#allocation20_spill] sm:$0xff] %v5551_v21  ;;  %v1362_v9 = vmul.f32 %v5557_v62, %v5557_v62  ;;  %v1221_v55 = vadd.f32 %v5537_v35, %v5547_v49  ;;  %v1290_v11 = vadd.f32 %v5543_v57, %v5557_v62 }
 0x151   : > { %9640 = vst [vmem:[#allocation17_spill] sm:$0xff] %v5539_v0  ;;  %9645 = vst [vmem:[#allocation22_spill] sm:$0xff] %v5557_v62  ;;  %v1191_v0 = vld [vmem:[%s9421_s11 + $0x120] sm:$0xff]  ;;  %v1489_v42 = vadd.f32 %v1363_v60, %v1361_v43  ;;  %v5618_v43 = vadd.f32 %v5334_v16, %v5533_v29  ;;  %v1369_v62 = vmul.f32 %v5589_v1, %v5589_v1 }
 0x152   : > { %v5553_v15 = vpop.f32.mrf.mxu0  ;;  %9647 = vst [vmem:[#allocation24_spill] sm:$0xff] %v5570_v3  ;;  %9650 = vst [vmem:[#allocation27_spill] sm:$0xff] %v5589_v1  ;;  %1688 = vmatpush2.msra.mxu0 %v1191_v0  ;;  %1759 = vmatpush2.msra.mxu1 %v1191_v0  ;;  %v1367_v0 = vmul.f32 %v5570_v3, %v5570_v3  ;;  %v1558_v35 = vadd.f32 %v1364_v61, %v1362_v9 }
 0x153   : > { %9644 = vst [vmem:[#allocation21_spill] sm:$0xff] %v5553_v15  ;;  %v1222_v49 = vadd.f32 %v1221_v55, %v5551_v21  ;;  %9654 = vst [vmem:[#allocation31_spill] sm:$0xff] %v5618_v43  ;;  %v1490_v60 = vadd.f32 %v1489_v42, %v1365_v6  ;;  %v1291_v57 = vadd.f32 %v1290_v11, %v5561_v7 }
 0x154   : > { %v5572_v15 = vpop.f32.mrf.mxu0  ;;  %v1559_v55 = vadd.f32 %v1558_v35, %v1366_v51  ;;  %v1370_v21 = vmul.f32 %v5601_v45, %v5601_v45  ;;  %v5634_v16 = vadd.f32 %v5343_v19, %v5533_v29  ;;  %v1372_v7 = vmul.f32 %v5618_v43, %v5618_v43 }
 0x155   : > { %9648 = vst [vmem:[#allocation25_spill] sm:$0xff] %v5572_v15  ;;  %v1223_v9 = vadd.f32 %v1222_v49, %v5570_v3  ;;  %v1491_v42 = vadd.f32 %v1490_v60, %v1367_v0  ;;  %v1292_v6 = vadd.f32 %v1291_v57, %v5578_v5  ;;  %v5650_v19 = vadd.f32 %v5351_v23, %v5533_v29 }
 0x156   : > { %v5591_v15 = vpop.f32.mrf.mxu0  ;;  %9656 = vst [vmem:[#allocation33_spill] sm:$0xff] %v5634_v16  ;;  %v1560_v35 = vadd.f32 %v1559_v55, %v1368_v12  ;;  %v1374_v55 = vmul.f32 %v5634_v16, %v5634_v16 }
 0x157   : > { %9651 = vst [vmem:[#allocation28_spill] sm:$0xff] %v5591_v15  ;;  %v5609_v15 = vadd.f32 %v5328_v13, %v5528_v4  ;;  %v5625_v13 = vadd.f32 %v5339_v18, %v5528_v4  ;;  %v5641_v18 = vadd.f32 %v5345_v20, %v5528_v4  ;;  %v1224_v49 = vadd.f32 %v1223_v9, %v5589_v1 }
 0x158   : > { %v5611_v38 = vpop.f32.mrf.mxu0  ;;  %9658 = vst [vmem:[#allocation35_spill] sm:$0xff] %v5650_v19  ;;  %v1492_v57 = vadd.f32 %v1491_v42, %v1369_v62  ;;  %v1293_v0 = vadd.f32 %v1292_v6, %v5601_v45  ;;  %v1561_v5 = vadd.f32 %v1560_v35, %v1370_v21  ;;  %v5662_v9 = vadd.f32 %v5356_v25, %v5528_v4 }
 0x159   : > { %9653 = vst [vmem:[#allocation30_spill] sm:$0xff] %v5609_v15  ;;  %9655 = vst [vmem:[#allocation32_spill] sm:$0xff] %v5625_v13  ;;  %v1371_v11 = vmul.f32 %v5609_v15, %v5609_v15  ;;  %v1373_v60 = vmul.f32 %v5625_v13, %v5625_v13  ;;  %v1225_v12 = vadd.f32 %v1224_v49, %v5609_v15 }
 0x15a   : > { %v5627_v61 = vpop.f32.mrf.mxu0  ;;  %9657 = vst [vmem:[#allocation34_spill] sm:$0xff] %v5641_v18  ;;  %9659 = vst [vmem:[#allocation36_spill] sm:$0xff] %v5662_v9  ;;  %v1294_v62 = vadd.f32 %v1293_v0, %v5618_v43  ;;  %v1375_v42 = vmul.f32 %v5641_v18, %v5641_v18  ;;  %v5669_v6 = vadd.f32 %v5360_v26, %v5533_v29 }
 0x15b   : > { %v1493_v23 = vadd.f32 %v1492_v57, %v1371_v11  ;;  %v1562_v35 = vadd.f32 %v1561_v5, %v1372_v7  ;;  %v1226_v49 = vadd.f32 %v1225_v12, %v5625_v13  ;;  %v1376_v45 = vmul.f32 %v5650_v19, %v5650_v19 }
 0x15c   : > { %v5643_v51 = vpop.f32.mrf.mxu0  ;;  %9660 = vst [vmem:[#allocation37_spill] sm:$0xff] %v5669_v6  ;;  %v5678_v25 = vadd.f32 %v5362_v27, %v5528_v4  ;;  %v1295_v57 = vadd.f32 %v1294_v62, %v5634_v16  ;;  %v5683_v0 = vadd.f32 %v5368_v30, %v5533_v29  ;;  %v1377_v5 = vmul.f32 %v5662_v9, %v5662_v9  ;;  %v1190_v27 = vld [vmem:[%s9421_s11 + $0x118] sm:$0xff]  ;;  %v1189_v30 = vld [vmem:[%s9421_s11 + $0x110] sm:$0xff] }
 0x15d   : > { %v1494_v11 = vadd.f32 %v1493_v23, %v1373_v60  ;;  %v1563_v43 = vadd.f32 %v1562_v35, %v1374_v55  ;;  %v1227_v7 = vadd.f32 %v1226_v49, %v5641_v18  ;;  %v5692_v12 = vadd.f32 %v5373_v32, %v5528_v4  ;;  %v1188_v60 = vld [vmem:[%s9421_s11 + $0x108] sm:$0xff]  ;;  %1689 = vmatprep.subr.mxu0 %v1190_v27  ;;  %v1187_v35 = vld [vmem:[%s9421_s11 + $0x100] sm:$0xff] }
 0x15e   : > { %v5655_v20 = vpop.f32.mrf.mxu0  ;;  %9661 = vst [vmem:[#allocation38_spill] sm:$0xff] %v5678_v25  ;;  %9662 = vst [vmem:[#allocation39_spill] sm:$0xff] %v5683_v0  ;;  %v1378_v23 = vmul.f32 %v5669_v6, %v5669_v6  ;;  %v5707_v32 = vadd.f32 %v5377_v33, %v5533_v29  ;;  %1760 = vmatprep.subr.mxu1 %v1190_v27  ;;  %v1296_v49 = vadd.f32 %v1295_v57, %v5650_v19 }
 0x15f   : > { %9663 = vst [vmem:[#allocation40_spill] sm:$0xff] %v5692_v12  ;;  %v1495_v55 = vadd.f32 %v1494_v11, %v1375_v42  ;;  %v1564_v18 = vadd.f32 %v1563_v43, %v1376_v45  ;;  %v1379_v42 = vmul.f32 %v5678_v25, %v5678_v25  ;;  %v5719_v11 = vadd.f32 %v5379_v34, %v5528_v4 }
 0x160   : > { %v5671_v21 = vpop.f32.mrf.mxu0  ;;  %9664 = vst [vmem:[#allocation41_spill] sm:$0xff] %v5707_v32  ;;  %1690 = vmatpush2.msra.mxu0 %v1189_v30  ;;  %v1228_v33 = vadd.f32 %v1227_v7, %v5662_v9  ;;  %v1380_v13 = vmul.f32 %v5683_v0, %v5683_v0  ;;  %v5726_v16 = vadd.f32 %v5385_v37, %v5533_v29 }
 0x161   : > { %9665 = vst [vmem:[#allocation42_spill] sm:$0xff] %v5719_v11  ;;  %1691 = vmatprep.subr.mxu0 %v1188_v60  ;;  %1761 = vmatpush2.msra.mxu1 %v1189_v30  ;;  %v1496_v45 = vadd.f32 %v1495_v55, %v1377_v5  ;;  %v1297_v43 = vadd.f32 %v1296_v49, %v5669_v6 }
 0x162   : > { %v5685_v26 = vpop.f32.mrf.mxu0  ;;  %9666 = vst [vmem:[#allocation43_spill] sm:$0xff] %v5726_v16  ;;  %v1381_v34 = vmul.f32 %v5692_v12, %v5692_v12  ;;  %v5735_v57 = vadd.f32 %v5390_v39, %v5528_v4  ;;  %1692 = vmatpush2.msra.mxu0 %v1187_v35  ;;  %v1565_v7 = vadd.f32 %v1564_v18, %v1378_v23 }
 0x163   : > { %v1229_v9 = vadd.f32 %v1228_v33, %v5678_v25  ;;  %v1382_v37 = vmul.f32 %v5707_v32, %v5707_v32  ;;  %v5742_v30 = vadd.f32 %v5394_v40, %v5533_v29  ;;  %1762 = vmatprep.subr.mxu1 %v1188_v60  ;;  %v1497_v55 = vadd.f32 %v1496_v45, %v1379_v42 }
 0x164   : > { %v5709_v62 = vpop.f32.mrf.mxu0  ;;  %9667 = vst [vmem:[#allocation44_spill] sm:$0xff] %v5735_v57  ;;  %v1298_v49 = vadd.f32 %v1297_v43, %v5683_v0  ;;  %v1383_v39 = vmul.f32 %v5719_v11, %v5719_v11  ;;  %v5751_v18 = vadd.f32 %v5396_v41, %v5528_v4  ;;  %1763 = vmatpush2.msra.mxu1 %v1187_v35  ;;  %v9671_v45 = vmov 0  }
 0x165   : > { %9668 = vst [vmem:[#allocation45_spill] sm:$0xff] %v5742_v30  ;;  %v1566_v23 = vadd.f32 %v1565_v7, %v1380_v13  ;;  %v1230_v33 = vadd.f32 %v1229_v9, %v5692_v12  ;;  %v1384_v40 = vmul.f32 %v5726_v16, %v5726_v16  ;;  %v5758_v60 = vadd.f32 %v5402_v44, %v5533_v29 }
 0x166   : > { %v5728_v27 = vpop.f32.mrf.mxu0  ;;  %9669 = vst [vmem:[#allocation46_spill] sm:$0xff] %v5751_v18  ;;  %2722 = vmatprep.subr.bf16.mxu1 %v9671_v45  ;;  %v1498_v43 = vadd.f32 %v1497_v55, %v1381_v34  ;;  %v1299_v25 = vadd.f32 %v1298_v49, %v5707_v32  ;;  %v1385_v41 = vmul.f32 %v5735_v57, %v5735_v57 }
 0x167   : > { %9670 = vst [vmem:[#allocation47_spill] sm:$0xff] %v5758_v60  ;;  %v5768_v13 = vadd.f32 %v5407_v46, %v5528_v4  ;;  %v1567_v9 = vadd.f32 %v1566_v23, %v1382_v37  ;;  %v1231_v35 = vadd.f32 %v1230_v33, %v5719_v11  ;;  %v1386_v44 = vmul.f32 %v5742_v30, %v5742_v30 }
 0x168   : > { %v5744_v5 = vpop.f32.mrf.mxu0  ;;  %v5775_v7 = vadd.f32 %v5410_v47, %v5533_v29  ;;  %v1499_v55 = vadd.f32 %v1498_v43, %v1383_v39  ;;  %v1300_v49 = vadd.f32 %v1299_v25, %v5726_v16  ;;  %v1387_v32 = vmul.f32 %v5751_v18, %v5751_v18 }
 0x169   : > { %9672 = vst [vmem:[#allocation48_spill] sm:$0xff] %v5768_v13  ;;  %v5784_v46 = vadd.f32 %v5412_v48, %v5528_v4  ;;  %v1568_v37 = vadd.f32 %v1567_v9, %v1384_v40  ;;  %v1232_v23 = vadd.f32 %v1231_v35, %v5735_v57  ;;  %v1388_v33 = vmul.f32 %v5758_v60, %v5758_v60 }
 0x16a   : > { %v5760_v42 = vpop.f32.mrf.mxu0  ;;  %9673 = vst [vmem:[#allocation49_spill] sm:$0xff] %v5775_v7  ;;  %v5791_v47 = vadd.f32 %v5417_v50, %v5533_v29  ;;  %v1500_v25 = vadd.f32 %v1499_v55, %v1385_v41  ;;  %v1301_v43 = vadd.f32 %v1300_v49, %v5742_v30  ;;  %v1389_v16 = vmul.f32 %v5768_v13, %v5768_v13 }
 0x16b   : > { %9674 = vst [vmem:[#allocation50_spill] sm:$0xff] %v5784_v46  ;;  %v5800_v48 = vadd.f32 %v5422_v52, %v5528_v4  ;;  %v1569_v40 = vadd.f32 %v1568_v37, %v1386_v44  ;;  %v1233_v9 = vadd.f32 %v1232_v23, %v5751_v18  ;;  %v1390_v35 = vmul.f32 %v5775_v7, %v5775_v7 }
 0x16c   : > { %v5777_v34 = vpop.f32.mrf.mxu0  ;;  %9675 = vst [vmem:[#allocation51_spill] sm:$0xff] %v5791_v47  ;;  %v5807_v50 = vadd.f32 %v5424_v53, %v5533_v29  ;;  %v1501_v55 = vadd.f32 %v1500_v25, %v1387_v32  ;;  %v1302_v49 = vadd.f32 %v1301_v43, %v5758_v60  ;;  %v1391_v30 = vmul.f32 %v5784_v46, %v5784_v46 }
 0x16d   : > { %v5816_v52 = vadd.f32 %v5426_v54, %v5528_v4  ;;  %v1570_v44 = vadd.f32 %v1569_v40, %v1388_v33  ;;  %v1234_v37 = vadd.f32 %v1233_v9, %v5768_v13  ;;  %v1392_v23 = vmul.f32 %v5791_v47, %v5791_v47 }
 0x16e   : > { %v5793_v39 = vpop.f32.mrf.mxu0  ;;  %9676 = vst [vmem:[#allocation52_spill] sm:$0xff] %v5807_v50  ;;  %v5823_v53 = vadd.f32 %v5431_v56, %v5533_v29  ;;  %v1502_v25 = vadd.f32 %v1501_v55, %v1389_v16  ;;  %v1303_v43 = vadd.f32 %v1302_v49, %v5775_v7  ;;  %v1393_v60 = vmul.f32 %v5800_v48, %v5800_v48 }
 0x16f   : > { %v5832_v54 = vadd.f32 %v5436_v58, %v5528_v4  ;;  %v1571_v33 = vadd.f32 %v1570_v44, %v1390_v35  ;;  %v1235_v40 = vadd.f32 %v1234_v37, %v5784_v46  ;;  %v1394_v9 = vmul.f32 %v5807_v50, %v5807_v50 }
 0x170   : > { %v5809_v41 = vpop.f32.mrf.mxu0  ;;  %9677 = vst [vmem:[#allocation53_spill] sm:$0xff] %v5823_v53  ;;  %v5839_v56 = vadd.f32 %v5438_v59, %v5533_v29  ;;  %v1503_v55 = vadd.f32 %v1502_v25, %v1391_v30  ;;  %v1304_v49 = vadd.f32 %v1303_v43, %v5791_v47  ;;  %v1395_v7 = vmul.f32 %v5816_v52, %v5816_v52 }
 0x171   : > { %v5848_v58 = vadd.f32 %v5440_v63, %v5528_v4  ;;  %v1572_v35 = vadd.f32 %v1571_v33, %v1392_v23  ;;  %v1236_v44 = vadd.f32 %v1235_v40, %v5800_v48  ;;  %v1396_v37 = vmul.f32 %v5823_v53, %v5823_v53 }
 0x172   : > { %v5825_v32 = vpop.f32.mrf.mxu0  ;;  %9678 = vst [vmem:[#allocation54_spill] sm:$0xff] %v5839_v56  ;;  %v5855_v59 = vadd.f32 %v5445_v2, %v5533_v29  ;;  %v1504_v25 = vadd.f32 %v1503_v55, %v1393_v60  ;;  %v1305_v43 = vadd.f32 %v1304_v49, %v5807_v50  ;;  %v1397_v47 = vmul.f32 %v5832_v54, %v5832_v54 }
 0x173   : > { %v5864_v63 = vadd.f32 %v5450_v8, %v5528_v4  ;;  %v1573_v23 = vadd.f32 %v1572_v35, %v1394_v9  ;;  %v1237_v33 = vadd.f32 %v1236_v44, %v5816_v52  ;;  %v1398_v40 = vmul.f32 %v5839_v56, %v5839_v56 }
 0x174   : > { %v5841_v16 = vpop.f32.mrf.mxu0  ;;  %9679 = vst [vmem:[#allocation55_spill] sm:$0xff] %v5855_v59  ;;  %v5871_v2 = vadd.f32 %v5452_v10, %v5533_v29  ;;  %v1505_v55 = vadd.f32 %v1504_v25, %v1395_v7  ;;  %v1306_v49 = vadd.f32 %v1305_v43, %v5823_v53  ;;  %v1399_v50 = vmul.f32 %v5848_v58, %v5848_v58 }
 0x175   : > { %v5880_v8 = vadd.f32 %v5454_v14, %v5528_v4  ;;  %v1574_v9 = vadd.f32 %v1573_v23, %v1396_v37  ;;  %v1238_v35 = vadd.f32 %v1237_v33, %v5832_v54  ;;  %v1400_v44 = vmul.f32 %v5855_v59, %v5855_v59 }
 0x176   : > { %v5857_v30 = vpop.f32.mrf.mxu0  ;;  %9680 = vst [vmem:[#allocation56_spill] sm:$0xff] %v5871_v2  ;;  %v5887_v10 = vadd.f32 %v5459_v17, %v5533_v29  ;;  %v1506_v25 = vadd.f32 %v1505_v55, %v1397_v47  ;;  %v1307_v43 = vadd.f32 %v1306_v49, %v5839_v56  ;;  %v1401_v53 = vmul.f32 %v5864_v63, %v5864_v63 }
 0x177   : > { %v5896_v14 = vadd.f32 %v5464_v22, %v5528_v4  ;;  %v1575_v37 = vadd.f32 %v1574_v9, %v1398_v40  ;;  %v1239_v23 = vadd.f32 %v1238_v35, %v5848_v58  ;;  %v1402_v33 = vmul.f32 %v5871_v2, %v5871_v2 }
 0x178   : > { %v5873_v60 = vpop.f32.mrf.mxu0  ;;  %9681 = vst [vmem:[#allocation57_spill] sm:$0xff] %v5887_v10  ;;  %v5903_v17 = vadd.f32 %v5466_v24, %v5533_v29  ;;  %v1507_v55 = vadd.f32 %v1506_v25, %v1399_v50  ;;  %v1308_v49 = vadd.f32 %v1307_v43, %v5855_v59  ;;  %v1403_v46 = vmul.f32 %v5880_v8, %v5880_v8 }
 0x179   : > { %9682 = vst [vmem:[#allocation58_spill] sm:$0xff] %v5896_v14  ;;  %v5912_v22 = vadd.f32 %v5468_v28, %v5528_v4  ;;  %v1576_v40 = vadd.f32 %v1575_v37, %v1400_v44  ;;  %v1240_v9 = vadd.f32 %v1239_v23, %v5864_v63  ;;  %v1404_v35 = vmul.f32 %v5887_v10, %v5887_v10 }
 0x17a   : > { %v5889_v7 = vpop.f32.mrf.mxu0  ;;  %9683 = vst [vmem:[#allocation59_spill] sm:$0xff] %v5903_v17  ;;  %v5919_v24 = vadd.f32 %v5473_v31, %v5533_v29  ;;  %v1508_v25 = vadd.f32 %v1507_v55, %v1401_v53  ;;  %v1309_v43 = vadd.f32 %v1308_v49, %v5871_v2  ;;  %v1405_v13 = vmul.f32 %v5896_v14, %v5896_v14  ;;  %v9687_v31 = vld [vmem:[#allocation2_spill] sm:$0xff] }
 0x17b   : > { %9684 = vst [vmem:[#allocation60_spill] sm:$0xff] %v5912_v22  ;;  %v5928_v28 = vadd.f32 %v5478_v36, %v5528_v4  ;;  %v1577_v44 = vadd.f32 %v1576_v40, %v1402_v33  ;;  %v1241_v37 = vadd.f32 %v1240_v9, %v5880_v8  ;;  %v1406_v23 = vmul.f32 %v5903_v17, %v5903_v17  ;;  %v9689_v36 = vld [vmem:[#allocation3_spill] sm:$0xff] }
 0x17c   : > { %v5905_v47 = vpop.f32.mrf.mxu0  ;;  %9685 = vst [vmem:[#allocation61_spill] sm:$0xff] %v5919_v24  ;;  %v5935_v18 = vadd.f32 %v9687_v31, %v5533_v29  ;;  %v1509_v55 = vadd.f32 %v1508_v25, %v1403_v46  ;;  %v1310_v49 = vadd.f32 %v1309_v43, %v5887_v10  ;;  %v1407_v57 = vmul.f32 %v5912_v22, %v5912_v22  ;;  %v9691_v31 = vld [vmem:[#allocation4_spill] sm:$0xff] }
 0x17d   : > { %9686 = vst [vmem:[#allocation62_spill] sm:$0xff] %v5928_v28  ;;  %v5944_v33 = vadd.f32 %v9689_v36, %v5528_v4  ;;  %v1578_v40 = vadd.f32 %v1577_v44, %v1404_v35  ;;  %v1242_v9 = vadd.f32 %v1241_v37, %v5896_v14  ;;  %v1408_v11 = vmul.f32 %v5919_v24, %v5919_v24  ;;  %v9693_v36 = vld [vmem:[#allocation5_spill] sm:$0xff] }
 0x17e   : > { %v5921_v50 = vpop.f32.mrf.mxu0  ;;  %9688 = vst [vmem:[#allocation2_spill] sm:$0xff] %v5935_v18  ;;  %v5951_v12 = vadd.f32 %v9691_v31, %v5533_v29  ;;  %v1510_v25 = vadd.f32 %v1509_v55, %v1405_v13  ;;  %v1311_v43 = vadd.f32 %v1310_v49, %v5903_v17  ;;  %v1409_v0 = vmul.f32 %v5928_v28, %v5928_v28  ;;  %v9695_v31 = vld [vmem:[#allocation6_spill] sm:$0xff] }
 0x17f   : > { %9690 = vst [vmem:[#allocation3_spill] sm:$0xff] %v5944_v33  ;;  %v5960_v35 = vadd.f32 %v9693_v36, %v5528_v4  ;;  %v1579_v44 = vadd.f32 %v1578_v40, %v1406_v23  ;;  %v1243_v37 = vadd.f32 %v1242_v9, %v5912_v22  ;;  %v1410_v6 = vmul.f32 %v5935_v18, %v5935_v18  ;;  %v9697_v36 = vld [vmem:[#allocation7_spill] sm:$0xff] }
 0x180   : > { %v5937_v53 = vpop.f32.mrf.mxu0  ;;  %9692 = vst [vmem:[#allocation4_spill] sm:$0xff] %v5951_v12  ;;  %v5967_v10 = vadd.f32 %v9695_v31, %v5533_v29  ;;  %v1511_v55 = vadd.f32 %v1510_v25, %v1407_v57  ;;  %v1312_v49 = vadd.f32 %v1311_v43, %v5919_v24  ;;  %v1411_v17 = vmul.f32 %v5944_v33, %v5944_v33  ;;  %v9699_v31 = vld [vmem:[#allocation8_spill] sm:$0xff] }
 0x181   : > { %9694 = vst [vmem:[#allocation5_spill] sm:$0xff] %v5960_v35  ;;  %v5976_v23 = vadd.f32 %v9697_v36, %v5528_v4  ;;  %v1580_v40 = vadd.f32 %v1579_v44, %v1408_v11  ;;  %v1244_v9 = vadd.f32 %v1243_v37, %v5928_v28  ;;  %v1412_v2 = vmul.f32 %v5951_v12, %v5951_v12  ;;  %v9701_v36 = vld [vmem:[#allocation9_spill] sm:$0xff] }
 0x182   : > { %v5953_v46 = vpop.f32.mrf.mxu0  ;;  %9696 = vst [vmem:[#allocation6_spill] sm:$0xff] %v5967_v10  ;;  %v5983_v59 = vadd.f32 %v9699_v31, %v5533_v29  ;;  %v1512_v25 = vadd.f32 %v1511_v55, %v1409_v0  ;;  %v1313_v43 = vadd.f32 %v1312_v49, %v5935_v18  ;;  %v1413_v24 = vmul.f32 %v5960_v35, %v5960_v35  ;;  %v9703_v31 = vld [vmem:[#allocation10_spill] sm:$0xff] }
 0x183   : > { %9698 = vst [vmem:[#allocation7_spill] sm:$0xff] %v5976_v23  ;;  %v5992_v11 = vadd.f32 %v9701_v36, %v5528_v4  ;;  %v1581_v44 = vadd.f32 %v1580_v40, %v1410_v6  ;;  %v1245_v37 = vadd.f32 %v1244_v9, %v5944_v33  ;;  %v1414_v56 = vmul.f32 %v5967_v10, %v5967_v10  ;;  %v9705_v36 = vld [vmem:[#allocation12_spill] sm:$0xff] }
 0x184   : > { %v5969_v13 = vpop.f32.mrf.mxu0  ;;  %9700 = vst [vmem:[#allocation8_spill] sm:$0xff] %v5983_v59  ;;  %v5999_v19 = vadd.f32 %v9703_v31, %v5533_v29  ;;  %v1513_v55 = vadd.f32 %v1512_v25, %v1411_v17  ;;  %v1314_v49 = vadd.f32 %v1313_v43, %v5951_v12  ;;  %v1415_v18 = vmul.f32 %v5976_v23, %v5976_v23  ;;  %v9706_v31 = vld [vmem:[#allocation14_spill] sm:$0xff] }
 0x185   : > { %9702 = vst [vmem:[#allocation9_spill] sm:$0xff] %v5992_v11  ;;  %v6008_v6 = vadd.f32 %v9705_v36, %v5528_v4  ;;  %v1582_v40 = vadd.f32 %v1581_v44, %v1412_v2  ;;  %v1246_v9 = vadd.f32 %v1245_v37, %v5960_v35  ;;  %v1416_v33 = vmul.f32 %v5983_v59, %v5983_v59  ;;  %v9708_v36 = vld [vmem:[#allocation15_spill] sm:$0xff] }
 0x186   : > { %v5985_v57 = vpop.f32.mrf.mxu0  ;;  %9704 = vst [vmem:[#allocation10_spill] sm:$0xff] %v5999_v19  ;;  %v6015_v28 = vadd.f32 %v9706_v31, %v5533_v29  ;;  %v1514_v25 = vadd.f32 %v1513_v55, %v1413_v24  ;;  %v1315_v43 = vadd.f32 %v1314_v49, %v5967_v10  ;;  %v1417_v12 = vmul.f32 %v5992_v11, %v5992_v11  ;;  %v9709_v31 = vld [vmem:[#allocation17_spill] sm:$0xff] }
 0x187   : > { %v6024_v2 = vadd.f32 %v9708_v36, %v5528_v4  ;;  %v1583_v44 = vadd.f32 %v1582_v40, %v1414_v56  ;;  %v1247_v37 = vadd.f32 %v1246_v9, %v5976_v23  ;;  %v1418_v35 = vmul.f32 %v5999_v19, %v5999_v19  ;;  %v9711_v36 = vld [vmem:[#allocation21_spill] sm:$0xff] }
 0x188   : > { %v6001_v0 = vpop.f32.mrf.mxu0  ;;  %9707 = vst [vmem:[#allocation12_spill] sm:$0xff] %v6015_v28  ;;  %v6031_v22 = vadd.f32 %v9709_v31, %v5533_v29  ;;  %v1515_v55 = vadd.f32 %v1514_v25, %v1415_v18  ;;  %v1316_v49 = vadd.f32 %v1315_v43, %v5983_v59  ;;  %v1419_v10 = vmul.f32 %v6008_v6, %v6008_v6  ;;  %v9712_v31 = vld [vmem:[#allocation25_spill] sm:$0xff] }
 0x189   : > { %v6040_v56 = vadd.f32 %v9711_v36, %v5528_v4  ;;  %v1584_v40 = vadd.f32 %v1583_v44, %v1416_v33  ;;  %v1248_v9 = vadd.f32 %v1247_v37, %v5992_v11  ;;  %v1420_v23 = vmul.f32 %v6015_v28, %v6015_v28  ;;  %v9714_v36 = vld [vmem:[#allocation28_spill] sm:$0xff] }
 0x18a   : > { %v6017_v17 = vpop.f32.mrf.mxu0  ;;  %9710 = vst [vmem:[#allocation14_spill] sm:$0xff] %v6031_v22  ;;  %v6047_v14 = vadd.f32 %v9712_v31, %v5533_v29  ;;  %v1516_v25 = vadd.f32 %v1515_v55, %v1417_v12  ;;  %v1317_v43 = vadd.f32 %v1316_v49, %v5999_v19  ;;  %v1421_v59 = vmul.f32 %v6024_v2, %v6024_v2 }
 0x18b   : > { %v6056_v33 = vadd.f32 %v9714_v36, %v5528_v4  ;;  %v1585_v44 = vadd.f32 %v1584_v40, %v1418_v35  ;;  %v1249_v37 = vadd.f32 %v1248_v9, %v6008_v6  ;;  %v1422_v11 = vmul.f32 %v6031_v22, %v6031_v22 }
 0x18c   : > { %v6033_v24 = vpop.f32.mrf.mxu0  ;;  %9713 = vst [vmem:[#allocation15_spill] sm:$0xff] %v6047_v14  ;;  %v6063_v31 = vadd.f32 %v5611_v38, %v5533_v29  ;;  %v1517_v55 = vadd.f32 %v1516_v25, %v1419_v10  ;;  %v1318_v49 = vadd.f32 %v1317_v43, %v6015_v28  ;;  %v1423_v19 = vmul.f32 %v6040_v56, %v6040_v56 }
 0x18d   : > { %v6072_v35 = vadd.f32 %v5627_v61, %v5528_v4  ;;  %v1586_v40 = vadd.f32 %v1585_v44, %v1420_v23  ;;  %v1250_v9 = vadd.f32 %v1249_v37, %v6024_v2  ;;  %v1424_v36 = vmul.f32 %v6047_v14, %v6047_v14 }
 0x18e   : > { %v6049_v18 = vpop.f32.mrf.mxu0  ;;  %9715 = vst [vmem:[#allocation17_spill] sm:$0xff] %v6063_v31  ;;  %v6079_v38 = vadd.f32 %v5643_v51, %v5533_v29  ;;  %v1518_v25 = vadd.f32 %v1517_v55, %v1421_v59  ;;  %v1319_v43 = vadd.f32 %v1318_v49, %v6031_v22  ;;  %v1425_v28 = vmul.f32 %v6056_v33, %v6056_v33 }
 0x18f   : > { %v6088_v61 = vadd.f32 %v5655_v20, %v5528_v4  ;;  %v1587_v23 = vadd.f32 %v1586_v40, %v1422_v11  ;;  %v1251_v44 = vadd.f32 %v1250_v9, %v6040_v56  ;;  %v1426_v37 = vmul.f32 %v6063_v31, %v6063_v31 }
 0x190   : > { %v6065_v12 = vpop.f32.mrf.mxu0  ;;  %9716 = vst [vmem:[#allocation21_spill] sm:$0xff] %v6079_v38  ;;  %v6095_v51 = vadd.f32 %v5671_v21, %v5533_v29  ;;  %v1519_v55 = vadd.f32 %v1518_v25, %v1423_v19  ;;  %v1320_v49 = vadd.f32 %v1319_v43, %v6047_v14  ;;  %v1427_v22 = vmul.f32 %v6072_v35, %v6072_v35 }
 0x191   : > { %v6104_v20 = vadd.f32 %v5685_v26, %v5528_v4  ;;  %v1588_v11 = vadd.f32 %v1587_v23, %v1424_v36  ;;  %v1252_v40 = vadd.f32 %v1251_v44, %v6056_v33  ;;  %v1428_v9 = vmul.f32 %v6079_v38, %v6079_v38 }
 0x192   : > { %v6081_v10 = vpop.f32.mrf.mxu0  ;;  %9717 = vst [vmem:[#allocation25_spill] sm:$0xff] %v6095_v51  ;;  %v6111_v21 = vadd.f32 %v5709_v62, %v5533_v29  ;;  %v1520_v25 = vadd.f32 %v1519_v55, %v1425_v28  ;;  %v1321_v43 = vadd.f32 %v1320_v49, %v6063_v31  ;;  %v1429_v14 = vmul.f32 %v6088_v61, %v6088_v61 }
 0x193   : > { %v6120_v26 = vadd.f32 %v5728_v27, %v5528_v4  ;;  %v1589_v36 = vadd.f32 %v1588_v11, %v1426_v37  ;;  %v1253_v23 = vadd.f32 %v1252_v40, %v6072_v35  ;;  %v1430_v44 = vmul.f32 %v6095_v51, %v6095_v51 }
 0x194   : > { %v6097_v59 = vpop.f32.mrf.mxu0  ;;  %9718 = vst [vmem:[#allocation28_spill] sm:$0xff] %v6111_v21  ;;  %v6127_v62 = vadd.f32 %v5744_v5, %v5533_v29  ;;  %v1521_v55 = vadd.f32 %v1520_v25, %v1427_v22  ;;  %v1322_v49 = vadd.f32 %v1321_v43, %v6079_v38  ;;  %v1431_v31 = vmul.f32 %v6104_v20, %v6104_v20 }
 0x195   : > { %v6136_v27 = vadd.f32 %v5760_v42, %v5528_v4  ;;  %v1590_v37 = vadd.f32 %v1589_v36, %v1428_v9  ;;  %v1254_v11 = vadd.f32 %v1253_v23, %v6088_v61  ;;  %v1432_v40 = vmul.f32 %v6111_v21, %v6111_v21 }
 0x196   : > { %v6113_v19 = vpop.f32.mrf.mxu0  ;;  %9719 = vst [vmem:[#allocation63_spill] sm:$0xff] %v6127_v62  ;;  %v6143_v5 = vadd.f32 %v5777_v34, %v5533_v29  ;;  %v1522_v25 = vadd.f32 %v1521_v55, %v1429_v14  ;;  %v1323_v43 = vadd.f32 %v1322_v49, %v6095_v51  ;;  %v1433_v38 = vmul.f32 %v6120_v26, %v6120_v26 }
 0x197   : > { %v6152_v42 = vadd.f32 %v5793_v39, %v5528_v4  ;;  %v1591_v9 = vadd.f32 %v1590_v37, %v1430_v44  ;;  %v1255_v36 = vadd.f32 %v1254_v11, %v6104_v20  ;;  %v1434_v23 = vmul.f32 %v6127_v62, %v6127_v62 }
 0x198   : > { %v6129_v28 = vpop.f32.mrf.mxu0  ;;  %9720 = vst [vmem:[#allocation64_spill] sm:$0xff] %v6143_v5  ;;  %v6159_v34 = vadd.f32 %v5809_v41, %v5533_v29  ;;  %v1523_v55 = vadd.f32 %v1522_v25, %v1431_v31  ;;  %v1324_v49 = vadd.f32 %v1323_v43, %v6111_v21  ;;  %v1435_v51 = vmul.f32 %v6136_v27, %v6136_v27 }
 0x199   : > { %v6168_v39 = vadd.f32 %v5825_v32, %v5528_v4  ;;  %v1592_v44 = vadd.f32 %v1591_v9, %v1432_v40  ;;  %v1256_v37 = vadd.f32 %v1255_v36, %v6120_v26  ;;  %v1436_v11 = vmul.f32 %v6143_v5, %v6143_v5 }
 0x19a   : > { %v6145_v22 = vpop.f32.mrf.mxu0  ;;  %9721 = vst [vmem:[#allocation65_spill] sm:$0xff] %v6159_v34  ;;  %v6175_v41 = vadd.f32 %v5841_v16, %v5533_v29  ;;  %v1524_v25 = vadd.f32 %v1523_v55, %v1433_v38  ;;  %v1325_v43 = vadd.f32 %v1324_v49, %v6127_v62  ;;  %v1437_v21 = vmul.f32 %v6152_v42, %v6152_v42 }
 0x19b   : > { %v6184_v32 = vadd.f32 %v5857_v30, %v5528_v4  ;;  %v1593_v40 = vadd.f32 %v1592_v44, %v1434_v23  ;;  %v1257_v9 = vadd.f32 %v1256_v37, %v6136_v27  ;;  %v1438_v36 = vmul.f32 %v6159_v34, %v6159_v34 }
 0x19c   : > { %v6161_v14 = vpop.f32.mrf.mxu0  ;;  %9722 = vst [vmem:[#allocation66_spill] sm:$0xff] %v6175_v41  ;;  %v6191_v16 = vadd.f32 %v5873_v60, %v5533_v29  ;;  %v1525_v55 = vadd.f32 %v1524_v25, %v1435_v51  ;;  %v1326_v49 = vadd.f32 %v1325_v43, %v6143_v5  ;;  %v1439_v62 = vmul.f32 %v6168_v39, %v6168_v39 }
 0x19d   : > { %v6200_v30 = vadd.f32 %v5889_v7, %v5528_v4  ;;  %v1594_v23 = vadd.f32 %v1593_v40, %v1436_v11  ;;  %v1258_v44 = vadd.f32 %v1257_v9, %v6152_v42  ;;  %v1440_v37 = vmul.f32 %v6175_v41, %v6175_v41 }
 0x19e   : > { %v6177_v31 = vpop.f32.mrf.mxu0  ;;  %9723 = vst [vmem:[#allocation67_spill] sm:$0xff] %v6191_v16  ;;  %v6207_v60 = vadd.f32 %v5905_v47, %v5533_v29  ;;  %v1526_v25 = vadd.f32 %v1525_v55, %v1437_v21  ;;  %v1327_v43 = vadd.f32 %v1326_v49, %v6159_v34  ;;  %v1441_v5 = vmul.f32 %v6184_v32, %v6184_v32 }
 0x19f   : > { %v6216_v7 = vadd.f32 %v5921_v50, %v5528_v4  ;;  %v1595_v11 = vadd.f32 %v1594_v23, %v1438_v36  ;;  %v1259_v40 = vadd.f32 %v1258_v44, %v6168_v39  ;;  %v1442_v9 = vmul.f32 %v6191_v16, %v6191_v16 }
 0x1a0   : > { %v6193_v38 = vpop.f32.mrf.mxu0  ;;  %9724 = vst [vmem:[#allocation68_spill] sm:$0xff] %v6207_v60  ;;  %v6223_v47 = vadd.f32 %v5937_v53, %v5533_v29  ;;  %v1527_v55 = vadd.f32 %v1526_v25, %v1439_v62  ;;  %v1328_v49 = vadd.f32 %v1327_v43, %v6175_v41  ;;  %v1443_v34 = vmul.f32 %v6200_v30, %v6200_v30 }
 0x1a1   : > { %v6232_v50 = vadd.f32 %v5953_v46, %v5528_v4  ;;  %v1596_v36 = vadd.f32 %v1595_v11, %v1440_v37  ;;  %v1260_v23 = vadd.f32 %v1259_v40, %v6184_v32  ;;  %v1444_v44 = vmul.f32 %v6207_v60, %v6207_v60 }
 0x1a2   : > { %v6209_v51 = vpop.f32.mrf.mxu0  ;;  %9725 = vst [vmem:[#allocation69_spill] sm:$0xff] %v6223_v47  ;;  %v6239_v53 = vadd.f32 %v5969_v13, %v5533_v29  ;;  %v1528_v25 = vadd.f32 %v1527_v55, %v1441_v5  ;;  %v1329_v43 = vadd.f32 %v1328_v49, %v6191_v16  ;;  %v1445_v41 = vmul.f32 %v6216_v7, %v6216_v7 }
 0x1a3   : > { %v6248_v46 = vadd.f32 %v5985_v57, %v5528_v4  ;;  %v1597_v37 = vadd.f32 %v1596_v36, %v1442_v9  ;;  %v1261_v11 = vadd.f32 %v1260_v23, %v6200_v30  ;;  %v1446_v40 = vmul.f32 %v6223_v47, %v6223_v47 }
 0x1a4   : > { %v6225_v21 = vpop.f32.mrf.mxu0  ;;  %9726 = vst [vmem:[#allocation70_spill] sm:$0xff] %v6239_v53  ;;  %v6255_v13 = vadd.f32 %v6001_v0, %v5533_v29  ;;  %v1529_v55 = vadd.f32 %v1528_v25, %v1443_v34  ;;  %v1330_v49 = vadd.f32 %v1329_v43, %v6207_v60  ;;  %v1447_v16 = vmul.f32 %v6232_v50, %v6232_v50 }
 0x1a5   : > { %v6264_v57 = vadd.f32 %v6017_v17, %v5528_v4  ;;  %v1598_v9 = vadd.f32 %v1597_v37, %v1444_v44  ;;  %v1262_v36 = vadd.f32 %v1261_v11, %v6216_v7  ;;  %v1448_v23 = vmul.f32 %v6239_v53, %v6239_v53 }
 0x1a6   : > { %v6241_v62 = vpop.f32.mrf.mxu0  ;;  %9727 = vst [vmem:[#allocation71_spill] sm:$0xff] %v6255_v13  ;;  %v6271_v0 = vadd.f32 %v6033_v24, %v5533_v29  ;;  %v1530_v25 = vadd.f32 %v1529_v55, %v1445_v41  ;;  %v1331_v43 = vadd.f32 %v1330_v49, %v6223_v47  ;;  %v1449_v60 = vmul.f32 %v6248_v46, %v6248_v46 }
 0x1a7   : > { %v6280_v17 = vadd.f32 %v6049_v18, %v5528_v4  ;;  %v1599_v44 = vadd.f32 %v1598_v9, %v1446_v40  ;;  %v1263_v37 = vadd.f32 %v1262_v36, %v6232_v50  ;;  %v1450_v11 = vmul.f32 %v6255_v13, %v6255_v13 }
 0x1a8   : > { %v6257_v5 = vpop.f32.mrf.mxu0  ;;  %9728 = vst [vmem:[#allocation72_spill] sm:$0xff] %v6271_v0  ;;  %v6287_v24 = vadd.f32 %v6065_v12, %v5533_v29  ;;  %v1531_v55 = vadd.f32 %v1530_v25, %v1447_v16  ;;  %v1332_v49 = vadd.f32 %v1331_v43, %v6239_v53  ;;  %v1451_v47 = vmul.f32 %v6264_v57, %v6264_v57 }
 0x1a9   : > { %v6294_v18 = vadd.f32 %v6081_v10, %v5528_v4  ;;  %v1600_v40 = vadd.f32 %v1599_v44, %v1448_v23  ;;  %v1264_v9 = vadd.f32 %v1263_v37, %v6248_v46  ;;  %v1452_v36 = vmul.f32 %v6271_v0, %v6271_v0 }
 0x1aa   : > { %v6273_v34 = vpop.f32.mrf.mxu0  ;;  %9729 = vst [vmem:[#allocation73_spill] sm:$0xff] %v6287_v24  ;;  %v6301_v12 = vadd.f32 %v6097_v59, %v5533_v29  ;;  %v1532_v25 = vadd.f32 %v1531_v55, %v1449_v60  ;;  %v1333_v43 = vadd.f32 %v1332_v49, %v6255_v13  ;;  %v1453_v53 = vmul.f32 %v6280_v17, %v6280_v17 }
 0x1ab   : > { %v6308_v10 = vadd.f32 %v6113_v19, %v5528_v4  ;;  %v1601_v23 = vadd.f32 %v1600_v40, %v1450_v11  ;;  %v1265_v44 = vadd.f32 %v1264_v9, %v6264_v57  ;;  %v1454_v37 = vmul.f32 %v6287_v24, %v6287_v24 }
 0x1ac   : > { %v1102_v41 = vpop.f32.mrf.mxu0  ;;  %9730 = vst [vmem:[#allocation74_spill] sm:$0xff] %v6301_v12  ;;  %v6315_v59 = vadd.f32 %v6129_v28, %v5533_v29  ;;  %v1533_v55 = vadd.f32 %v1532_v25, %v1451_v47  ;;  %v1334_v49 = vadd.f32 %v1333_v43, %v6271_v0  ;;  %v1455_v13 = vmul.f32 %v6294_v18, %v6294_v18 }
 0x1ad   : > { %v6322_v19 = vadd.f32 %v6145_v22, %v5528_v4  ;;  %v1602_v11 = vadd.f32 %v1601_v23, %v1452_v36  ;;  %v1266_v40 = vadd.f32 %v1265_v44, %v6280_v17  ;;  %v1456_v9 = vmul.f32 %v6301_v12, %v6301_v12 }
 0x1ae   : > { %v1106_v16 = vpop.f32.mrf.mxu0  ;;  %9731 = vst [vmem:[#allocation75_spill] sm:$0xff] %v6315_v59  ;;  %v6329_v28 = vadd.f32 %v6161_v14, %v5533_v29  ;;  %v1534_v25 = vadd.f32 %v1533_v55, %v1453_v53  ;;  %v1335_v43 = vadd.f32 %v1334_v49, %v6287_v24  ;;  %v1457_v0 = vmul.f32 %v6308_v10, %v6308_v10 }
 0x1af   : > { %9732 = vst [vmem:[#allocation76_spill] sm:$0xff] %v6322_v19  ;;  %v6336_v22 = vadd.f32 %v6177_v31, %v5528_v4  ;;  %v1603_v36 = vadd.f32 %v1602_v11, %v1454_v37  ;;  %v1267_v23 = vadd.f32 %v1266_v40, %v6294_v18  ;;  %v1458_v44 = vmul.f32 %v6315_v59, %v6315_v59 }
 0x1b0   : > { %v1108_v60 = vpop.f32.mrf.mxu0  ;;  %9733 = vst [vmem:[#allocation77_spill] sm:$0xff] %v6329_v28  ;;  %v6343_v14 = vadd.f32 %v6193_v38, %v5533_v29  ;;  %v1535_v55 = vadd.f32 %v1534_v25, %v1455_v13  ;;  %v1336_v49 = vadd.f32 %v1335_v43, %v6301_v12  ;;  %v1459_v24 = vmul.f32 %v6322_v19, %v6322_v19 }
 0x1b1   : > { %9734 = vst [vmem:[#allocation78_spill] sm:$0xff] %v6336_v22  ;;  %v6350_v31 = vadd.f32 %v6209_v51, %v5528_v4  ;;  %v1604_v37 = vadd.f32 %v1603_v36, %v1456_v9  ;;  %v1268_v11 = vadd.f32 %v1267_v23, %v6308_v10  ;;  %v1460_v40 = vmul.f32 %v6329_v28, %v6329_v28 }
 0x1b2   : > { %v1110_v47 = vpop.f32.mrf.mxu0  ;;  %9735 = vst [vmem:[#allocation79_spill] sm:$0xff] %v6343_v14  ;;  %v6357_v38 = vadd.f32 %v6225_v21, %v5533_v29  ;;  %v1536_v25 = vadd.f32 %v1535_v55, %v1457_v0  ;;  %v1337_v43 = vadd.f32 %v1336_v49, %v6315_v59  ;;  %v1461_v12 = vmul.f32 %v6336_v22, %v6336_v22 }
 0x1b3   : > { %v6364_v51 = vadd.f32 %v6241_v62, %v5528_v4  ;;  %v1605_v9 = vadd.f32 %v1604_v37, %v1458_v44  ;;  %v1269_v36 = vadd.f32 %v1268_v11, %v6322_v19  ;;  %v1462_v23 = vmul.f32 %v6343_v14, %v6343_v14 }
 0x1b4   : > { %v1112_v53 = vpop.f32.mrf.mxu0  ;;  %9736 = vst [vmem:[#allocation80_spill] sm:$0xff] %v6357_v38  ;;  %v6371_v21 = vadd.f32 %v6257_v5, %v5533_v29  ;;  %v1537_v55 = vadd.f32 %v1536_v25, %v1459_v24  ;;  %v1338_v49 = vadd.f32 %v1337_v43, %v6329_v28  ;;  %v1463_v59 = vmul.f32 %v6350_v31, %v6350_v31 }
 0x1b5   : > { %9737 = vst [vmem:[#allocation81_spill] sm:$0xff] %v6364_v51  ;;  %v6378_v62 = vadd.f32 %v6273_v34, %v5528_v4  ;;  %v1606_v44 = vadd.f32 %v1605_v9, %v1460_v40  ;;  %v1270_v37 = vadd.f32 %v1269_v36, %v6336_v22  ;;  %v1464_v11 = vmul.f32 %v6357_v38, %v6357_v38 }
 0x1b6   : > { %v1116_v13 = vpop.f32.mrf.mxu0  ;;  %9738 = vst [vmem:[#allocation82_spill] sm:$0xff] %v6371_v21  ;;  %v6384_v5 = vadd.f32 %v1102_v41, %v5533_v29  ;;  %v1538_v24 = vadd.f32 %v1537_v55, %v1461_v12  ;;  %v1465_v25 = vmul.f32 %v6364_v51, %v6364_v51  ;;  %v6389_v43 = vadd.f32 %v1106_v16, %v5528_v4 }
 0x1b7   : > { %v1339_v34 = vadd.f32 %v1338_v49, %v6343_v14  ;;  %v1607_v28 = vadd.f32 %v1606_v44, %v1462_v23  ;;  %v1271_v40 = vadd.f32 %v1270_v37, %v6350_v31  ;;  %v1466_v9 = vmul.f32 %v6371_v21, %v6371_v21 }
 0x1b8   : > { %v1118_v0 = vpop.f32.mrf.mxu0  ;;  %9739 = vst [vmem:[#allocation83_spill] sm:$0xff] %v6384_v5  ;;  %v1539_v22 = vadd.f32 %v1538_v24, %v1463_v59  ;;  %v1467_v41 = vmul.f32 %v6378_v62, %v6378_v62  ;;  %v6398_v12 = vadd.f32 %v1108_v60, %v5533_v29  ;;  %v6401_v55 = vadd.f32 %v1110_v47, %v5528_v4 }
 0x1b9   : > { %v1340_v16 = vadd.f32 %v1339_v34, %v6357_v38  ;;  %v1608_v49 = vadd.f32 %v1607_v28, %v1464_v11  ;;  %v1272_v23 = vadd.f32 %v1271_v40, %v6364_v51  ;;  %v1468_v44 = vmul.f32 %v6384_v5, %v6384_v5 }
 0x1ba   : > { %v1120_v19 = vpop.f32.mrf.mxu0  ;;  %9740 = vst [vmem:[#allocation84_spill] sm:$0xff] %v6398_v12  ;;  %v1540_v14 = vadd.f32 %v1539_v22, %v1465_v25  ;;  %v1469_v59 = vmul.f32 %v6389_v43, %v6389_v43  ;;  %v6410_v24 = vadd.f32 %v1112_v53, %v5533_v29  ;;  %v6413_v60 = vadd.f32 %v1116_v13, %v5528_v4 }
 0x1bb   : > { %v1341_v47 = vadd.f32 %v1340_v16, %v6371_v21  ;;  %v1609_v34 = vadd.f32 %v1608_v49, %v1466_v9  ;;  %v1273_v28 = vadd.f32 %v1272_v23, %v6378_v62  ;;  %v1470_v38 = vmul.f32 %v6398_v12, %v6398_v12 }
 0x1bc   : > { %v1122_v36 = vpop.f32.mrf.mxu0  ;;  %9741 = vst [vmem:[#allocation85_spill] sm:$0xff] %v6410_v24  ;;  %v1541_v40 = vadd.f32 %v1540_v14, %v1467_v41  ;;  %v1471_v22 = vmul.f32 %v6401_v55, %v6401_v55  ;;  %v6422_v25 = vadd.f32 %v1118_v0, %v5533_v29  ;;  %v6426_v51 = vadd.f32 %v1120_v19, %v5528_v4 }
 0x1bd   : > { %v1342_v53 = vadd.f32 %v1341_v47, %v6384_v5  ;;  %v1610_v13 = vadd.f32 %v1609_v34, %v1468_v44  ;;  %v1274_v16 = vadd.f32 %v1273_v28, %v6389_v43  ;;  %v1472_v14 = vmul.f32 %v6410_v24, %v6410_v24 }
 0x1be   : > { %v1126_v37 = vpop.f32.mrf.mxu0  ;;  %9742 = vst [vmem:[#allocation86_spill] sm:$0xff] %v6422_v25  ;;  %9743 = vst [vmem:[#allocation87_spill] sm:$0xff] %v6426_v51  ;;  %v1542_v49 = vadd.f32 %v1541_v40, %v1469_v59  ;;  %v1473_v41 = vmul.f32 %v6413_v60, %v6413_v60  ;;  %v6435_v0 = vadd.f32 %v1122_v36, %v5533_v29 }
 0x1bf   : > { %v1343_v23 = vadd.f32 %v1342_v53, %v6398_v12  ;;  %v6438_v44 = vadd.f32 %v1126_v37, %v5528_v4  ;;  %v1611_v47 = vadd.f32 %v1610_v13, %v1470_v38  ;;  %v1275_v34 = vadd.f32 %v1274_v16, %v6401_v55 }
 0x1c0   : > { %v1128_v11 = vpop.f32.mrf.mxu0  ;;  %9744 = vst [vmem:[#allocation88_spill] sm:$0xff] %v6435_v0  ;;  %v1543_v28 = vadd.f32 %v1542_v49, %v1471_v22  ;;  %v1474_v59 = vmul.f32 %v6422_v25, %v6422_v25  ;;  %v1475_v40 = vmul.f32 %v6426_v51, %v6426_v51  ;;  %v1476_v22 = vmul.f32 %v6435_v0, %v6435_v0 }
 0x1c1   : > { %v6446_v5 = vadd.f32 %v1128_v11, %v5533_v29  ;;  %v1344_v37 = vadd.f32 %v1343_v23, %v6410_v24  ;;  %v1612_v12 = vadd.f32 %v1611_v47, %v1472_v14  ;;  %v1276_v38 = vadd.f32 %v1275_v34, %v6413_v60 }
 0x1c2   : > { %v1130_v9 = vpop.f32.mrf.mxu0  ;;  %v1544_v13 = vadd.f32 %v1543_v28, %v1473_v41  ;;  %v1477_v16 = vmul.f32 %v6438_v44, %v6438_v44 }
 0x1c3   : > { %9745 = vst [vmem:[#allocation89_spill] sm:$0xff] %v6446_v5  ;;  %v6449_v36 = vadd.f32 %v1130_v9, %v5528_v4  ;;  %v1345_v21 = vadd.f32 %v1344_v37, %v6422_v25  ;;  %v1613_v23 = vadd.f32 %v1612_v12, %v1474_v59  ;;  %v1277_v14 = vadd.f32 %v1276_v38, %v6426_v51 }
 0x1c4   : > { %v1132_v19 = vpop.f32.mrf.mxu0  ;;  %v1545_v47 = vadd.f32 %v1544_v13, %v1475_v40  ;;  %v1478_v41 = vmul.f32 %v6446_v5, %v6446_v5 }
 0x1c5   : > { %9746 = vst [vmem:[#allocation90_spill] sm:$0xff] %v6449_v36  ;;  %v6458_v49 = vadd.f32 %v1132_v19, %v5533_v29  ;;  %v1479_v34 = vmul.f32 %v6449_v36, %v6449_v36  ;;  %v1278_v24 = vadd.f32 %v1277_v14, %v6438_v44  ;;  %v1614_v12 = vadd.f32 %v1613_v23, %v1476_v22 }
 0x1c6   : > { %v1136_v53 = vpop.f32.mrf.mxu0  ;;  %v1546_v59 = vadd.f32 %v1545_v47, %v1477_v16 }
 0x1c7   : > { %9747 = vst [vmem:[#allocation91_spill] sm:$0xff] %v6458_v49  ;;  %v6461_v11 = vadd.f32 %v1136_v53, %v5528_v4  ;;  %v1346_v53 = vadd.f32 %v1345_v21, %v6435_v0  ;;  %v1480_v40 = vmul.f32 %v6458_v49, %v6458_v49  ;;  %v1279_v25 = vadd.f32 %v1278_v24, %v6449_v36 }
 0x1c8   : > { %v1138_v9 = vpop.f32.mrf.mxu0  ;;  %v1615_v14 = vadd.f32 %v1614_v12, %v1478_v41  ;;  %v1547_v0 = vadd.f32 %v1546_v59, %v1479_v34 }
 0x1c9   : > { %9748 = vst [vmem:[#allocation92_spill] sm:$0xff] %v6461_v11  ;;  %v6470_v28 = vadd.f32 %v1138_v9, %v5533_v29  ;;  %v1481_v38 = vmul.f32 %v6461_v11, %v6461_v11  ;;  %v1347_v9 = vadd.f32 %v1346_v53, %v6446_v5 }
 0x1ca   : > { %v1140_v19 = vpop.f32.mrf.mxu0  ;;  %v1616_v24 = vadd.f32 %v1615_v14, %v1480_v40 }
 0x1cb   : > { %9749 = vst [vmem:[#allocation93_spill] sm:$0xff] %v6470_v28  ;;  %v6475_v37 = vadd.f32 %v1140_v19, %v5528_v4  ;;  %v1482_v22 = vmul.f32 %v6470_v28, %v6470_v28  ;;  %v1348_v47 = vadd.f32 %v1347_v9, %v6458_v49  ;;  %v1280_v19 = vadd.f32 %v1279_v25, %v6461_v11 }
 0x1cc   : > { %v1142_v13 = vpop.f32.mrf.mxu0  ;;  %v1548_v5 = vadd.f32 %v1547_v0, %v1481_v38 }
 0x1cd   : > { %9750 = vst [vmem:[#allocation94_spill] sm:$0xff] %v6475_v37  ;;  %v6484_v21 = vadd.f32 %v1142_v13, %v5533_v29  ;;  %v1483_v16 = vmul.f32 %v6475_v37, %v6475_v37  ;;  %v1349_v12 = vadd.f32 %v1348_v47, %v6470_v28  ;;  %v1281_v59 = vadd.f32 %v1280_v19, %v6475_v37 }
 0x1ce   : > { %v1146_v23 = vpop.f32.mrf.mxu0  ;;  %v1617_v25 = vadd.f32 %v1616_v24, %v1482_v22 }
 0x1cf   : > { %9751 = vst [vmem:[#allocation95_spill] sm:$0xff] %v6484_v21  ;;  %v6493_v53 = vadd.f32 %v1146_v23, %v5528_v4  ;;  %v1484_v41 = vmul.f32 %v6484_v21, %v6484_v21  ;;  %v1549_v49 = vadd.f32 %v1548_v5, %v1483_v16  ;;  %v1350_v40 = vadd.f32 %v1349_v12, %v6484_v21 }
 0x1d0   : > { %v1148_v34 = vpop.f32.mrf.mxu0 }
 0x1d1   : > { %9752 = vst [vmem:[#allocation96_spill] sm:$0xff] %v6493_v53  ;;  %v1485_v13 = vmul.f32 %v6493_v53, %v6493_v53  ;;  %v6502_v9 = vadd.f32 %v1148_v34, %v5533_v29  ;;  %v1282_v0 = vadd.f32 %v1281_v59, %v6493_v53  ;;  %v1618_v47 = vadd.f32 %v1617_v25, %v1484_v41 }
 0x1d2   : > { %v1150_v23 = vpop.f32.mrf.mxu0 }
 0x1d3   : > { %9753 = vst [vmem:[#allocation97_spill] sm:$0xff] %v6502_v9  ;;  %v1486_v38 = vmul.f32 %v6502_v9, %v6502_v9  ;;  %v6509_v14 = vadd.f32 %v1150_v23, %v5528_v4  ;;  %v1550_v19 = vadd.f32 %v1549_v49, %v1485_v13  ;;  %v1351_v37 = vadd.f32 %v1350_v40, %v6502_v9 }
 0x1d4   : > { %v1152_v28 = vpop.f32.mrf.mxu0 }
 0x1d5   : > { %9754 = vst [vmem:[#allocation98_spill] sm:$0xff] %v6509_v14  ;;  %v1283_v34 = vadd.f32 %v1282_v0, %v6509_v14  ;;  %v1487_v5 = vmul.f32 %v6509_v14, %v6509_v14  ;;  %v6516_v22 = vadd.f32 %v1152_v28, %v5533_v29  ;;  %v1619_v16 = vadd.f32 %v1618_v47, %v1486_v38 }
 0x1d7   : > { %9755 = vst [vmem:[#allocation99_spill] sm:$0xff] %v6516_v22  ;;  %v1284_v24 = vrot.slane %v1283_v34, 4  ;;  %v1551_v12 = vadd.f32 %v1550_v19, %v1487_v5  ;;  %v1352_v59 = vadd.f32 %v1351_v37, %v6516_v22  ;;  %v1488_v4 = vmul.f32 %v6516_v22, %v6516_v22 }
 0x1d9   : > { %v1285_v49 = vadd.f32 %v1284_v24, %v1283_v34  ;;  %v1552_v41 = vrot.slane %v1551_v12, 4  ;;  %v1353_v13 = vrot.slane %v1352_v59, 4  ;;  %v1620_v25 = vadd.f32 %v1619_v16, %v1488_v4 }
 0x1db   : > { %v1286_v23 = vrot.slane %v1285_v49, 2  ;;  %v1354_v40 = vadd.f32 %v1353_v13, %v1352_v59  ;;  %v1621_v0 = vrot.slane %v1620_v25, 4  ;;  %v1553_v9 = vadd.f32 %v1552_v41, %v1551_v12  ;;  %v4813_v41 = vld [vmem:[%s9415_s5] sm:$0xff]   ;;  %v4814_v13 = vld [vmem:[%s9415_s5 + $0x78] sm:$0xff]  }
 0x1dd   : > { %v1287_v21 = vadd.f32 %v1286_v23, %v1285_v49  ;;  %v1355_v14 = vrot.slane %v1354_v40, 2  ;;  %v1622_v29 = vadd.f32 %v1621_v0, %v1620_v25  ;;  %v1554_v28 = vrot.slane %v1553_v9, 2  ;;  %v4806_v49 = vld [vmem:[%s9415_s5 + $0x38] sm:$0xff]   ;;  %v4815_v25 = vld [vmem:[%s9415_s5 + $0x70] sm:$0xff]   ;;  %v4816_v23 = vld [vmem:[%s9415_s5 + $0x68] sm:$0xff]  }
 0x1de   : > { %v4818_v0 = vld [vmem:[%s9415_s5 + $0x58] sm:$0xff]  }
 0x1df   : > { %v1288_v38 = vrot.slane %v1287_v21, 1  ;;  %v1356_v47 = vadd.f32 %v1355_v14, %v1354_v40  ;;  %v1623_v19 = vrot.slane %v1622_v29, 2  ;;  %v1555_v5 = vadd.f32 %v1554_v28, %v1553_v9  ;;  %v4811_v9 = vld [vmem:[%s9415_s5 + $0x10] sm:$0xff]   ;;  %v4817_v40 = vld [vmem:[%s9415_s5 + $0x60] sm:$0xff]   ;;  %v4820_v28 = vld [vmem:[%s9415_s5 + $0x48] sm:$0xff]  }
 0x1e1   : > { %v1357_v37 = vrot.slane %v1356_v47, 1  ;;  %v1624_v53 = vadd.f32 %v1623_v19, %v1622_v29  ;;  %v1556_v11 = vrot.slane %v1555_v5, 1  ;;  %v1289_v22 = vadd.f32 %v1288_v38, %v1287_v21  ;;  %v4807_v21 = vld [vmem:[%s9415_s5 + $0x30] sm:$0xff]   ;;  %v4821_v38 = vld [vmem:[%s9415_s5 + $0x40] sm:$0xff]  }
 0x1e2   : > { %v4819_v29 = vld [vmem:[%s9415_s5 + $0x50] sm:$0xff]  }
 0x1e3   : > { %v1358_v34 = vadd.f32 %v1357_v37, %v1356_v47  ;;  %v1625_v24 = vrot.slane %v1624_v53, 1  ;;  %v1557_v36 = vadd.f32 %v1556_v11, %v1555_v5  ;;  %v1359_v59 = vmul.f32 0.00048828125, %v1289_v22  ;;  %v4808_v11 = vld [vmem:[%s9415_s5 + $0x28] sm:$0xff]   ;;  %v1220_v37 = vld [vmem:[%s9414_s4] sm:$0x3] }
 0x1e4   : > { %v4812_v22 = vld [vmem:[%s9415_s5 + $0x8] sm:$0xff]  }
 0x1e5   : > { %v1360_v16 = vmul.f32 0.00048828125, %v1358_v34  ;;  %v1626_v4 = vadd.f32 %v1625_v24, %v1624_v53  ;;  %v1627_v14 = vmul.f32 0.00048828125, %v1557_v36  ;;  %v4809_v36 = vld [vmem:[%s9415_s5 + $0x20] sm:$0xff]   ;;  %v4810_v53 = vld [vmem:[%s9415_s5 + $0x18] sm:$0xff]   ;;  %v9756_v34 = vld [vmem:[#allocation11_spill] sm:$0xff] }
 0x1e7   : > { %1693 = vmatprep.mubr.f32.mxu0 %v1360_v16  ;;  %v1628_v12 = vmul.f32 0.00048828125, %v1626_v4  ;;  %v6593_v16 = vld [vmem:[%s9413_s3] sm:$0x3] }
 0x1e8   : > { %1694 = vmatmul.mubr.f32.vlgmr.msra.gmra.mxu0 %v1359_v59  ;;  %9757 = vst [vmem:[#allocation100_spill] sm:$0xff] %v6593_v16  ;;  %v6596_v59 = vrot.slane %v1220_v37, %v9756_v34 }
 0x1e9   : > { %1764 = vmatprep.mubr.f32.mxu1 %v1628_v12  ;;  %v9759_v12 = vld [vmem:[#allocation19_spill] sm:$0xff] }
 0x1ea   : > { %1765 = vmatmul.mubr.f32.vlgmr.msra.gmra.mxu1 %v1627_v14  ;;  %9758 = vst [vmem:[#allocation101_spill] sm:$0xff] %v6596_v59  ;;  %v9760_v14 = vld [vmem:[#allocation16_spill] sm:$0xff]  ;;  %v9789_v59 = vld [vmem:[#allocation55_spill] sm:$0xff] }
 0x1eb   : > { %2723 = vmatpush1.bf16.msra.mxu1 %v4806_v49  ;;  %v9772_v49 = vld [vmem:[#allocation78_spill] sm:$0xff] }
 0x1ec   : > { %2724 = vmatprep.subr.bf16.mxu1 %v9671_v45 }
 0x1ef   : > { %2725 = vmatpush1.bf16.msra.mxu1 %v4807_v21  ;;  %v9771_v21 = vld [vmem:[#allocation76_spill] sm:$0xff] }
 0x1f0   : > { %2726 = vmatprep.subr.bf16.mxu1 %v9671_v45 }
 0x1f3   : > { %2727 = vmatpush1.bf16.msra.mxu1 %v4808_v11  ;;  %v9761_v11 = vld [vmem:[#allocation13_spill] sm:$0xff] }
 0x1f4   : > { %2728 = vmatprep.subr.bf16.mxu1 %v9671_v45 }
 0x1f7   : > { %2729 = vmatpush1.bf16.msra.mxu1 %v4809_v36  ;;  %v9768_v36 = vld [vmem:[#allocation5_spill] sm:$0xff] }
 0x1f8   : > { %2730 = vmatprep.subr.bf16.mxu1 %v9671_v45 }
 0x1fb   : > { %2731 = vmatpush1.bf16.msra.mxu1 %v4810_v53  ;;  %v6607_v53 = vrot.slane %v1220_v37, %v9761_v11  ;;  %v9765_v37 = vld [vmem:[#allocation60_spill] sm:$0xff] }
 0x1fc   : > { %2732 = vmatprep.subr.bf16.mxu1 %v9671_v45 }
 0x1fd   : > { %9762 = vst [vmem:[#allocation19_spill] sm:$0xff] %v6607_v53 }
 0x1ff   : > { %2733 = vmatpush1.bf16.msra.mxu1 %v4811_v9 }
 0x200   : > { %2734 = vmatprep.subr.bf16.mxu1 %v9671_v45 }
 0x203   : > { %2735 = vmatpush1.bf16.msra.mxu1 %v4812_v22  ;;  %v9773_v22 = vld [vmem:[#allocation81_spill] sm:$0xff] }
 0x204   : > { %2736 = vmatprep.subr.bf16.mxu1 %v9671_v45 }
 0x207   : > { %2737 = vmatpush1.bf16.msra.mxu1 %v4813_v41  ;;  %v9767_v41 = vld [vmem:[#allocation3_spill] sm:$0xff] }
 0x208   : > { %2738 = vmatprep.subr.bf16.mxu1 %v9671_v45 }
 0x20b   : > { %2739 = vmatpush2.bf16.msra.mxu1 %v4814_v13 }
 0x20c   : > { %2740 = vmatprep.subr.bf16.mxu1 %v9671_v45 }
 0x20f   : > { %2741 = vmatpush2.bf16.msra.mxu1 %v4815_v25 }
 0x210   : > { %2742 = vmatprep.subr.bf16.mxu1 %v9671_v45 }
 0x213   : > { %2743 = vmatpush2.bf16.msra.mxu1 %v4816_v23  ;;  %v9766_v23 = vld [vmem:[#allocation62_spill] sm:$0xff] }
 0x214   : > { %2744 = vmatprep.subr.bf16.mxu1 %v9671_v45 }
 0x217   : > { %2745 = vmatpush2.bf16.msra.mxu1 %v4817_v40 }
 0x218   : > { %2746 = vmatprep.subr.bf16.mxu1 %v9671_v45 }
 0x21b   : > { %2747 = vmatpush2.bf16.msra.mxu1 %v4818_v0 }
 0x21c   : > { %2748 = vmatprep.subr.bf16.mxu1 %v9671_v45 }
 0x21f   : > { %2749 = vmatpush2.bf16.msra.mxu1 %v4819_v29  ;;  %v9802_v29 = vld [vmem:[#allocation17_spill] sm:$0xff] }
 0x220   : > { %2750 = vmatprep.subr.bf16.mxu1 %v9671_v45 }
 0x223   : > { %2751 = vmatpush2.bf16.msra.mxu1 %v4820_v28 }
 0x224   : > { %2752 = vmatprep.subr.bf16.mxu1 %v9671_v45  ;;  %v9806_v45 = vld [vmem:[#allocation63_spill] sm:$0xff] }
 0x227   : > { %2753 = vmatpush2.bf16.msra.mxu1 %v4821_v38  ;;  %v9769_v38 = vld [vmem:[#allocation7_spill] sm:$0xff] }
 0x2a8   : > { %v1695_v47 = vpop.f32.mrf.mxu0 }
 0x2a9   : > { %v1771_v19 = vmul.f32 %v1695_v47, %v1695_v47  ;;  %v6588_v24 = vrot.slane %v1695_v47, %v9756_v34 }
 0x2aa   : > { %v1766_v5 = vpop.f32.mrf.mxu1  ;;  %v1697_v0 = vpop.f32.mrf.mxu0 }
 0x2ab   : > { %v1773_v4 = vsub.f32 %v1766_v5, %v1771_v19  ;;  %v9764_v19 = vld [vmem:[#allocation58_spill] sm:$0xff]  ;;  %v1772_v40 = vmul.f32 %v1697_v0, %v1697_v0  ;;  %v6690_v13 = vrot.slane %v1697_v0, %v9756_v34  ;;  %v9788_v0 = vrot.slane %v6593_v16, %v9756_v34  ;;  %v9810_v5 = vld [vmem:[#allocation67_spill] sm:$0xff] }
 0x2ac   : > { %v1768_v47 = vpop.f32.mrf.mxu1  ;;  %v9813_v51 = vsub.f32 %v9759_v12, %v6588_v24  ;;  %v9815_v3 = vsub.f32 %v5800_v48, %v6588_v24  ;;  %v9816_v11 = vsub.f32 %v5816_v52, %v6588_v24 }
 0x2ad   : > { %v1775_v25 = vadd.f32 1e-05, %v1773_v4  ;;  %v1774_v15 = vsub.f32 %v1768_v47, %v1772_v40  ;;  %v9807_v47 = vld [vmem:[#allocation64_spill] sm:$0xff] }
 0x2ae   : > { %v9811_v4 = vld [vmem:[#allocation68_spill] sm:$0xff] }
 0x2af   : > { %4826 = vrsqrt.f32 %v1775_v25  ;;  %v9770_v25 = vld [vmem:[#allocation9_spill] sm:$0xff]  ;;  %v1776_v28 = vadd.f32 1e-05, %v1774_v15 }
 0x2b0   : > { %v9808_v15 = vld [vmem:[#allocation65_spill] sm:$0xff] }
 0x2b1   : > { %4828 = vrsqrt.f32 %v1776_v28  ;;  %v9809_v28 = vld [vmem:[#allocation66_spill] sm:$0xff] }
 0x2bc   : > { %v4827_v53 = vpop.eup %4826 }
 0x2bd   : > { %v1926_v1 = vmul.f32 %v4827_v53, %v9788_v0  ;;  %v9814_v53 = vsub.f32 %v9760_v14, %v6588_v24 }
 0x2bf   : > { %v6760_v40 = vrot.slane %v1926_v1, %v9756_v34  ;;  %v9812_v1 = vld [vmem:[#allocation69_spill] sm:$0xff] }
 0x2c1   : > { %v6792_v16 = vmul.f32 %v6760_v40, %v9813_v51  ;;  %v6798_v0 = vmul.f32 %v6760_v40, %v9814_v53  ;;  %v6804_v9 = vmul.f32 %v6760_v40, %v9815_v3  ;;  %v6810_v12 = vmul.f32 %v6760_v40, %v9816_v11 }
 0x2c2   : > { %v9817_v51 = vsub.f32 %v5832_v54, %v6588_v24  ;;  %v9818_v53 = vsub.f32 %v5848_v58, %v6588_v24  ;;  %v9819_v3 = vsub.f32 %v5864_v63, %v6588_v24  ;;  %v9821_v11 = vsub.f32 %v5880_v8, %v6588_v24 }
 0x2c4   : > { %v6816_v14 = vmul.f32 %v6760_v40, %v9817_v51  ;;  %v6822_v48 = vmul.f32 %v6760_v40, %v9818_v53  ;;  %v6828_v52 = vmul.f32 %v6760_v40, %v9819_v3  ;;  %v6834_v54 = vmul.f32 %v6760_v40, %v9821_v11 }
 0x2c5   : > { %v9823_v51 = vsub.f32 %v9764_v19, %v6588_v24  ;;  %v9825_v53 = vsub.f32 %v9765_v37, %v6588_v24  ;;  %v9827_v3 = vsub.f32 %v9766_v23, %v6588_v24  ;;  %v9829_v11 = vsub.f32 %v9767_v41, %v6588_v24 }
 0x2c6   : > { %9820 = vst [vmem:[#allocation16_spill] sm:$0xff] %v6828_v52  ;;  %9822 = vst [vmem:[#allocation58_spill] sm:$0xff] %v6834_v54 }
 0x2c7   : > { %v6840_v58 = vmul.f32 %v6760_v40, %v9823_v51  ;;  %v6846_v63 = vmul.f32 %v6760_v40, %v9825_v53  ;;  %v6852_v8 = vmul.f32 %v6760_v40, %v9827_v3  ;;  %v6858_v19 = vmul.f32 %v6760_v40, %v9829_v11 }
 0x2c8   : > { %v9831_v51 = vsub.f32 %v9768_v36, %v6588_v24  ;;  %v9833_v53 = vsub.f32 %v9769_v38, %v6588_v24  ;;  %v9835_v3 = vsub.f32 %v9770_v25, %v6588_v24  ;;  %v9837_v11 = vsub.f32 %v6008_v6, %v6588_v24 }
 0x2c9   : > { %9824 = vst [vmem:[#allocation60_spill] sm:$0xff] %v6840_v58  ;;  %9826 = vst [vmem:[#allocation62_spill] sm:$0xff] %v6846_v63 }
 0x2ca   : > { %9828 = vst [vmem:[#allocation3_spill] sm:$0xff] %v6852_v8  ;;  %9830 = vst [vmem:[#allocation5_spill] sm:$0xff] %v6858_v19  ;;  %v6864_v37 = vmul.f32 %v6760_v40, %v9831_v51  ;;  %v6870_v23 = vmul.f32 %v6760_v40, %v9833_v53  ;;  %v6876_v41 = vmul.f32 %v6760_v40, %v9835_v3  ;;  %v9958_v19 = vld [vmem:[#allocation54_spill] sm:$0xff] }
 0x2cb   : > { %v6882_v36 = vmul.f32 %v6760_v40, %v9837_v11  ;;  %v9839_v51 = vsub.f32 %v6024_v2, %v6588_v24  ;;  %v9841_v53 = vsub.f32 %v6040_v56, %v6588_v24  ;;  %v9843_v3 = vsub.f32 %v6056_v33, %v6588_v24 }
 0x2cc   : > { %9832 = vst [vmem:[#allocation7_spill] sm:$0xff] %v6864_v37  ;;  %9834 = vst [vmem:[#allocation9_spill] sm:$0xff] %v6870_v23  ;;  %v9845_v11 = vsub.f32 %v6072_v35, %v6588_v24  ;;  %v9954_v23 = vld [vmem:[#allocation29_spill] sm:$0xff]  ;;  %v9956_v37 = vld [vmem:[#allocation31_spill] sm:$0xff] }
 0x2cd   : > { %9836 = vst [vmem:[#allocation76_spill] sm:$0xff] %v6876_v41  ;;  %9838 = vst [vmem:[#allocation78_spill] sm:$0xff] %v6882_v36  ;;  %v6888_v38 = vmul.f32 %v6760_v40, %v9839_v51  ;;  %v6894_v25 = vmul.f32 %v6760_v40, %v9841_v53  ;;  %v6900_v6 = vmul.f32 %v6760_v40, %v9843_v3  ;;  %v9948_v36 = vld [vmem:[#allocation18_spill] sm:$0xff] }
 0x2ce   : > { %v6906_v2 = vmul.f32 %v6760_v40, %v9845_v11  ;;  %v9847_v51 = vsub.f32 %v6088_v61, %v6588_v24  ;;  %v9849_v53 = vsub.f32 %v6104_v20, %v6588_v24  ;;  %v9851_v3 = vsub.f32 %v6120_v26, %v6588_v24 }
 0x2cf   : > { %9840 = vst [vmem:[#allocation81_spill] sm:$0xff] %v6888_v38  ;;  %9842 = vst [vmem:[#allocation55_spill] sm:$0xff] %v6894_v25  ;;  %v9853_v11 = vsub.f32 %v6136_v27, %v6588_v24  ;;  %v9946_v38 = vld [vmem:[#allocation22_spill] sm:$0xff] }
 0x2d0   : > { %9844 = vst [vmem:[#allocation17_spill] sm:$0xff] %v6900_v6  ;;  %9846 = vst [vmem:[#allocation63_spill] sm:$0xff] %v6906_v2  ;;  %v6912_v56 = vmul.f32 %v6760_v40, %v9847_v51  ;;  %v6918_v33 = vmul.f32 %v6760_v40, %v9849_v53  ;;  %v6924_v35 = vmul.f32 %v6760_v40, %v9851_v3  ;;  %v9942_v2 = vld [vmem:[#allocation27_spill] sm:$0xff]  ;;  %v9944_v6 = vld [vmem:[#allocation30_spill] sm:$0xff] }
 0x2d1   : > { %v6930_v61 = vmul.f32 %v6760_v40, %v9853_v11  ;;  %v9855_v51 = vsub.f32 %v6152_v42, %v6588_v24  ;;  %v9857_v53 = vsub.f32 %v6168_v39, %v6588_v24  ;;  %v9859_v3 = vsub.f32 %v6184_v32, %v6588_v24 }
 0x2d2   : > { %9848 = vst [vmem:[#allocation64_spill] sm:$0xff] %v6912_v56  ;;  %9850 = vst [vmem:[#allocation65_spill] sm:$0xff] %v6918_v33  ;;  %v9861_v11 = vsub.f32 %v6200_v30, %v6588_v24 }
 0x2d3   : > { %9852 = vst [vmem:[#allocation66_spill] sm:$0xff] %v6924_v35  ;;  %9854 = vst [vmem:[#allocation67_spill] sm:$0xff] %v6930_v61  ;;  %v6936_v20 = vmul.f32 %v6760_v40, %v9855_v51  ;;  %v6942_v26 = vmul.f32 %v6760_v40, %v9857_v53  ;;  %v6948_v27 = vmul.f32 %v6760_v40, %v9859_v3 }
 0x2d4   : > { %v6954_v42 = vmul.f32 %v6760_v40, %v9861_v11  ;;  %v9863_v51 = vsub.f32 %v6216_v7, %v6588_v24  ;;  %v9865_v53 = vsub.f32 %v6232_v50, %v6588_v24  ;;  %v9867_v3 = vsub.f32 %v6248_v46, %v6588_v24 }
 0x2d5   : > { %9856 = vst [vmem:[#allocation68_spill] sm:$0xff] %v6936_v20  ;;  %9858 = vst [vmem:[#allocation69_spill] sm:$0xff] %v6942_v26  ;;  %v9869_v11 = vsub.f32 %v6264_v57, %v6588_v24 }
 0x2d6   : > { %9860 = vst [vmem:[#allocation102_spill] sm:$0xff] %v6948_v27  ;;  %9862 = vst [vmem:[#allocation103_spill] sm:$0xff] %v6954_v42  ;;  %v6960_v39 = vmul.f32 %v6760_v40, %v9863_v51  ;;  %v6966_v32 = vmul.f32 %v6760_v40, %v9865_v53  ;;  %v6972_v30 = vmul.f32 %v6760_v40, %v9867_v3 }
 0x2d7   : > { %v6978_v7 = vmul.f32 %v6760_v40, %v9869_v11  ;;  %v9871_v51 = vsub.f32 %v6280_v17, %v6588_v24  ;;  %v9873_v53 = vsub.f32 %v6294_v18, %v6588_v24  ;;  %v9875_v3 = vsub.f32 %v6308_v10, %v6588_v24 }
 0x2d8   : > { %9864 = vst [vmem:[#allocation104_spill] sm:$0xff] %v6960_v39  ;;  %9866 = vst [vmem:[#allocation105_spill] sm:$0xff] %v6966_v32  ;;  %v9877_v11 = vsub.f32 %v9771_v21, %v6588_v24 }
 0x2d9   : > { %9868 = vst [vmem:[#allocation106_spill] sm:$0xff] %v6972_v30  ;;  %9870 = vst [vmem:[#allocation107_spill] sm:$0xff] %v6978_v7  ;;  %v6984_v50 = vmul.f32 %v6760_v40, %v9871_v51  ;;  %v6990_v46 = vmul.f32 %v6760_v40, %v9873_v53  ;;  %v6996_v57 = vmul.f32 %v6760_v40, %v9875_v3  ;;  %v4829_v3 = vpop.eup %4828  ;;  %v9929_v30 = vld [vmem:[#allocation24_spill] sm:$0xff] }
 0x2da   : > { %v7002_v17 = vmul.f32 %v6760_v40, %v9877_v11  ;;  %v9879_v51 = vsub.f32 %v9772_v49, %v6588_v24  ;;  %v9881_v53 = vsub.f32 %v6350_v31, %v6588_v24  ;;  %v9885_v11 = vsub.f32 %v6378_v62, %v6588_v24 }
 0x2db   : > { %9872 = vst [vmem:[#allocation108_spill] sm:$0xff] %v6984_v50  ;;  %9874 = vst [vmem:[#allocation109_spill] sm:$0xff] %v6990_v46 }
 0x2dc   : > { %9876 = vst [vmem:[#allocation110_spill] sm:$0xff] %v6996_v57  ;;  %9878 = vst [vmem:[#allocation111_spill] sm:$0xff] %v7002_v17  ;;  %v7008_v18 = vmul.f32 %v6760_v40, %v9879_v51  ;;  %v7014_v10 = vmul.f32 %v6760_v40, %v9881_v53  ;;  %v9883_v57 = vsub.f32 %v9773_v22, %v6588_v24 }
 0x2dd   : > { %v7026_v49 = vmul.f32 %v6760_v40, %v9885_v11  ;;  %v9887_v51 = vsub.f32 %v6389_v43, %v6588_v24  ;;  %v9889_v53 = vsub.f32 %v6401_v55, %v6588_v24  ;;  %v9893_v11 = vld [vmem:[#allocation87_spill] sm:$0xff] }
 0x2de   : > { %9880 = vst [vmem:[#allocation112_spill] sm:$0xff] %v7008_v18  ;;  %9882 = vst [vmem:[#allocation113_spill] sm:$0xff] %v7014_v10  ;;  %v7020_v21 = vmul.f32 %v6760_v40, %v9883_v57  ;;  %v9891_v57 = vsub.f32 %v6413_v60, %v6588_v24 }
 0x2df   : > { %9886 = vst [vmem:[#allocation115_spill] sm:$0xff] %v7026_v49  ;;  %v7032_v31 = vmul.f32 %v6760_v40, %v9887_v51  ;;  %v7038_v22 = vmul.f32 %v6760_v40, %v9889_v53  ;;  %v9894_v49 = vsub.f32 %v9893_v11, %v6588_v24  ;;  %v9896_v51 = vsub.f32 %v6438_v44, %v6588_v24  ;;  %v9898_v53 = vld [vmem:[#allocation90_spill] sm:$0xff] }
 0x2e0   : > { %9884 = vst [vmem:[#allocation114_spill] sm:$0xff] %v7020_v21  ;;  %v7044_v62 = vmul.f32 %v6760_v40, %v9891_v57  ;;  %v9899_v21 = vsub.f32 %v9898_v53, %v6588_v24  ;;  %v9901_v57 = vld [vmem:[#allocation92_spill] sm:$0xff] }
 0x2e1   : > { %9888 = vst [vmem:[#allocation116_spill] sm:$0xff] %v7032_v31  ;;  %9890 = vst [vmem:[#allocation117_spill] sm:$0xff] %v7038_v22  ;;  %v7050_v43 = vmul.f32 %v6760_v40, %v9894_v49  ;;  %v7056_v55 = vmul.f32 %v6760_v40, %v9896_v51  ;;  %v9904_v49 = vld [vmem:[#allocation94_spill] sm:$0xff]  ;;  %v9907_v51 = vld [vmem:[#allocation96_spill] sm:$0xff] }
 0x2e2   : > { %9892 = vst [vmem:[#allocation118_spill] sm:$0xff] %v7044_v62  ;;  %v7062_v60 = vmul.f32 %v6760_v40, %v9899_v21  ;;  %v9902_v62 = vsub.f32 %v9901_v57, %v6588_v24  ;;  %v9910_v21 = vld [vmem:[#allocation98_spill] sm:$0xff]  ;;  %v9916_v31 = vld [vmem:[#allocation100_spill] sm:$0xff]  ;;  %v9923_v22 = vld [vmem:[#allocation79_spill] sm:$0xff] }
 0x2e3   : > { %9895 = vst [vmem:[#allocation87_spill] sm:$0xff] %v7050_v43  ;;  %9897 = vst [vmem:[#allocation119_spill] sm:$0xff] %v7056_v55  ;;  %v9905_v43 = vsub.f32 %v9904_v49, %v6588_v24  ;;  %v9908_v55 = vsub.f32 %v9907_v51, %v6588_v24  ;;  %v9914_v49 = vld [vmem:[#allocation71_spill] sm:$0xff]  ;;  %v9917_v51 = vld [vmem:[#allocation13_spill] sm:$0xff]  ;;  %v1888_v50 = vsub.f32 %v9923_v22, %v6690_v13 }
 0x2e4   : > { %9900 = vst [vmem:[#allocation90_spill] sm:$0xff] %v7062_v60  ;;  %v7068_v11 = vmul.f32 %v6760_v40, %v9902_v62  ;;  %v9911_v60 = vsub.f32 %v9910_v21, %v6588_v24  ;;  %v9913_v62 = vld [vmem:[#allocation70_spill] sm:$0xff]  ;;  %v9918_v10 = vrot.slane %v9916_v31, %v9917_v51  ;;  %v9926_v31 = vld [vmem:[#allocation83_spill] sm:$0xff]  ;;  %v9927_v51 = vld [vmem:[#allocation20_spill] sm:$0xff] }
 0x2e5   : > { %v7074_v44 = vmul.f32 %v6760_v40, %v9905_v43  ;;  %v7080_v53 = vmul.f32 %v6760_v40, %v9908_v55  ;;  %v9915_v43 = vld [vmem:[#allocation72_spill] sm:$0xff]  ;;  %v9920_v21 = vld [vmem:[#allocation74_spill] sm:$0xff]  ;;  %v9931_v22 = vld [vmem:[#allocation101_spill] sm:$0xff] }
 0x2e6   : > { %9903 = vst [vmem:[#allocation92_spill] sm:$0xff] %v7068_v11  ;;  %v7086_v57 = vmul.f32 %v6760_v40, %v9911_v60  ;;  %v1927_v55 = vmul.f32 %v4829_v3, %v9918_v10  ;;  %v1882_v60 = vsub.f32 %v9920_v21, %v6690_v13  ;;  %v9922_v11 = vld [vmem:[#allocation77_spill] sm:$0xff]  ;;  %v9925_v10 = vld [vmem:[#allocation82_spill] sm:$0xff]  ;;  %v9928_v21 = vsub.f32 %v9927_v51, %v6588_v24 }
 0x2e7   : > { %9906 = vst [vmem:[#allocation94_spill] sm:$0xff] %v7074_v44  ;;  %9909 = vst [vmem:[#allocation96_spill] sm:$0xff] %v7080_v53  ;;  %v9919_v53 = vld [vmem:[#allocation73_spill] sm:$0xff]  ;;  %v1886_v46 = vsub.f32 %v9922_v11, %v6690_v13  ;;  %v9924_v44 = vld [vmem:[#allocation80_spill] sm:$0xff]  ;;  %v1892_v3 = vsub.f32 %v9925_v10, %v6690_v13  ;;  %v9930_v11 = vsub.f32 %v9929_v30, %v6588_v24 }
 0x2e8   : > { %9912 = vst [vmem:[#allocation98_spill] sm:$0xff] %v7086_v57  ;;  %v1880_v18 = vsub.f32 %v9919_v53, %v6690_v13  ;;  %v9921_v57 = vld [vmem:[#allocation75_spill] sm:$0xff]  ;;  %v1890_v7 = vsub.f32 %v9924_v44, %v6690_v13  ;;  %v1894_v53 = vsub.f32 %v9926_v31, %v6690_v13  ;;  %v2075_v39 = vadd.f32 %v9931_v22, %v6792_v16  ;;  %v9932_v10 = vld [vmem:[#allocation84_spill] sm:$0xff]  ;;  %v9933_v31 = vld [vmem:[#allocation85_spill] sm:$0xff] }
 0x2e9   : > { %v1884_v17 = vsub.f32 %v9921_v57, %v6690_v13  ;;  %v1940_v57 = vmul.f32 %v6760_v40, %v9928_v21  ;;  %v1942_v32 = vmul.f32 %v6760_v40, %v9930_v11  ;;  %v2077_v44 = vadd.f32 %v9931_v22, %v6798_v0  ;;  %v9934_v51 = vld [vmem:[#allocation86_spill] sm:$0xff]  ;;  %v9935_v30 = vld [vmem:[#allocation88_spill] sm:$0xff]  ;;  %v9936_v16 = vld [vmem:[#allocation89_spill] sm:$0xff] }
 0x2ea   : > { %v1896_v42 = vsub.f32 %v9932_v10, %v6690_v13  ;;  %v1898_v27 = vsub.f32 %v9933_v31, %v6690_v13  ;;  %v1900_v21 = vsub.f32 %v9934_v51, %v6690_v13  ;;  %v7132_v26 = vrot.slane %v1927_v55, %v9756_v34  ;;  %v9937_v0 = vld [vmem:[#allocation91_spill] sm:$0xff]  ;;  %v9938_v10 = vld [vmem:[#allocation93_spill] sm:$0xff] }
 0x2eb   : > { %v1902_v11 = vsub.f32 %v9935_v30, %v6690_v13  ;;  %v1904_v20 = vsub.f32 %v9936_v16, %v6690_v13  ;;  %v1906_v61 = vsub.f32 %v9937_v0, %v6690_v13  ;;  %v1908_v35 = vsub.f32 %v9938_v10, %v6690_v13  ;;  %v9939_v31 = vld [vmem:[#allocation95_spill] sm:$0xff]  ;;  %v9940_v51 = vld [vmem:[#allocation97_spill] sm:$0xff] }
 0x2ec   : > { %v1910_v33 = vsub.f32 %v9939_v31, %v6690_v13  ;;  %v1912_v56 = vsub.f32 %v9940_v51, %v6690_v13  ;;  %v9941_v55 = vld [vmem:[#allocation99_spill] sm:$0xff]  ;;  %v9943_v30 = vsub.f32 %v9942_v2, %v6588_v24  ;;  %v9945_v0 = vsub.f32 %v9944_v6, %v6588_v24 }
 0x2ed   : > { %v1914_v34 = vsub.f32 %v9941_v55, %v6690_v13  ;;  %v7160_v25 = vpack.c.bf16 %v2077_v44, %v2075_v39  ;;  %v2079_v31 = vadd.f32 %v9931_v22, %v1940_v57  ;;  %v2081_v51 = vadd.f32 %v9931_v22, %v1942_v32  ;;  %v9950_v6 = vld [vmem:[#allocation23_spill] sm:$0xff]  ;;  %v9952_v44 = vld [vmem:[#allocation26_spill] sm:$0xff] }
 0x2ee   : > { %v7152_v16 = vmul.f32 %v6760_v40, %v9943_v30  ;;  %v7158_v10 = vmul.f32 %v6760_v40, %v9945_v0  ;;  %v9947_v55 = vsub.f32 %v9946_v38, %v6690_v13  ;;  %v9949_v30 = vsub.f32 %v9948_v36, %v6690_v13 }
 0x2ef   : > { %v9951_v0 = vsub.f32 %v9950_v6, %v6690_v13  ;;  %v9953_v57 = vsub.f32 %v9952_v44, %v6690_v13  ;;  %v9955_v38 = vsub.f32 %v9954_v23, %v6690_v13  ;;  %v9957_v36 = vsub.f32 %v9956_v37, %v6690_v13  ;;  %v9961_v23 = vld [vmem:[#allocation56_spill] sm:$0xff]  ;;  %v9963_v37 = vld [vmem:[#allocation57_spill] sm:$0xff] }
 0x2f0   : > { %v1937_v2 = vmul.f32 %v7132_v26, %v9947_v55  ;;  %v1939_v41 = vmul.f32 %v7132_v26, %v9949_v30  ;;  %v9959_v6 = vsub.f32 %v9958_v19, %v6690_v13  ;;  %v9960_v44 = vsub.f32 %v9789_v59, %v6690_v13 }
 0x2f1   : > { %v1941_v39 = vmul.f32 %v7132_v26, %v9951_v0  ;;  %v1943_v32 = vmul.f32 %v7132_v26, %v9953_v57  ;;  %v1945_v55 = vmul.f32 %v7132_v26, %v9955_v38  ;;  %v1947_v30 = vmul.f32 %v7132_v26, %v9957_v36 }
 0x2f2   : > { %v7192_v0 = vmul.f32 %v7132_v26, %v9959_v6  ;;  %v7198_v57 = vmul.f32 %v7132_v26, %v9960_v44  ;;  %v9962_v38 = vsub.f32 %v9961_v23, %v6690_v13  ;;  %v9964_v36 = vsub.f32 %v9963_v37, %v6690_v13  ;;  %v9965_v6 = vld [vmem:[#allocation59_spill] sm:$0xff]  ;;  %v9968_v44 = vld [vmem:[#allocation61_spill] sm:$0xff] }
 0x2f3   : > { %v9966_v63 = vsub.f32 %v9965_v6, %v6690_v13  ;;  %v9969_v58 = vsub.f32 %v9968_v44, %v6690_v13 }
 0x2f4   : > { %v7204_v8 = vmul.f32 %v7132_v26, %v9962_v38  ;;  %v7210_v19 = vmul.f32 %v7132_v26, %v9964_v36  ;;  %v9971_v38 = vld [vmem:[#allocation2_spill] sm:$0xff]  ;;  %v9974_v36 = vld [vmem:[#allocation4_spill] sm:$0xff] }
 0x2f5   : > { %v7216_v59 = vmul.f32 %v7132_v26, %v9966_v63  ;;  %v7222_v23 = vmul.f32 %v7132_v26, %v9969_v58  ;;  %v9972_v54 = vsub.f32 %v9971_v38, %v6690_v13  ;;  %v9975_v52 = vsub.f32 %v9974_v36, %v6690_v13  ;;  %v9977_v63 = vld [vmem:[#allocation6_spill] sm:$0xff]  ;;  %v9980_v58 = vld [vmem:[#allocation8_spill] sm:$0xff] }
 0x2f7   : > { %9967 = vst [vmem:[#allocation70_spill] sm:$0xff] %v7216_v59  ;;  %9970 = vst [vmem:[#allocation71_spill] sm:$0xff] %v7222_v23  ;;  %v7228_v37 = vmul.f32 %v7132_v26, %v9972_v54  ;;  %v7234_v6 = vmul.f32 %v7132_v26, %v9975_v52  ;;  %v9978_v59 = vsub.f32 %v9977_v63, %v6690_v13  ;;  %v9983_v54 = vld [vmem:[#allocation10_spill] sm:$0xff]  ;;  %v9985_v52 = vld [vmem:[#allocation12_spill] sm:$0xff] }
 0x2f8   : > { %v9981_v23 = vsub.f32 %v9980_v58, %v6690_v13 }
 0x2f9   : > { %9973 = vst [vmem:[#allocation72_spill] sm:$0xff] %v7228_v37  ;;  %9976 = vst [vmem:[#allocation100_spill] sm:$0xff] %v7234_v6  ;;  %v7240_v44 = vmul.f32 %v7132_v26, %v9978_v59  ;;  %v9984_v37 = vsub.f32 %v9983_v54, %v6690_v13  ;;  %v9986_v6 = vsub.f32 %v9985_v52, %v6690_v13  ;;  %v9988_v59 = vld [vmem:[#allocation14_spill] sm:$0xff] }
 0x2fa   : > { %v7246_v38 = vmul.f32 %v7132_v26, %v9981_v23  ;;  %v9991_v23 = vld [vmem:[#allocation15_spill] sm:$0xff] }
 0x2fb   : > { %9979 = vst [vmem:[#allocation13_spill] sm:$0xff] %v7240_v44  ;;  %v7252_v36 = vmul.f32 %v7132_v26, %v9984_v37  ;;  %v7258_v63 = vmul.f32 %v7132_v26, %v9986_v6  ;;  %v9989_v44 = vsub.f32 %v9988_v59, %v6690_v13  ;;  %v9994_v37 = vsub.f32 %v9802_v29, %v6690_v13  ;;  %v9995_v6 = vld [vmem:[#allocation21_spill] sm:$0xff] }
 0x2fc   : > { %9982 = vst [vmem:[#allocation73_spill] sm:$0xff] %v7246_v38  ;;  %v9992_v38 = vsub.f32 %v9991_v23, %v6690_v13 }
 0x2fd   : > { %9987 = vst [vmem:[#allocation74_spill] sm:$0xff] %v7258_v63  ;;  %v7264_v58 = vmul.f32 %v7132_v26, %v9989_v44  ;;  %v7276_v52 = vmul.f32 %v7132_v26, %v9994_v37  ;;  %v9996_v63 = vsub.f32 %v9995_v6, %v6690_v13  ;;  %v9997_v44 = vld [vmem:[#allocation25_spill] sm:$0xff]  ;;  %v10001_v37 = vsub.f32 %v9806_v45, %v6690_v13 }
 0x2fe   : > { %v7270_v54 = vmul.f32 %v7132_v26, %v9992_v38  ;;  %v9999_v38 = vld [vmem:[#allocation28_spill] sm:$0xff] }
 0x2ff   : > { %9990 = vst [vmem:[#allocation75_spill] sm:$0xff] %v7264_v58  ;;  %v7282_v59 = vmul.f32 %v7132_v26, %v9996_v63  ;;  %v9998_v58 = vsub.f32 %v9997_v44, %v6690_v13  ;;  %v7300_v6 = vmul.f32 %v7132_v26, %v10001_v37  ;;  %v10002_v63 = vsub.f32 %v9807_v47, %v6690_v13 }
 0x300   : > { %9993 = vst [vmem:[#allocation77_spill] sm:$0xff] %v7270_v54  ;;  %v10000_v54 = vsub.f32 %v9999_v38, %v6690_v13  ;;  %v10005_v37 = vsub.f32 %v9810_v5, %v6690_v13 }
 0x301   : > { %v7288_v23 = vmul.f32 %v7132_v26, %v9998_v58  ;;  %v7306_v44 = vmul.f32 %v7132_v26, %v10002_v63  ;;  %v10003_v58 = vsub.f32 %v9808_v15, %v6690_v13  ;;  %v10006_v63 = vsub.f32 %v9811_v4, %v6690_v13 }
 0x302   : > { %v7294_v29 = vmul.f32 %v7132_v26, %v10000_v54  ;;  %v10004_v54 = vsub.f32 %v9809_v28, %v6690_v13  ;;  %v7324_v47 = vmul.f32 %v7132_v26, %v10005_v37  ;;  %v10009_v37 = vsub.f32 %v9914_v49, %v6690_v13 }
 0x303   : > { %v7312_v38 = vmul.f32 %v7132_v26, %v10003_v58  ;;  %v7330_v15 = vmul.f32 %v7132_v26, %v10006_v63  ;;  %v10007_v58 = vsub.f32 %v9812_v1, %v6690_v13  ;;  %v10010_v63 = vsub.f32 %v9915_v43, %v6690_v13 }
 0x304   : > { %v7318_v45 = vmul.f32 %v7132_v26, %v10004_v54  ;;  %v10008_v54 = vsub.f32 %v9913_v62, %v6690_v13  ;;  %v7348_v4 = vmul.f32 %v7132_v26, %v10009_v37  ;;  %v7360_v62 = vmul.f32 %v7132_v26, %v1882_v60 }
 0x305   : > { %v7336_v28 = vmul.f32 %v7132_v26, %v10007_v58  ;;  %v7354_v1 = vmul.f32 %v7132_v26, %v10010_v63  ;;  %v7357_v58 = vmul.f32 %v7132_v26, %v1880_v18  ;;  %v7366_v49 = vmul.f32 %v7132_v26, %v1886_v46 }
 0x306   : > { %v7342_v5 = vmul.f32 %v7132_v26, %v10008_v54  ;;  %10013 = vst [vmem:[#allocation82_spill] sm:$0xff] %v7360_v62  ;;  %v7363_v54 = vmul.f32 %v7132_v26, %v1884_v17  ;;  %v7369_v37 = vmul.f32 %v7132_v26, %v1888_v50  ;;  %v7372_v43 = vmul.f32 %v7132_v26, %v1890_v7 }
 0x307   : > { %10011 = vst [vmem:[#allocation79_spill] sm:$0xff] %v7354_v1  ;;  %10012 = vst [vmem:[#allocation80_spill] sm:$0xff] %v7357_v58  ;;  %v7375_v63 = vmul.f32 %v7132_v26, %v1892_v3  ;;  %v7378_v18 = vmul.f32 %v7132_v26, %v1894_v53  ;;  %v7381_v60 = vmul.f32 %v7132_v26, %v1896_v42 }
 0x308   : > { %10014 = vst [vmem:[#allocation83_spill] sm:$0xff] %v7363_v54  ;;  %10015 = vst [vmem:[#allocation20_spill] sm:$0xff] %v7366_v49  ;;  %v7384_v17 = vmul.f32 %v7132_v26, %v1898_v27  ;;  %v7387_v46 = vmul.f32 %v7132_v26, %v1900_v21  ;;  %v7390_v50 = vmul.f32 %v7132_v26, %v1902_v11  ;;  %v10030_v11 = vld [vmem:[#allocation19_spill] sm:$0xff] }
 0x309   : > { %10016 = vst [vmem:[#allocation24_spill] sm:$0xff] %v7369_v37  ;;  %10017 = vst [vmem:[#allocation101_spill] sm:$0xff] %v7372_v43  ;;  %v7393_v7 = vmul.f32 %v7132_v26, %v1904_v20  ;;  %v7396_v3 = vmul.f32 %v7132_v26, %v1906_v61  ;;  %v7399_v53 = vmul.f32 %v7132_v26, %v1908_v35 }
 0x30a   : > { %10018 = vst [vmem:[#allocation84_spill] sm:$0xff] %v7375_v63  ;;  %10019 = vst [vmem:[#allocation85_spill] sm:$0xff] %v7378_v18  ;;  %v7402_v42 = vmul.f32 %v7132_v26, %v1910_v33  ;;  %v7405_v27 = vmul.f32 %v7132_v26, %v1912_v56  ;;  %v7408_v21 = vmul.f32 %v7132_v26, %v1914_v34  ;;  %v10047_v18 = vld [vmem:[#allocation43_spill] sm:$0xff] }
 0x30b   : > { %10020 = vst [vmem:[#allocation86_spill] sm:$0xff] %v7381_v60  ;;  %10021 = vst [vmem:[#allocation88_spill] sm:$0xff] %v7384_v17  ;;  %v2078_v20 = vadd.f32 %v10030_v11, %v1939_v41  ;;  %v2080_v61 = vadd.f32 %v10030_v11, %v1941_v39  ;;  %v2082_v35 = vadd.f32 %v10030_v11, %v1943_v32  ;;  %v10046_v60 = vld [vmem:[#allocation48_spill] sm:$0xff] }
 0x30c   : > { %10022 = vst [vmem:[#allocation89_spill] sm:$0xff] %v7387_v46  ;;  %10023 = vst [vmem:[#allocation91_spill] sm:$0xff] %v7390_v50  ;;  %v2076_v50 = vadd.f32 %v10030_v11, %v1937_v2  ;;  %v2084_v33 = vadd.f32 %v10030_v11, %v1945_v55  ;;  %v2086_v56 = vadd.f32 %v10030_v11, %v1947_v30  ;;  %v10033_v2 = vld [vmem:[#allocation35_spill] sm:$0xff]  ;;  %v10036_v55 = vld [vmem:[#allocation34_spill] sm:$0xff] }
 0x30d   : > { %10024 = vst [vmem:[#allocation93_spill] sm:$0xff] %v7393_v7  ;;  %10025 = vst [vmem:[#allocation95_spill] sm:$0xff] %v7396_v3  ;;  %v2267_v7 = vmul.bf16 1056980736, %v7160_v25  ;;  %v10034_v41 = vsub.f32 %v10033_v2, %v6690_v13  ;;  %v7429_v39 = vpack.c.bf16 %v2082_v35, %v2080_v61  ;;  %v1801_v30 = vsub.f32 %v10036_v55, %v6588_v24 }
 0x30e   : > { %10026 = vst [vmem:[#allocation97_spill] sm:$0xff] %v7399_v53  ;;  %10027 = vst [vmem:[#allocation99_spill] sm:$0xff] %v7402_v42  ;;  %v7415_v53 = vpack.c.bf16 %v2081_v51, %v2079_v31  ;;  %v7427_v3 = vpack.c.bf16 %v2078_v20, %v2076_v50  ;;  %v7431_v31 = vpack.c.bf16 %v2086_v56, %v2084_v33  ;;  %v10035_v51 = vld [vmem:[#allocation32_spill] sm:$0xff]  ;;  %v10037_v33 = vld [vmem:[#allocation37_spill] sm:$0xff] }
 0x30f   : > { %10028 = vst [vmem:[#allocation27_spill] sm:$0xff] %v7405_v27  ;;  %10029 = vst [vmem:[#allocation30_spill] sm:$0xff] %v7408_v21  ;;  %v10031_v27 = vld [vmem:[#allocation33_spill] sm:$0xff]  ;;  %v1951_v42 = vmul.f32 %v7132_v26, %v10034_v41  ;;  %4830 = vtanh.bf16 %v2267_v7  ;;  %v1799_v32 = vsub.f32 %v10035_v51, %v6588_v24  ;;  %v2083_v50 = vadd.f32 %v9931_v22, %v7152_v16  ;;  %v10038_v41 = vld [vmem:[#allocation39_spill] sm:$0xff] }
 0x310   : > { %v10032_v34 = vsub.f32 %v10031_v27, %v6690_v13  ;;  %v2268_v27 = vmul.bf16 1056980736, %v7427_v3  ;;  %v2269_v2 = vmul.bf16 1056980736, %v7415_v53  ;;  %v2085_v7 = vadd.f32 %v9931_v22, %v7158_v10 }
 0x311   : > { %v2272_v20 = vmul.bf16 1056980736, %v7431_v31  ;;  %v2090_v35 = vadd.f32 %v10030_v11, %v1951_v42  ;;  %v1804_v56 = vsub.f32 %v10037_v33, %v6690_v13  ;;  %v1806_v51 = vsub.f32 %v10038_v41, %v6690_v13  ;;  %v10040_v41 = vld [vmem:[#allocation38_spill] sm:$0xff] }
 0x312   : > { %v1949_v21 = vmul.f32 %v7132_v26, %v10032_v34  ;;  %v2270_v34 = vmul.bf16 1056980736, %v7429_v39  ;;  %4832 = vtanh.bf16 %v2268_v27  ;;  %v1948_v55 = vmul.f32 %v6760_v40, %v1799_v32  ;;  %v10041_v32 = vld [vmem:[#allocation40_spill] sm:$0xff] }
 0x313   : > { %v1950_v16 = vmul.f32 %v6760_v40, %v1801_v30  ;;  %v1953_v10 = vmul.f32 %v7132_v26, %v1804_v56  ;;  %v1955_v27 = vmul.f32 %v7132_v26, %v1806_v51  ;;  %v7455_v46 = vpack.c.bf16 %v2085_v7, %v2083_v50 }
 0x314   : > { %v2088_v61 = vadd.f32 %v10030_v11, %v1949_v21  ;;  %4834 = vtanh.bf16 %v2270_v34  ;;  %v10039_v21 = vld [vmem:[#allocation36_spill] sm:$0xff]  ;;  %v1805_v34 = vsub.f32 %v10040_v41, %v6588_v24  ;;  %v1807_v17 = vsub.f32 %v10041_v32, %v6588_v24  ;;  %v10045_v32 = vld [vmem:[#allocation41_spill] sm:$0xff] }
 0x315   : > { %4836 = vtanh.bf16 %v2269_v2  ;;  %v1803_v33 = vsub.f32 %v10039_v21, %v6588_v24  ;;  %v2087_v30 = vadd.f32 %v9931_v22, %v1948_v55  ;;  %v2089_v56 = vadd.f32 %v9931_v22, %v1950_v16  ;;  %v10042_v2 = vld [vmem:[#allocation42_spill] sm:$0xff] }
 0x316   : > { %4838 = vtanh.bf16 %v2272_v20  ;;  %v7457_v42 = vpack.c.bf16 %v2090_v35, %v2088_v61  ;;  %v1809_v50 = vsub.f32 %v10042_v2, %v6588_v24  ;;  %v2271_v7 = vmul.bf16 1056980736, %v7455_v46  ;;  %v10043_v35 = vld [vmem:[#allocation44_spill] sm:$0xff]  ;;  %v10044_v21 = vld [vmem:[#allocation46_spill] sm:$0xff] }
 0x317   : > { %v2092_v20 = vadd.f32 %v10030_v11, %v1953_v10  ;;  %v2094_v61 = vadd.f32 %v10030_v11, %v1955_v27  ;;  %v1808_v55 = vsub.f32 %v10045_v32, %v6690_v13  ;;  %v1810_v63 = vsub.f32 %v10047_v18, %v6690_v13  ;;  %v10048_v10 = vld [vmem:[#allocation45_spill] sm:$0xff] }
 0x318   : > { %v2274_v16 = vmul.bf16 1056980736, %v7457_v42  ;;  %v1812_v27 = vsub.f32 %v10048_v10, %v6690_v13  ;;  %v1952_v43 = vmul.f32 %v6760_v40, %v1803_v33  ;;  %v1954_v37 = vmul.f32 %v6760_v40, %v1805_v34 }
 0x319   : > { %v1957_v41 = vmul.f32 %v7132_v26, %v1808_v55  ;;  %v7488_v49 = vpack.c.bf16 %v2089_v56, %v2087_v30  ;;  %v2107_v32 = vadd.f32 %v9931_v22, %v6804_v9  ;;  %v1959_v2 = vmul.f32 %v7132_v26, %v1810_v63  ;;  %v10049_v30 = vld [vmem:[#allocation47_spill] sm:$0xff] }
 0x31a   : > { %4840 = vtanh.bf16 %v2271_v7  ;;  %v7493_v54 = vpack.c.bf16 %v2094_v61, %v2092_v20  ;;  %v2109_v18 = vadd.f32 %v9931_v22, %v6810_v12  ;;  %v2112_v33 = vadd.f32 %v10030_v11, %v7192_v0 }
 0x31b   : > { %4842 = vtanh.bf16 %v2274_v16  ;;  %v2114_v34 = vadd.f32 %v10030_v11, %v7198_v57  ;;  %v1814_v56 = vsub.f32 %v10049_v30, %v6690_v13  ;;  %v1956_v9 = vmul.f32 %v6760_v40, %v1807_v17 }
 0x31c   : > { %v1958_v63 = vmul.f32 %v6760_v40, %v1809_v50  ;;  %v7505_v7 = vpack.c.bf16 %v2109_v18, %v2107_v32  ;;  %v2273_v12 = vmul.bf16 1056980736, %v7488_v49  ;;  %v2091_v61 = vadd.f32 %v9931_v22, %v1952_v43  ;;  %v10050_v50 = vld [vmem:[#allocation50_spill] sm:$0xff] }
 0x31d   : > { %v4831_v51 = vpop.eup %4830  ;;  %v7510_v0 = vpack.c.bf16 %v2114_v34, %v2112_v33  ;;  %v2096_v16 = vadd.f32 %v10030_v11, %v1957_v41  ;;  %v2098_v30 = vadd.f32 %v10030_v11, %v1959_v2  ;;  %v2111_v17 = vadd.f32 %v9931_v22, %v6816_v14 }
 0x31e   : > { %v2395_v10 = vadd.bf16 1065369472, %v4831_v51  ;;  %v2093_v51 = vadd.f32 %v9931_v22, %v1954_v37  ;;  %v2276_v43 = vmul.bf16 1056980736, %v7493_v54  ;;  %v1961_v37 = vmul.f32 %v7132_v26, %v1812_v27 }
 0x31f   : > { %v1963_v33 = vmul.f32 %v7132_v26, %v1814_v56  ;;  %v2113_v41 = vadd.f32 %v9931_v22, %v6822_v48  ;;  %4844 = vtanh.bf16 %v2273_v12  ;;  %v2095_v32 = vadd.f32 %v9931_v22, %v1956_v9  ;;  %v10052_v9 = vld [vmem:[#allocation51_spill] sm:$0xff] }
 0x320   : > { %v4833_v20 = vpop.eup %4832  ;;  %v2459_v18 = vmul.bf16 1056980736, %v2395_v10  ;;  %v7523_v14 = vpack.c.bf16 %v2093_v51, %v2091_v61  ;;  %v2097_v1 = vadd.f32 %v9931_v22, %v1958_v63  ;;  %4846 = vtanh.bf16 %v2276_v43  ;;  %v10053_v63 = vld [vmem:[#allocation52_spill] sm:$0xff] }
 0x321   : > { %v2396_v57 = vadd.bf16 1065369472, %v4833_v20  ;;  %v7530_v27 = vpack.c.bf16 %v2113_v41, %v2111_v17  ;;  %v2116_v48 = vadd.f32 %v10030_v11, %v7204_v8  ;;  %v1818_v61 = vsub.f32 %v10052_v9, %v6690_v13 }
 0x322   : > { %v4835_v55 = vpop.eup %4834  ;;  %v2523_v56 = vmul.bf16 %v2459_v18, %v7160_v25  ;;  %v10054_v25 = vsub.f32 %v10043_v35, %v6588_v24  ;;  %v2275_v8 = vmul.bf16 1056980736, %v7523_v14  ;;  %v10055_v17 = vsub.f32 %v10044_v21, %v6588_v24 }
 0x323   : > { %v2398_v62 = vadd.bf16 1065369472, %v4835_v55  ;;  %v4837_v58 = vpop.eup %4836  ;;  %v2460_v34 = vmul.bf16 1056980736, %v2396_v57  ;;  %v7527_v55 = vpack.c.bf16 %v2098_v30, %v2096_v16  ;;  %v1820_v16 = vsub.f32 %v10053_v63, %v6690_v13 }
 0x324   : > { %v4839_v2 = vpop.eup %4838  ;;  %v2397_v57 = vadd.bf16 1065369472, %v4837_v58  ;;  %v1960_v58 = vmul.f32 %v6760_v40, %v10054_v25  ;;  %v2118_v30 = vadd.f32 %v10030_v11, %v7210_v19  ;;  %v7553_v18 = vpack.c.bf16 %v2097_v1, %v2095_v32 }
 0x325   : > { %v2462_v20 = vmul.bf16 1056980736, %v2398_v62  ;;  %v2524_v10 = vmul.bf16 %v2460_v34, %v7427_v3  ;;  %v10051_v62 = vld [vmem:[#allocation49_spill] sm:$0xff]  ;;  %v2400_v51 = vadd.bf16 1065369472, %v4839_v2  ;;  %v2100_v43 = vadd.f32 %v10030_v11, %v1961_v37  ;;  %v10058_v37 = vld [vmem:[#allocation16_spill] sm:$0xff] }
 0x326   : > { %v1816_v12 = vsub.f32 %v10051_v62, %v6690_v13  ;;  %v2102_v35 = vadd.f32 %v10030_v11, %v1963_v33  ;;  %v10056_v34 = vld [vmem:[#allocation53_spill] sm:$0xff]  ;;  %v2461_v2 = vmul.bf16 1056980736, %v2397_v57  ;;  %v10057_v21 = vsub.f32 %v10046_v60, %v6588_v24 }
 0x327   : > { %2754 = vmatprep.mubr.bf16.mxu1 %v2524_v10  ;;  %v2526_v3 = vmul.bf16 %v2462_v20, %v7429_v39  ;;  %v1962_v39 = vmul.f32 %v6760_v40, %v10055_v17  ;;  %v1822_v41 = vsub.f32 %v10056_v34, %v6690_v13  ;;  %v2278_v20 = vmul.bf16 1056980736, %v7527_v55  ;;  %v10061_v17 = vld [vmem:[#allocation71_spill] sm:$0xff] }
 0x328   : > { %2755 = vmatmul.mubr.bf16.vlgmr.msra.gmra.mxu1 %v2523_v56  ;;  %v7560_v10 = vpack.c.bf16 %v2118_v30, %v2116_v48  ;;  %v4841_v19 = vpop.eup %4840  ;;  %v1964_v56 = vmul.f32 %v6760_v40, %v10057_v21  ;;  %v1965_v1 = vmul.f32 %v7132_v26, %v1816_v12  ;;  %v2464_v32 = vmul.bf16 1056980736, %v2400_v51  ;;  %v10059_v48 = vld [vmem:[#allocation58_spill] sm:$0xff]  ;;  %v10062_v21 = vld [vmem:[#allocation60_spill] sm:$0xff] }
 0x329   : > { %2762 = vmatprep.mubr.bf16.mxu1 %v2526_v3  ;;  %v2115_v33 = vadd.f32 %v9931_v22, %v10058_v37  ;;  %v4843_v62 = vpop.eup %4842  ;;  %v1967_v13 = vmul.f32 %v7132_v26, %v1818_v61  ;;  %4848 = vtanh.bf16 %v2275_v8  ;;  %v2099_v57 = vadd.f32 %v9931_v22, %v1960_v58  ;;  %v10060_v12 = vld [vmem:[#allocation70_spill] sm:$0xff] }
 0x32a   : > { %v2117_v9 = vadd.f32 %v9931_v22, %v10059_v48  ;;  %v2277_v3 = vmul.bf16 1056980736, %v7553_v18  ;;  %v7574_v60 = vpack.c.bf16 %v2102_v35, %v2100_v43  ;;  %v2101_v63 = vadd.f32 %v9931_v22, %v1962_v39 }
 0x32b   : > { %v2120_v51 = vadd.f32 %v10030_v11, %v10060_v12  ;;  %v2525_v25 = vmul.bf16 %v2461_v2, %v7415_v53  ;;  %v2399_v30 = vadd.bf16 1065369472, %v4841_v19  ;;  %4850 = vtanh.bf16 %v2278_v20  ;;  %v10064_v20 = vld [vmem:[#allocation62_spill] sm:$0xff] }
 0x32c   : > { %v7580_v61 = vpack.c.bf16 %v2117_v9, %v2115_v33  ;;  %v2528_v58 = vmul.bf16 %v2464_v32, %v7431_v31  ;;  %v2402_v8 = vadd.bf16 1065369472, %v4843_v62  ;;  %v2122_v34 = vadd.f32 %v10030_v11, %v10061_v17  ;;  %v10065_v62 = vld [vmem:[#allocation72_spill] sm:$0xff] }
 0x32d   : > { %v2119_v43 = vadd.f32 %v9931_v22, %v10062_v21  ;;  %v10063_v39 = vsub.f32 %v10050_v50, %v6588_v24  ;;  %v2104_v53 = vadd.f32 %v10030_v11, %v1965_v1  ;;  %v2106_v2 = vadd.f32 %v10030_v11, %v1967_v13  ;;  %v4845_v24 = vpop.eup %4844 }
 0x32e   : > { %v2121_v31 = vadd.f32 %v9931_v22, %v10064_v20  ;;  %v1969_v19 = vmul.f32 %v7132_v26, %v1820_v16  ;;  %v2280_v32 = vmul.bf16 1056980736, %v7574_v60  ;;  %v7597_v37 = vpack.c.bf16 %v2101_v63, %v2099_v57  ;;  %v4847_v16 = vpop.eup %4846  ;;  %v10066_v63 = vld [vmem:[#allocation100_spill] sm:$0xff] }
 0x32f   : > { %v1966_v35 = vmul.f32 %v6760_v40, %v10063_v39  ;;  %v7599_v33 = vpack.c.bf16 %v2122_v34, %v2120_v51  ;;  %v1971_v40 = vmul.f32 %v7132_v26, %v1822_v41  ;;  %v2463_v50 = vmul.bf16 1056980736, %v2399_v30  ;;  %v10069_v34 = vld [vmem:[#allocation13_spill] sm:$0xff] }
 0x330   : > { %2763 = vmatmul.mubr.bf16.gmra.mxu1 %v2525_v25  ;;  %v2124_v1 = vadd.f32 %v10030_v11, %v10065_v62  ;;  %v2466_v13 = vmul.bf16 1056980736, %v2402_v8  ;;  %4852 = vtanh.bf16 %v2277_v3  ;;  %v2103_v48 = vadd.f32 %v9931_v22, %v1964_v56  ;;  %v10067_v25 = vld [vmem:[#allocation3_spill] sm:$0xff]  ;;  %v10068_v8 = vld [vmem:[#allocation5_spill] sm:$0xff]  ;;  %v10073_v62 = vld [vmem:[#allocation74_spill] sm:$0xff] }
 0x331   : > { %2770 = vmatprep.mubr.bf16.mxu1 %v2528_v58  ;;  %v7605_v9 = vpack.c.bf16 %v2121_v31, %v2119_v43  ;;  %v7607_v12 = vpack.c.bf16 %v2106_v2, %v2104_v53  ;;  %v2105_v57 = vadd.f32 %v9931_v22, %v1966_v35  ;;  %v2126_v51 = vadd.f32 %v10030_v11, %v10066_v63  ;;  %v10070_v35 = vld [vmem:[#allocation73_spill] sm:$0xff]  ;;  %v10071_v2 = vld [vmem:[#allocation7_spill] sm:$0xff] }
 0x332   : > { %v2123_v26 = vadd.f32 %v9931_v22, %v10067_v25  ;;  %v2401_v41 = vadd.bf16 1065369472, %v4845_v24  ;;  %4854 = vtanh.bf16 %v2280_v32  ;;  %v2279_v30 = vmul.bf16 1056980736, %v7597_v37  ;;  %v10072_v32 = vld [vmem:[#allocation9_spill] sm:$0xff] }
 0x333   : > { %v2108_v3 = vadd.f32 %v10030_v11, %v1969_v19  ;;  %v2527_v56 = vmul.bf16 %v2463_v50, %v7455_v46  ;;  %v7617_v58 = vpack.c.bf16 %v2126_v51, %v2124_v1  ;;  %v2125_v17 = vadd.f32 %v9931_v22, %v10068_v8 }
 0x334   : > { %v2128_v21 = vadd.f32 %v10030_v11, %v10069_v34  ;;  %v2530_v43 = vmul.bf16 %v2466_v13, %v7457_v42  ;;  %v2404_v39 = vadd.bf16 1065369472, %v4847_v16  ;;  %v2130_v53 = vadd.f32 %v10030_v11, %v10070_v35  ;;  %v10074_v13 = vld [vmem:[#allocation76_spill] sm:$0xff] }
 0x335   : > { %v2127_v20 = vadd.f32 %v9931_v22, %v10071_v2  ;;  %v2282_v46 = vmul.bf16 1056980736, %v7607_v12  ;;  %v2110_v31 = vadd.f32 %v10030_v11, %v1971_v40  ;;  %v7630_v19 = vpack.c.bf16 %v2125_v17, %v2123_v26  ;;  %v10076_v17 = vld [vmem:[#allocation75_spill] sm:$0xff] }
 0x336   : > { %v2129_v24 = vadd.f32 %v9931_v22, %v10072_v32  ;;  %v7634_v50 = vpack.c.bf16 %v2130_v53, %v2128_v21  ;;  %v2132_v42 = vadd.f32 %v10030_v11, %v7252_v36  ;;  %v2134_v1 = vadd.f32 %v10030_v11, %v10073_v62  ;;  %v10078_v32 = vld [vmem:[#allocation81_spill] sm:$0xff] }
 0x337   : > { %v2131_v16 = vadd.f32 %v9931_v22, %v10074_v13  ;;  %v4849_v63 = vpop.eup %4848  ;;  %v2465_v51 = vmul.bf16 1056980736, %v2401_v41  ;;  %v2468_v25 = vmul.bf16 1056980736, %v2404_v39  ;;  %v2136_v34 = vadd.f32 %v10030_v11, %v10076_v17 }
 0x338   : > { %2771 = vmatmul.mubr.bf16.gmra.mxu1 %v2527_v56  ;;  %v7642_v40 = vpack.c.bf16 %v2129_v24, %v2127_v20  ;;  %v7644_v26 = vpack.c.bf16 %v2134_v1, %v2132_v42  ;;  %v10075_v56 = vld [vmem:[#allocation78_spill] sm:$0xff]  ;;  %4856 = vtanh.bf16 %v2279_v30  ;;  %v7650_v21 = vpack.c.bf16 %v2105_v57, %v2103_v48  ;;  %v10079_v42 = vld [vmem:[#allocation55_spill] sm:$0xff] }
 0x339   : > { %2778 = vmatprep.mubr.bf16.mxu1 %v2530_v43  ;;  %v2133_v8 = vadd.f32 %v9931_v22, %v10075_v56  ;;  %v4851_v36 = vpop.eup %4850  ;;  %v10077_v43 = vld [vmem:[#allocation77_spill] sm:$0xff]  ;;  %v2403_v53 = vadd.bf16 1065369472, %v4849_v63  ;;  %4858 = vtanh.bf16 %v2282_v46  ;;  %v7654_v41 = vpack.c.bf16 %v2110_v31, %v2108_v3 }
 0x33a   : > { %v2138_v35 = vadd.f32 %v10030_v11, %v10077_v43  ;;  %v2529_v2 = vmul.bf16 %v2465_v51, %v7488_v49  ;;  %v2135_v24 = vadd.f32 %v9931_v22, %v10078_v32  ;;  %v2137_v48 = vadd.f32 %v9931_v22, %v10079_v42  ;;  %v10080_v31 = vld [vmem:[#allocation17_spill] sm:$0xff] }
 0x33b   : > { %v7656_v39 = vpack.c.bf16 %v2133_v8, %v2131_v16  ;;  %v2532_v57 = vmul.bf16 %v2468_v25, %v7493_v54  ;;  %v2406_v30 = vadd.bf16 1065369472, %v4851_v36  ;;  %v2140_v46 = vadd.f32 %v10030_v11, %v7276_v52  ;;  %v10081_v16 = vld [vmem:[#allocation63_spill] sm:$0xff]  ;;  %v10083_v43 = vld [vmem:[#allocation65_spill] sm:$0xff] }
 0x33c   : > { %v7659_v20 = vpack.c.bf16 %v2138_v35, %v2136_v34  ;;  %v7668_v3 = vpack.c.bf16 %v2137_v48, %v2135_v24  ;;  %v2142_v49 = vadd.f32 %v10030_v11, %v7282_v59  ;;  %v2139_v62 = vadd.f32 %v9931_v22, %v10080_v31  ;;  %v10082_v34 = vld [vmem:[#allocation64_spill] sm:$0xff] }
 0x33d   : > { %v2281_v13 = vmul.bf16 1056980736, %v7650_v21  ;;  %v2141_v54 = vadd.f32 %v9931_v22, %v10081_v16  ;;  %v2467_v63 = vmul.bf16 1056980736, %v2403_v53  ;;  %v2284_v51 = vmul.bf16 1056980736, %v7654_v41 }
 0x33e   : > { %v4853_v1 = vpop.eup %4852  ;;  %v7678_v52 = vpack.c.bf16 %v2142_v49, %v2140_v46  ;;  %v2144_v25 = vadd.f32 %v10030_v11, %v7288_v23  ;;  %v2470_v59 = vmul.bf16 1056980736, %v2406_v30  ;;  %v2146_v17 = vadd.f32 %v10030_v11, %v7294_v29  ;;  %v10085_v49 = vld [vmem:[#allocation67_spill] sm:$0xff] }
 0x33f   : > { %v7682_v8 = vpack.c.bf16 %v2141_v54, %v2139_v62  ;;  %v2143_v36 = vadd.f32 %v9931_v22, %v10082_v34  ;;  %v2145_v35 = vadd.f32 %v9931_v22, %v10083_v43  ;;  %4860 = vtanh.bf16 %v2281_v13 }
 0x340   : > { %2779 = vmatmul.mubr.bf16.gmra.mxu1 %v2529_v2  ;;  %v4855_v56 = vpop.eup %4854  ;;  %v7690_v53 = vpack.c.bf16 %v2146_v17, %v2144_v25  ;;  %v2148_v2 = vadd.f32 %v10030_v11, %v7300_v6  ;;  %v2531_v23 = vmul.bf16 %v2467_v63, %v7523_v14  ;;  %v2405_v32 = vadd.bf16 1065369472, %v4853_v1  ;;  %v10086_v63 = vld [vmem:[#allocation68_spill] sm:$0xff] }
 0x341   : > { %2786 = vmatprep.mubr.bf16.mxu1 %v2532_v57  ;;  %4862 = vtanh.bf16 %v2284_v51  ;;  %v7695_v24 = vpack.c.bf16 %v2145_v35, %v2143_v36  ;;  %v2534_v29 = vmul.bf16 %v2470_v59, %v7527_v55  ;;  %v2408_v42 = vadd.bf16 1065369472, %v4855_v56  ;;  %v10084_v57 = vld [vmem:[#allocation66_spill] sm:$0xff]  ;;  %v10087_v56 = vld [vmem:[#allocation69_spill] sm:$0xff] }
 0x342   : > { %v2150_v48 = vadd.f32 %v10030_v11, %v7306_v44  ;;  %v2147_v30 = vadd.f32 %v9931_v22, %v10084_v57  ;;  %v2283_v46 = vmul.bf16 1056980736, %v7505_v7  ;;  %v2149_v6 = vadd.f32 %v9931_v22, %v10085_v49 }
 0x343   : > { %v2152_v31 = vadd.f32 %v10030_v11, %v7312_v38  ;;  %v2469_v62 = vmul.bf16 1056980736, %v2405_v32  ;;  %v2286_v1 = vmul.bf16 1056980736, %v7510_v0  ;;  %v2154_v13 = vadd.f32 %v10030_v11, %v7318_v45  ;;  %v10088_v32 = vld [vmem:[#allocation102_spill] sm:$0xff] }
 0x344   : > { %v7705_v14 = vpack.c.bf16 %v2150_v48, %v2148_v2  ;;  %v7710_v44 = vpack.c.bf16 %v2149_v6, %v2147_v30  ;;  %v2472_v54 = vmul.bf16 1056980736, %v2408_v42  ;;  %v2151_v51 = vadd.f32 %v9931_v22, %v10086_v63 }
 0x345   : > { %4864 = vtanh.bf16 %v2283_v46  ;;  %v7716_v25 = vpack.c.bf16 %v2154_v13, %v2152_v31  ;;  %v2153_v38 = vadd.f32 %v9931_v22, %v10087_v56  ;;  %v2533_v59 = vmul.bf16 %v2469_v62, %v7553_v18  ;;  %v10090_v62 = vld [vmem:[#allocation104_spill] sm:$0xff] }
 0x346   : > { %v4857_v55 = vpop.eup %4856  ;;  %4866 = vtanh.bf16 %v2286_v1  ;;  %v2536_v34 = vmul.bf16 %v2472_v54, %v7574_v60  ;;  %v2156_v45 = vadd.f32 %v10030_v11, %v7324_v47  ;;  %v2285_v35 = vmul.bf16 1056980736, %v7530_v27  ;;  %v10089_v60 = vld [vmem:[#allocation103_spill] sm:$0xff]  ;;  %v10091_v54 = vld [vmem:[#allocation105_spill] sm:$0xff] }
 0x347   : > { %v4859_v16 = vpop.eup %4858  ;;  %v2407_v17 = vadd.bf16 1065369472, %v4857_v55  ;;  %v7722_v43 = vpack.c.bf16 %v2153_v38, %v2151_v51  ;;  %v2288_v2 = vmul.bf16 1056980736, %v7560_v10  ;;  %v2157_v42 = vadd.f32 %v9931_v22, %v10089_v60 }
 0x348   : > { %2787 = vmatmul.mubr.bf16.gmra.mxu1 %v2531_v23  ;;  %v2410_v36 = vadd.bf16 1065369472, %v4859_v16  ;;  %v2158_v23 = vadd.f32 %v10030_v11, %v7330_v15  ;;  %4868 = vtanh.bf16 %v2285_v35  ;;  %v2160_v49 = vadd.f32 %v10030_v11, %v7336_v28 }
 0x349   : > { %2794 = vmatprep.mubr.bf16.mxu1 %v2534_v29  ;;  %v2471_v18 = vmul.bf16 1056980736, %v2407_v17  ;;  %v2155_v29 = vadd.f32 %v9931_v22, %v10088_v32  ;;  %v2162_v15 = vadd.f32 %v10030_v11, %v7342_v5  ;;  %4870 = vtanh.bf16 %v2288_v2 }
 0x34a   : > { %v2474_v57 = vmul.bf16 1056980736, %v2410_v36  ;;  %v7734_v30 = vpack.c.bf16 %v2158_v23, %v2156_v45  ;;  %v2159_v1 = vadd.f32 %v9931_v22, %v10090_v62  ;;  %v2161_v63 = vadd.f32 %v9931_v22, %v10091_v54  ;;  %v10094_v45 = vld [vmem:[#allocation107_spill] sm:$0xff] }
 0x34b   : > { %v7736_v46 = vpack.c.bf16 %v2157_v42, %v2155_v29  ;;  %v2535_v6 = vmul.bf16 %v2471_v18, %v7597_v37  ;;  %v7743_v55 = vpack.c.bf16 %v2162_v15, %v2160_v49  ;;  %v2287_v28 = vmul.bf16 1056980736, %v7580_v61  ;;  %v10095_v18 = vld [vmem:[#allocation80_spill] sm:$0xff]  ;;  %v10096_v42 = vld [vmem:[#allocation82_spill] sm:$0xff] }
 0x34c   : > { %v2538_v13 = vmul.bf16 %v2474_v57, %v7607_v12  ;;  %v7751_v5 = vpack.c.bf16 %v2161_v63, %v2159_v1  ;;  %v2164_v37 = vadd.f32 %v10030_v11, %v7348_v4  ;;  %v2290_v38 = vmul.bf16 1056980736, %v7599_v33  ;;  %v10097_v57 = vld [vmem:[#allocation108_spill] sm:$0xff] }
 0x34d   : > { %v4861_v48 = vpop.eup %4860  ;;  %v2165_v35 = vadd.f32 %v9931_v22, %v10094_v45  ;;  %v2168_v4 = vadd.f32 %v10030_v11, %v10095_v18  ;;  %4872 = vtanh.bf16 %v2287_v28  ;;  %v2289_v62 = vmul.bf16 1056980736, %v7605_v9 }
 0x34e   : > { %v2409_v31 = vadd.bf16 1065369472, %v4861_v48  ;;  %4874 = vtanh.bf16 %v2290_v38  ;;  %v2170_v48 = vadd.f32 %v10030_v11, %v10096_v42  ;;  %v2292_v28 = vmul.bf16 1056980736, %v7617_v58  ;;  %v10106_v42 = vld [vmem:[#allocation113_spill] sm:$0xff] }
 0x34f   : > { %v4863_v47 = vpop.eup %4862  ;;  %4876 = vtanh.bf16 %v2289_v62 }
 0x350   : > { %2795 = vmatmul.mubr.bf16.gmra.mxu1 %v2533_v59  ;;  %v2412_v16 = vadd.bf16 1065369472, %v4863_v47  ;;  %v2473_v56 = vmul.bf16 1056980736, %v2409_v31  ;;  %v10092_v59 = vld [vmem:[#allocation79_spill] sm:$0xff]  ;;  %v2167_v47 = vadd.f32 %v9931_v22, %v10097_v57  ;;  %v7777_v1 = vpack.c.bf16 %v2170_v48, %v2168_v4 }
 0x351   : > { %2802 = vmatprep.mubr.bf16.mxu1 %v2536_v34  ;;  %v2166_v12 = vadd.f32 %v10030_v11, %v10092_v59  ;;  %v10093_v34 = vld [vmem:[#allocation106_spill] sm:$0xff]  ;;  %v2177_v48 = vadd.f32 %v9931_v22, %v10106_v42  ;;  %4878 = vtanh.bf16 %v2292_v28 }
 0x352   : > { %v2476_v17 = vmul.bf16 1056980736, %v2412_v16  ;;  %v2163_v36 = vadd.f32 %v9931_v22, %v10093_v34  ;;  %v2537_v60 = vmul.bf16 %v2473_v56, %v7650_v21  ;;  %v10103_v34 = vld [vmem:[#allocation24_spill] sm:$0xff] }
 0x353   : > { %v4865_v51 = vpop.eup %4864  ;;  %v7762_v23 = vpack.c.bf16 %v2166_v12, %v2164_v37  ;;  %v10102_v12 = vld [vmem:[#allocation111_spill] sm:$0xff] }
 0x354   : > { %v4867_v2 = vpop.eup %4866  ;;  %v2411_v32 = vadd.bf16 1065369472, %v4865_v51  ;;  %v7766_v29 = vpack.c.bf16 %v2165_v35, %v2163_v36  ;;  %v2540_v49 = vmul.bf16 %v2476_v17, %v7654_v41  ;;  %v10100_v41 = vld [vmem:[#allocation20_spill] sm:$0xff]  ;;  %v10101_v51 = vld [vmem:[#allocation110_spill] sm:$0xff]  ;;  %v2173_v17 = vadd.f32 %v9931_v22, %v10102_v12  ;;  %v10104_v35 = vld [vmem:[#allocation101_spill] sm:$0xff] }
 0x355   : > { %v2414_v15 = vadd.bf16 1065369472, %v4867_v2  ;;  %v2174_v37 = vadd.f32 %v10030_v11, %v10100_v41  ;;  %v2171_v56 = vadd.f32 %v9931_v22, %v10101_v51  ;;  %v2176_v36 = vadd.f32 %v10030_v11, %v10103_v34  ;;  %v10109_v41 = vld [vmem:[#allocation85_spill] sm:$0xff]  ;;  %v10111_v51 = vld [vmem:[#allocation114_spill] sm:$0xff] }
 0x356   : > { %v4869_v54 = vpop.eup %4868  ;;  %v2475_v63 = vmul.bf16 1056980736, %v2411_v32  ;;  %v2178_v2 = vadd.f32 %v10030_v11, %v10104_v35  ;;  %v10105_v32 = vld [vmem:[#allocation112_spill] sm:$0xff] }
 0x357   : > { %v4871_v38 = vpop.eup %4870  ;;  %v2478_v59 = vmul.bf16 1056980736, %v2414_v15  ;;  %v2413_v18 = vadd.bf16 1065369472, %v4869_v54  ;;  %v7796_v4 = vpack.c.bf16 %v2173_v17, %v2171_v56  ;;  %v2291_v54 = vmul.bf16 1056980736, %v7630_v19 }
 0x358   : > { %2803 = vmatmul.mubr.bf16.gmra.mxu1 %v2535_v6  ;;  %v10098_v6 = vld [vmem:[#allocation109_spill] sm:$0xff]  ;;  %v2539_v57 = vmul.bf16 %v2475_v63, %v7505_v7  ;;  %v2416_v15 = vadd.bf16 1065369472, %v4871_v38  ;;  %v2182_v7 = vadd.f32 %v10030_v11, %v10109_v41  ;;  %v2179_v56 = vadd.f32 %v9931_v22, %v10111_v51 }
 0x359   : > { %2810 = vmatprep.mubr.bf16.mxu1 %v2538_v13  ;;  %v2169_v31 = vadd.f32 %v9931_v22, %v10098_v6  ;;  %v10099_v13 = vld [vmem:[#allocation83_spill] sm:$0xff]  ;;  %v10110_v63 = vld [vmem:[#allocation117_spill] sm:$0xff]  ;;  %4880 = vtanh.bf16 %v2291_v54 }
 0x35a   : > { %v2172_v21 = vadd.f32 %v10030_v11, %v10099_v13  ;;  %v10108_v13 = vld [vmem:[#allocation116_spill] sm:$0xff]  ;;  %v2185_v28 = vadd.f32 %v9931_v22, %v10110_v63  ;;  %v2480_v17 = vmul.bf16 1056980736, %v2416_v15  ;;  %v10117_v41 = vld [vmem:[#allocation89_spill] sm:$0xff]  ;;  %v10118_v54 = vld [vmem:[#allocation91_spill] sm:$0xff] }
 0x35b   : > { %v7781_v16 = vpack.c.bf16 %v2169_v31, %v2167_v47  ;;  %v7803_v47 = vpack.c.bf16 %v2178_v2, %v2176_v36  ;;  %v10107_v31 = vld [vmem:[#allocation84_spill] sm:$0xff]  ;;  %v4873_v38 = vpop.eup %4872  ;;  %v10113_v36 = vld [vmem:[#allocation115_spill] sm:$0xff]  ;;  %v2190_v63 = vadd.f32 %v10030_v11, %v10118_v54 }
 0x35c   : > { %v7792_v45 = vpack.c.bf16 %v2174_v37, %v2172_v21  ;;  %v2180_v62 = vadd.f32 %v10030_v11, %v10107_v31  ;;  %v2183_v21 = vadd.f32 %v9931_v22, %v10108_v13  ;;  %v2294_v37 = vmul.bf16 1056980736, %v7634_v50  ;;  %v4875_v2 = vpop.eup %4874  ;;  %v10125_v54 = vld [vmem:[#allocation96_spill] sm:$0xff] }
 0x35d   : > { %v2181_v35 = vadd.f32 %v9931_v22, %v10113_v36  ;;  %v2544_v51 = vmul.bf16 %v2480_v17, %v7560_v10  ;;  %v10119_v36 = vld [vmem:[#allocation119_spill] sm:$0xff]  ;;  %v4877_v17 = vpop.eup %4876 }
 0x35e   : > { %v7822_v34 = vpack.c.bf16 %v2182_v7, %v2180_v62  ;;  %4882 = vtanh.bf16 %v2294_v37  ;;  %v7835_v31 = vpack.c.bf16 %v2185_v28, %v2183_v21  ;;  %v2415_v62 = vadd.bf16 1065369472, %v4873_v38  ;;  %v10120_v28 = vld [vmem:[#allocation90_spill] sm:$0xff] }
 0x35f   : > { %v7833_v15 = vpack.c.bf16 %v2181_v35, %v2179_v56  ;;  %v2188_v7 = vadd.f32 %v10030_v11, %v10117_v41  ;;  %v2193_v37 = vadd.f32 %v9931_v22, %v10120_v28  ;;  %v2296_v56 = vmul.bf16 1056980736, %v7644_v26  ;;  %v10121_v35 = vld [vmem:[#allocation93_spill] sm:$0xff] }
 0x360   : > { %2811 = vmatmul.mubr.bf16.gmra.mxu1 %v2537_v60  ;;  %v2175_v60 = vadd.f32 %v9931_v22, %v10105_v32  ;;  %v10114_v32 = vld [vmem:[#allocation87_spill] sm:$0xff]  ;;  %v2192_v10 = vadd.f32 %v10030_v11, %v10121_v35  ;;  %v10127_v28 = vld [vmem:[#allocation97_spill] sm:$0xff] }
 0x361   : > { %2818 = vmatprep.mubr.bf16.mxu1 %v2540_v49  ;;  %v2542_v49 = vmul.bf16 %v2478_v59, %v7510_v0  ;;  %v2477_v0 = vmul.bf16 1056980736, %v2413_v18  ;;  %v10112_v59 = vld [vmem:[#allocation118_spill] sm:$0xff]  ;;  %v7847_v21 = vpack.c.bf16 %v2190_v63, %v2188_v7  ;;  %v4879_v7 = vpop.eup %4878 }
 0x362   : > { %v7806_v6 = vpack.c.bf16 %v2177_v48, %v2175_v60  ;;  %v2187_v12 = vadd.f32 %v9931_v22, %v10112_v59  ;;  %v2189_v60 = vadd.f32 %v9931_v22, %v10114_v32  ;;  %v10115_v18 = vld [vmem:[#allocation86_spill] sm:$0xff]  ;;  %v10116_v48 = vld [vmem:[#allocation88_spill] sm:$0xff]  ;;  %v2418_v59 = vadd.bf16 1065369472, %v4875_v2 }
 0x363   : > { %v2184_v42 = vadd.f32 %v10030_v11, %v10115_v18  ;;  %v10122_v2 = vld [vmem:[#allocation92_spill] sm:$0xff]  ;;  %v10123_v18 = vld [vmem:[#allocation94_spill] sm:$0xff] }
 0x364   : > { %v7852_v38 = vpack.c.bf16 %v2189_v60, %v2187_v12  ;;  %v2195_v32 = vadd.f32 %v9931_v22, %v10122_v2  ;;  %v2482_v41 = vmul.bf16 1056980736, %v2418_v59  ;;  %v2199_v12 = vadd.f32 %v9931_v22, %v10125_v54  ;;  %v10126_v63 = vld [vmem:[#allocation98_spill] sm:$0xff]  ;;  %v10128_v59 = vld [vmem:[#allocation99_spill] sm:$0xff] }
 0x365   : > { %v2417_v2 = vadd.bf16 1065369472, %v4877_v17  ;;  %v2298_v17 = vmul.bf16 1056980736, %v7659_v20 }
 0x368   : > { %2819 = vmatmul.mubr.bf16.gmra.mxu1 %v2539_v57  ;;  %v2186_v57 = vadd.f32 %v10030_v11, %v10116_v48  ;;  %v2479_v48 = vmul.bf16 1056980736, %v2415_v62  ;;  %v2196_v62 = vadd.f32 %v10030_v11, %v10127_v28 }
 0x369   : > { %2826 = vmatprep.mubr.bf16.mxu1 %v2542_v49  ;;  %v2541_v49 = vmul.bf16 %v2477_v0, %v7530_v27  ;;  %v2191_v27 = vadd.f32 %v9931_v22, %v10119_v36  ;;  %v2293_v0 = vmul.bf16 1056980736, %v7642_v40 }
 0x36a   : > { %v7837_v13 = vpack.c.bf16 %v2186_v57, %v2184_v42  ;;  %v2197_v42 = vadd.f32 %v9931_v22, %v10123_v18  ;;  %v10124_v57 = vld [vmem:[#allocation95_spill] sm:$0xff]  ;;  %v2543_v35 = vmul.bf16 %v2479_v48, %v7580_v61  ;;  %v2198_v18 = vadd.f32 %v10030_v11, %v10128_v59  ;;  %v10130_v48 = vld [vmem:[#allocation30_spill] sm:$0xff] }
 0x36b   : > { %4884 = vtanh.bf16 %v2293_v0  ;;  %v7868_v36 = vpack.c.bf16 %v2193_v37, %v2191_v27  ;;  %v2546_v0 = vmul.bf16 %v2482_v41, %v7599_v33  ;;  %v2295_v37 = vmul.bf16 1056980736, %v7656_v39 }
 0x36c   : > { %4886 = vtanh.bf16 %v2296_v56  ;;  %v4881_v56 = vpop.eup %4880  ;;  %v2481_v61 = vmul.bf16 1056980736, %v2417_v2 }
 0x36d   : > { %v4883_v33 = vpop.eup %4882  ;;  %4888 = vtanh.bf16 %v2295_v37 }
 0x36e   : > { %v2545_v54 = vmul.bf16 %v2481_v61, %v7605_v9  ;;  %4890 = vtanh.bf16 %v2298_v17 }
 0x370   : > { %2827 = vmatmul.mubr.bf16.gmra.mxu1 %v2541_v49  ;;  %v2194_v49 = vadd.f32 %v10030_v11, %v10124_v57  ;;  %v7875_v57 = vpack.c.bf16 %v2197_v42, %v2195_v32  ;;  %v2202_v32 = vadd.f32 %v10030_v11, %v10130_v48 }
 0x371   : > { %2834 = vmatprep.mubr.bf16.mxu1 %v2544_v51  ;;  %v2201_v51 = vadd.f32 %v9931_v22, %v10126_v63  ;;  %v10129_v22 = vld [vmem:[#allocation27_spill] sm:$0xff]  ;;  %v2419_v63 = vadd.bf16 1065369472, %v4881_v56 }
 0x372   : > { %v7864_v60 = vpack.c.bf16 %v2194_v49, %v2192_v10  ;;  %v2420_v10 = vadd.bf16 1065369472, %v4879_v7  ;;  %v7878_v49 = vpack.c.bf16 %v2198_v18, %v2196_v62  ;;  %v2200_v27 = vadd.f32 %v10030_v11, %v10129_v22 }
 0x373   : > { %v7886_v42 = vpack.c.bf16 %v2201_v51, %v2199_v12  ;;  %v2422_v62 = vadd.bf16 1065369472, %v4883_v33  ;;  %v2483_v11 = vmul.bf16 1056980736, %v2419_v63  ;;  %v2300_v12 = vmul.bf16 1056980736, %v7678_v52 }
 0x374   : > { %v2484_v41 = vmul.bf16 1056980736, %v2420_v10  ;;  %v7888_v7 = vpack.c.bf16 %v2202_v32, %v2200_v27  ;;  %v2302_v27 = vmul.bf16 1056980736, %v7690_v53 }
 0x375   : > { %v2486_v59 = vmul.bf16 1056980736, %v2422_v62  ;;  %v2547_v18 = vmul.bf16 %v2483_v11, %v7630_v19 }
 0x376   : > { %v2548_v28 = vmul.bf16 %v2484_v41, %v7617_v58  ;;  %v2299_v58 = vmul.bf16 1056980736, %v7682_v8  ;;  %v2304_v41 = vmul.bf16 1056980736, %v7705_v14 }
 0x377   : > { %v2550_v9 = vmul.bf16 %v2486_v59, %v7634_v50  ;;  %v2301_v50 = vmul.bf16 1056980736, %v7695_v24 }
 0x378   : > { %2835 = vmatmul.mubr.bf16.gmra.mxu1 %v2543_v35  ;;  %v2297_v35 = vmul.bf16 1056980736, %v7668_v3 }
 0x379   : > { %2842 = vmatprep.mubr.bf16.mxu1 %v2546_v0  ;;  %v4885_v2 = vpop.eup %4884 }
 0x37a   : > { %v4887_v51 = vpop.eup %4886  ;;  %4892 = vtanh.bf16 %v2297_v35  ;;  %v2421_v0 = vadd.bf16 1065369472, %v4885_v2 }
 0x37b   : > { %4894 = vtanh.bf16 %v2300_v12  ;;  %v2424_v10 = vadd.bf16 1065369472, %v4887_v51  ;;  %v4889_v37 = vpop.eup %4888  ;;  %v2306_v12 = vmul.bf16 1056980736, %v7716_v25 }
 0x37c   : > { %v2485_v22 = vmul.bf16 1056980736, %v2421_v0  ;;  %v4891_v61 = vpop.eup %4890  ;;  %4896 = vtanh.bf16 %v2299_v58  ;;  %v2423_v48 = vadd.bf16 1065369472, %v4889_v37 }
 0x37d   : > { %v2488_v56 = vmul.bf16 1056980736, %v2424_v10  ;;  %4898 = vtanh.bf16 %v2302_v27  ;;  %v2426_v32 = vadd.bf16 1065369472, %v4891_v61 }
 0x37e   : > { %v2549_v17 = vmul.bf16 %v2485_v22, %v7642_v40  ;;  %v2487_v33 = vmul.bf16 1056980736, %v2423_v48  ;;  %4900 = vtanh.bf16 %v2301_v50  ;;  %v2308_v22 = vmul.bf16 1056980736, %v7734_v30 }
 0x37f   : > { %v2552_v19 = vmul.bf16 %v2488_v56, %v7644_v26  ;;  %v2490_v63 = vmul.bf16 1056980736, %v2426_v32  ;;  %4902 = vtanh.bf16 %v2304_v41  ;;  %v2303_v26 = vmul.bf16 1056980736, %v7710_v44 }
 0x380   : > { %2843 = vmatmul.mubr.bf16.gmra.mxu1 %v2545_v54  ;;  %v2551_v62 = vmul.bf16 %v2487_v33, %v7656_v39  ;;  %v2310_v32 = vmul.bf16 1056980736, %v7743_v55 }
 0x381   : > { %2850 = vmatprep.mubr.bf16.mxu1 %v2548_v28  ;;  %v2554_v40 = vmul.bf16 %v2490_v63, %v7659_v20  ;;  %4904 = vtanh.bf16 %v2303_v26  ;;  %v2305_v20 = vmul.bf16 1056980736, %v7722_v43 }
 0x382   : > { %4906 = vtanh.bf16 %v2306_v12 }
 0x383   : > { %4908 = vtanh.bf16 %v2305_v20 }
 0x384   : > { %4910 = vtanh.bf16 %v2308_v22 }
 0x388   : > { %2851 = vmatmul.mubr.bf16.gmra.mxu1 %v2547_v18  ;;  %v4893_v54 = vpop.eup %4892 }
 0x389   : > { %2858 = vmatprep.mubr.bf16.mxu1 %v2550_v9  ;;  %v4895_v28 = vpop.eup %4894  ;;  %v2425_v35 = vadd.bf16 1065369472, %v4893_v54 }
 0x38a   : > { %v2428_v2 = vadd.bf16 1065369472, %v4895_v28  ;;  %v4897_v51 = vpop.eup %4896 }
 0x38b   : > { %v2489_v11 = vmul.bf16 1056980736, %v2425_v35  ;;  %v4899_v18 = vpop.eup %4898  ;;  %v2427_v9 = vadd.bf16 1065369472, %v4897_v51  ;;  %v2312_v35 = vmul.bf16 1056980736, %v7762_v23 }
 0x38c   : > { %v2492_v59 = vmul.bf16 1056980736, %v2428_v2  ;;  %v2430_v10 = vadd.bf16 1065369472, %v4899_v18  ;;  %v4901_v27 = vpop.eup %4900  ;;  %v2314_v18 = vmul.bf16 1056980736, %v7777_v1 }
 0x38d   : > { %v2553_v0 = vmul.bf16 %v2489_v11, %v7668_v3  ;;  %v2491_v58 = vmul.bf16 1056980736, %v2427_v9  ;;  %v4903_v56 = vpop.eup %4902 }
 0x38e   : > { %v2556_v39 = vmul.bf16 %v2492_v59, %v7678_v52  ;;  %v2494_v37 = vmul.bf16 1056980736, %v2430_v10  ;;  %v2432_v48 = vadd.bf16 1065369472, %v4903_v56  ;;  %v2307_v52 = vmul.bf16 1056980736, %v7736_v46 }
 0x38f   : > { %v2555_v61 = vmul.bf16 %v2491_v58, %v7682_v8  ;;  %v4905_v50 = vpop.eup %4904 }
 0x390   : > { %2859 = vmatmul.mubr.bf16.gmra.mxu1 %v2549_v17  ;;  %v2429_v17 = vadd.bf16 1065369472, %v4901_v27  ;;  %v2558_v3 = vmul.bf16 %v2494_v37, %v7690_v53  ;;  %v2496_v33 = vmul.bf16 1056980736, %v2432_v48  ;;  %v4907_v41 = vpop.eup %4906  ;;  %4912 = vtanh.bf16 %v2307_v52 }
 0x391   : > { %2866 = vmatprep.mubr.bf16.mxu1 %v2552_v19  ;;  %v2431_v63 = vadd.bf16 1065369472, %v4905_v50  ;;  %4914 = vtanh.bf16 %v2310_v32  ;;  %v2434_v28 = vadd.bf16 1065369472, %v4907_v41  ;;  %v2309_v53 = vmul.bf16 1056980736, %v7751_v5 }
 0x392   : > { %v2493_v19 = vmul.bf16 1056980736, %v2429_v17  ;;  %v2560_v8 = vmul.bf16 %v2496_v33, %v7705_v14  ;;  %v2311_v14 = vmul.bf16 1056980736, %v7766_v29  ;;  %v2316_v27 = vmul.bf16 1056980736, %v7792_v45 }
 0x393   : > { %v2498_v2 = vmul.bf16 1056980736, %v2434_v28  ;;  %4916 = vtanh.bf16 %v2309_v53  ;;  %v2320_v28 = vmul.bf16 1056980736, %v7822_v34 }
 0x394   : > { %v2557_v54 = vmul.bf16 %v2493_v19, %v7695_v24  ;;  %4918 = vtanh.bf16 %v2312_v35  ;;  %v2318_v19 = vmul.bf16 1056980736, %v7803_v47 }
 0x395   : > { %v2562_v24 = vmul.bf16 %v2498_v2, %v7716_v25  ;;  %4920 = vtanh.bf16 %v2311_v14  ;;  %v2313_v25 = vmul.bf16 1056980736, %v7781_v16 }
 0x396   : > { %4922 = vtanh.bf16 %v2314_v18 }
 0x397   : > { %4924 = vtanh.bf16 %v2313_v25 }
 0x398   : > { %2867 = vmatmul.mubr.bf16.gmra.mxu1 %v2551_v62  ;;  %v2495_v62 = vmul.bf16 1056980736, %v2431_v63  ;;  %4926 = vtanh.bf16 %v2316_v27  ;;  %v2323_v27 = vmul.bf16 1056980736, %v7852_v38 }
 0x399   : > { %2874 = vmatprep.mubr.bf16.mxu1 %v2554_v40  ;;  %v4909_v40 = vpop.eup %4908 }
 0x39a   : > { %v4911_v26 = vpop.eup %4910  ;;  %v2559_v11 = vmul.bf16 %v2495_v62, %v7710_v44  ;;  %v2433_v12 = vadd.bf16 1065369472, %v4909_v40 }
 0x39b   : > { %v2436_v51 = vadd.bf16 1065369472, %v4911_v26 }
 0x39c   : > { %v2497_v59 = vmul.bf16 1056980736, %v2433_v12  ;;  %v2322_v12 = vmul.bf16 1056980736, %v7837_v13 }
 0x39d   : > { %v2500_v9 = vmul.bf16 1056980736, %v2436_v51 }
 0x39e   : > { %v2561_v10 = vmul.bf16 %v2497_v59, %v7722_v43 }
 0x39f   : > { %v2564_v44 = vmul.bf16 %v2500_v9, %v7734_v30  ;;  %v2315_v30 = vmul.bf16 1056980736, %v7796_v4 }
 0x3a0   : > { %2875 = vmatmul.mubr.bf16.gmra.mxu1 %v2553_v0  ;;  %v4913_v0 = vpop.eup %4912 }
 0x3a1   : > { %2882 = vmatprep.mubr.bf16.mxu1 %v2556_v39  ;;  %v4915_v39 = vpop.eup %4914  ;;  %v2435_v20 = vadd.bf16 1065369472, %v4913_v0  ;;  %4928 = vtanh.bf16 %v2315_v30 }
 0x3a2   : > { %v2438_v58 = vadd.bf16 1065369472, %v4915_v39  ;;  %v4917_v37 = vpop.eup %4916  ;;  %4930 = vtanh.bf16 %v2318_v19  ;;  %v2324_v39 = vmul.bf16 1056980736, %v7847_v21 }
 0x3a3   : > { %v2499_v22 = vmul.bf16 1056980736, %v2435_v20 }
 0x3a4   : > { %v2502_v56 = vmul.bf16 1056980736, %v2438_v58 }
 0x3a5   : > { %v2563_v17 = vmul.bf16 %v2499_v22, %v7736_v46 }
 0x3a6   : > { %v2566_v43 = vmul.bf16 %v2502_v56, %v7743_v55  ;;  %v2317_v55 = vmul.bf16 1056980736, %v7806_v6 }
 0x3a8   : > { %2883 = vmatmul.mubr.bf16.gmra.mxu1 %v2555_v61  ;;  %v4919_v61 = vpop.eup %4918  ;;  %4932 = vtanh.bf16 %v2317_v55 }
 0x3a9   : > { %2890 = vmatprep.mubr.bf16.mxu1 %v2558_v3  ;;  %v2437_v3 = vadd.bf16 1065369472, %v4917_v37  ;;  %v2440_v48 = vadd.bf16 1065369472, %v4919_v61  ;;  %v4921_v32 = vpop.eup %4920  ;;  %4934 = vtanh.bf16 %v2320_v28  ;;  %v2326_v61 = vmul.bf16 1056980736, %v7864_v60 }
 0x3aa   : > { %v4923_v33 = vpop.eup %4922 }
 0x3ab   : > { %v2501_v52 = vmul.bf16 1056980736, %v2437_v3  ;;  %v2504_v50 = vmul.bf16 1056980736, %v2440_v48  ;;  %v2442_v63 = vadd.bf16 1065369472, %v4923_v33  ;;  %v4925_v53 = vpop.eup %4924 }
 0x3ac   : > { %v4927_v35 = vpop.eup %4926  ;;  %v2441_v2 = vadd.bf16 1065369472, %v4925_v53 }
 0x3ad   : > { %v2565_v41 = vmul.bf16 %v2501_v52, %v7751_v5  ;;  %v2568_v46 = vmul.bf16 %v2504_v50, %v7762_v23  ;;  %v2506_v62 = vmul.bf16 1056980736, %v2442_v63  ;;  %v2444_v26 = vadd.bf16 1065369472, %v4927_v35 }
 0x3ae   : > { %v2319_v23 = vmul.bf16 1056980736, %v7833_v15  ;;  %v2325_v50 = vmul.bf16 1056980736, %v7868_v36 }
 0x3af   : > { %v2570_v5 = vmul.bf16 %v2506_v62, %v7777_v1  ;;  %v2508_v51 = vmul.bf16 1056980736, %v2444_v26  ;;  %v2321_v1 = vmul.bf16 1056980736, %v7835_v31  ;;  %v2330_v26 = vmul.bf16 1056980736, %v7888_v7 }
 0x3b0   : > { %2891 = vmatmul.mubr.bf16.gmra.mxu1 %v2557_v54  ;;  %v2439_v54 = vadd.bf16 1065369472, %v4921_v32  ;;  %4936 = vtanh.bf16 %v2319_v23 }
 0x3b1   : > { %2898 = vmatprep.mubr.bf16.mxu1 %v2560_v8  ;;  %4938 = vtanh.bf16 %v2322_v12 }
 0x3b2   : > { %v2503_v8 = vmul.bf16 1056980736, %v2439_v54  ;;  %4940 = vtanh.bf16 %v2321_v1  ;;  %v2328_v54 = vmul.bf16 1056980736, %v7878_v49 }
 0x3b3   : > { %4942 = vtanh.bf16 %v2324_v39 }
 0x3b4   : > { %v2567_v40 = vmul.bf16 %v2503_v8, %v7766_v29  ;;  %v2572_v29 = vmul.bf16 %v2508_v51, %v7792_v45  ;;  %4944 = vtanh.bf16 %v2323_v27 }
 0x3b5   : > { %4946 = vtanh.bf16 %v2326_v61 }
 0x3b6   : > { %4948 = vtanh.bf16 %v2325_v50 }
 0x3b7   : > { %4950 = vtanh.bf16 %v2328_v54 }
 0x3b8   : > { %2899 = vmatmul.mubr.bf16.gmra.mxu1 %v2559_v11  ;;  %v2505_v11 = vmul.bf16 1056980736, %v2441_v2 }
 0x3b9   : > { %2906 = vmatprep.mubr.bf16.mxu1 %v2562_v24  ;;  %v4929_v24 = vpop.eup %4928 }
 0x3ba   : > { %v4931_v14 = vpop.eup %4930  ;;  %v2569_v59 = vmul.bf16 %v2505_v11, %v7781_v16  ;;  %v2443_v18 = vadd.bf16 1065369472, %v4929_v24 }
 0x3bb   : > { %v2446_v0 = vadd.bf16 1065369472, %v4931_v14 }
 0x3bc   : > { %v2507_v9 = vmul.bf16 1056980736, %v2443_v18 }
 0x3bd   : > { %v2510_v20 = vmul.bf16 1056980736, %v2446_v0 }
 0x3be   : > { %v2571_v58 = vmul.bf16 %v2507_v9, %v7796_v4 }
 0x3bf   : > { %v2574_v16 = vmul.bf16 %v2510_v20, %v7803_v47 }
 0x3c0   : > { %2907 = vmatmul.mubr.bf16.gmra.mxu1 %v2561_v10  ;;  %v4933_v10 = vpop.eup %4932 }
 0x3c1   : > { %2914 = vmatprep.mubr.bf16.mxu1 %v2564_v44  ;;  %v4935_v44 = vpop.eup %4934  ;;  %v2445_v25 = vadd.bf16 1065369472, %v4933_v10 }
 0x3c2   : > { %v2448_v22 = vadd.bf16 1065369472, %v4935_v44 }
 0x3c3   : > { %v2509_v56 = vmul.bf16 1056980736, %v2445_v25 }
 0x3c4   : > { %v2512_v3 = vmul.bf16 1056980736, %v2448_v22 }
 0x3c5   : > { %v2573_v47 = vmul.bf16 %v2509_v56, %v7806_v6 }
 0x3c6   : > { %v2576_v52 = vmul.bf16 %v2512_v3, %v7822_v34 }
 0x3c8   : > { %2915 = vmatmul.mubr.bf16.gmra.mxu1 %v2563_v17  ;;  %v4937_v17 = vpop.eup %4936 }
 0x3c9   : > { %2922 = vmatprep.mubr.bf16.mxu1 %v2566_v43  ;;  %v4939_v43 = vpop.eup %4938  ;;  %v2447_v30 = vadd.bf16 1065369472, %v4937_v17 }
 0x3ca   : > { %v2450_v19 = vadd.bf16 1065369472, %v4939_v43 }
 0x3cc   : > { %v2514_v63 = vmul.bf16 1056980736, %v2450_v19 }
 0x3ce   : > { %v2578_v53 = vmul.bf16 %v2514_v63, %v7837_v13 }
 0x3d0   : > { %2923 = vmatmul.mubr.bf16.gmra.mxu1 %v2565_v41  ;;  %v2511_v41 = vmul.bf16 1056980736, %v2447_v30 }
 0x3d1   : > { %2930 = vmatprep.mubr.bf16.mxu1 %v2568_v46  ;;  %v4941_v46 = vpop.eup %4940 }
 0x3d2   : > { %v4943_v55 = vpop.eup %4942  ;;  %v2575_v34 = vmul.bf16 %v2511_v41, %v7833_v15  ;;  %v2449_v28 = vadd.bf16 1065369472, %v4941_v46 }
 0x3d3   : > { %v2452_v62 = vadd.bf16 1065369472, %v4943_v55  ;;  %v4945_v23 = vpop.eup %4944 }
 0x3d4   : > { %v4947_v12 = vpop.eup %4946  ;;  %v2451_v51 = vadd.bf16 1065369472, %v4945_v23 }
 0x3d5   : > { %v2516_v11 = vmul.bf16 1056980736, %v2452_v62  ;;  %v4949_v9 = vpop.eup %4948 }
 0x3d6   : > { %v2515_v1 = vmul.bf16 1056980736, %v2451_v51  ;;  %v4951_v10 = vpop.eup %4950 }
 0x3d7   : > { %v2580_v14 = vmul.bf16 %v2516_v11, %v7847_v21  ;;  %v2456_v25 = vadd.bf16 1065369472, %v4951_v10 }
 0x3d8   : > { %2931 = vmatmul.mubr.bf16.gmra.mxu1 %v2567_v40  ;;  %v2327_v40 = vmul.bf16 1056980736, %v7875_v57  ;;  %v2579_v44 = vmul.bf16 %v2515_v1, %v7852_v38 }
 0x3d9   : > { %2938 = vmatprep.mubr.bf16.mxu1 %v2570_v5  ;;  %v2513_v5 = vmul.bf16 1056980736, %v2449_v28  ;;  %v2520_v56 = vmul.bf16 1056980736, %v2456_v25 }
 0x3da   : > { %4952 = vtanh.bf16 %v2327_v40 }
 0x3db   : > { %v2577_v13 = vmul.bf16 %v2513_v5, %v7835_v31  ;;  %4954 = vtanh.bf16 %v2330_v26  ;;  %v2584_v38 = vmul.bf16 %v2520_v56, %v7878_v49 }
 0x3e0   : > { %2939 = vmatmul.mubr.bf16.gmra.mxu1 %v2569_v59  ;;  %v2454_v59 = vadd.bf16 1065369472, %v4947_v12 }
 0x3e1   : > { %2946 = vmatprep.mubr.bf16.mxu1 %v2572_v29  ;;  %v2329_v29 = vmul.bf16 1056980736, %v7886_v42 }
 0x3e2   : > { %v2518_v39 = vmul.bf16 1056980736, %v2454_v59 }
 0x3e3   : > { %4956 = vtanh.bf16 %v2329_v29 }
 0x3e4   : > { %v2582_v21 = vmul.bf16 %v2518_v39, %v7864_v60 }
 0x3e8   : > { %v7944_v45 = vpop.f32.mrf.mxu1  ;;  %2947 = vmatmul.mubr.bf16.gmra.mxu1 %v2571_v58  ;;  %v2453_v58 = vadd.bf16 1065369472, %v4949_v9 }
 0x3e9   : > { %2954 = vmatprep.mubr.bf16.mxu1 %v2574_v16 }
 0x3ea   : > { %v2758_v37 = vpop.f32.mrf.mxu1  ;;  %v2517_v27 = vmul.bf16 1056980736, %v2453_v58 }
 0x3eb   : > { %v4953_v37 = vpop.eup %4952 }
 0x3ec   : > { %v7948_v48 = vpop.f32.mrf.mxu1  ;;  %v4955_v61 = vpop.eup %4954  ;;  %v2581_v43 = vmul.bf16 %v2517_v27, %v7868_v36 }
 0x3ee   : > { %v2761_v4 = vpop.f32.mrf.mxu1 }
 0x3ef   : > { %v2455_v4 = vadd.bf16 1065369472, %v4953_v37 }
 0x3f0   : > { %v7952_v32 = vpop.f32.mrf.mxu1  ;;  %2955 = vmatmul.mubr.bf16.gmra.mxu1 %v2573_v47  ;;  %v2458_v47 = vadd.bf16 1065369472, %v4955_v61 }
 0x3f1   : > { %2962 = vmatprep.mubr.bf16.mxu1 %v2576_v52  ;;  %v2519_v52 = vmul.bf16 1056980736, %v2455_v4  ;;  %v4957_v19 = vpop.eup %4956 }
 0x3f2   : > { %v2766_v33 = vpop.f32.mrf.mxu1  ;;  %v2522_v50 = vmul.bf16 1056980736, %v2458_v47  ;;  %v2457_v46 = vadd.bf16 1065369472, %v4957_v19 }
 0x3f3   : > { %v2583_v54 = vmul.bf16 %v2519_v52, %v7875_v57 }
 0x3f4   : > { %v7956_v8 = vpop.f32.mrf.mxu1  ;;  %v2586_v36 = vmul.bf16 %v2522_v50, %v7888_v7  ;;  %v2521_v55 = vmul.bf16 1056980736, %v2457_v46 }
 0x3f6   : > { %v2769_v6 = vpop.f32.mrf.mxu1  ;;  %v2585_v28 = vmul.bf16 %v2521_v55, %v7886_v42 }
 0x3f8   : > { %v7960_v35 = vpop.f32.mrf.mxu1  ;;  %2963 = vmatmul.mubr.bf16.gmra.mxu1 %v2575_v34 }
 0x3f9   : > { %2970 = vmatprep.mubr.bf16.mxu1 %v2578_v53 }
 0x3fa   : > { %v2774_v2 = vpop.f32.mrf.mxu1 }
 0x3fc   : > { %v7964_v24 = vpop.f32.mrf.mxu1 }
 0x3fe   : > { %v2777_v15 = vpop.f32.mrf.mxu1 }
 0x400   : > { %v7968_v18 = vpop.f32.mrf.mxu1  ;;  %2971 = vmatmul.mubr.bf16.gmra.mxu1 %v2577_v13 }
 0x401   : > { %2978 = vmatprep.mubr.bf16.mxu1 %v2580_v14 }
 0x402   : > { %v2782_v0 = vpop.f32.mrf.mxu1 }
 0x404   : > { %v7971_v20 = vpop.f32.mrf.mxu1 }
 0x406   : > { %v2785_v31 = vpop.f32.mrf.mxu1 }
 0x408   : > { %v7975_v16 = vpop.f32.mrf.mxu1  ;;  %2979 = vmatmul.mubr.bf16.gmra.mxu1 %v2579_v44 }
 0x409   : > { %2986 = vmatprep.mubr.bf16.mxu1 %v2582_v21 }
 0x40a   : > { %v2790_v22 = vpop.f32.mrf.mxu1 }
 0x40c   : > { %v7977_v17 = vpop.f32.mrf.mxu1 }
 0x40e   : > { %v2793_v3 = vpop.f32.mrf.mxu1 }
 0x40f   : > { %v8029_v3 = vld [vmem:[%s9416_s6] ss:$0 sm:$0xff] }
 0x410   : > { %v7981_v60 = vpop.f32.mrf.mxu1  ;;  %2987 = vmatmul.mubr.bf16.gmra.mxu1 %v2581_v43  ;;  %v8033_v4 = vadd.f32 %v8029_v3, %v7948_v48  ;;  %v8049_v50 = vadd.f32 %v8029_v3, %v7956_v8 }
 0x411   : > { %2994 = vmatprep.mubr.bf16.mxu1 %v2584_v38  ;;  %v8037_v38 = vadd.f32 %v8029_v3, %v7944_v45 }
 0x412   : > { %v2798_v30 = vpop.f32.mrf.mxu1  ;;  %v3157_v19 = vmul.f32 %v8033_v4, %v8033_v4  ;;  %v3159_v55 = vmul.f32 %v8049_v50, %v8049_v50 }
 0x413   : > { %v8043_v30 = vadd.f32 %v8029_v3, %v7952_v32  ;;  %v3156_v48 = vmul.f32 %v8037_v38, %v8037_v38  ;;  %v3022_v46 = vsel %vm3021_vm2, %v8037_v38, 0.0 }
 0x414   : > { %v7983_v33 = vpop.f32.mrf.mxu1 }
 0x415   : > { %v3158_v32 = vmul.f32 %v8043_v30, %v8043_v30 }
 0x416   : > { %v2801_v41 = vpop.f32.mrf.mxu1 }
 0x417   : > { %v3023_v41 = vsel %vm3021_vm2, %v8033_v4, 0.0 }
 0x418   : > { %v7987_v63 = vpop.f32.mrf.mxu1  ;;  %2995 = vmatmul.mubr.bf16.gmra.mxu1 %v2583_v54  ;;  %v8061_v54 = vadd.f32 %v8029_v3, %v7960_v35  ;;  %v3024_v35 = vadd.f32 %v3023_v41, %v3022_v46  ;;  %v8113_v46 = vadd.f32 %v8029_v3, %v7977_v17 }
 0x419   : > { %3002 = vmatprep.mubr.bf16.mxu1 %v2586_v36  ;;  %v3221_v36 = vsel %vm3021_vm2, %v3157_v19, 0.0 }
 0x41a   : > { %v2806_v49 = vpop.f32.mrf.mxu1  ;;  %10131 = vst [vmem:[#allocation22_spill] sm:$0xff] %v8113_v46 }
 0x41b   : > { %v3025_v49 = vsel %vm3021_vm2, %v8043_v30, 0.0 }
 0x41c   : > { %v7989_v6 = vpop.f32.mrf.mxu1 }
 0x41e   : > { %v2809_v34 = vpop.f32.mrf.mxu1 }
 0x41f   : > { %v8072_v34 = vadd.f32 %v8029_v3, %v7964_v24  ;;  %v3026_v24 = vadd.f32 %v3025_v49, %v3024_v35  ;;  %v8124_v35 = vadd.f32 %v8029_v3, %v7981_v60  ;;  %v8140_v60 = vld [vmem:[%s9422_s12 + $0x38] sm:$0xff] }
 0x420   : > { %v7992_v53 = vpop.f32.mrf.mxu1  ;;  %3003 = vmatmul.mubr.bf16.gmra.mxu1 %v2585_v28  ;;  %v3220_v28 = vsel %vm3021_vm2, %v3156_v48, 0.0 }
 0x421   : > { %10132 = vst [vmem:[#allocation18_spill] sm:$0xff] %v8124_v35 }
 0x422   : > { %v2814_v62 = vpop.f32.mrf.mxu1 }
 0x424   : > { %v7994_v40 = vpop.f32.mrf.mxu1 }
 0x426   : > { %v2817_v57 = vpop.f32.mrf.mxu1 }
 0x427   : > { %v3223_v57 = vsel %vm3021_vm2, %v3158_v32, 0.0 }
 0x428   : > { %v7996_v2 = vpop.f32.mrf.mxu1 }
 0x42a   : > { %v2822_v7 = vpop.f32.mrf.mxu1 }
 0x42b   : > { %v3027_v7 = vsel %vm3021_vm2, %v8049_v50, 0.0 }
 0x42c   : > { %v7998_v5 = vpop.f32.mrf.mxu1 }
 0x42e   : > { %v2825_v26 = vpop.f32.mrf.mxu1 }
 0x42f   : > { %v3160_v26 = vmul.f32 %v8061_v54, %v8061_v54 }
 0x430   : > { %v8000_v23 = vpop.f32.mrf.mxu1 }
 0x432   : > { %v2830_v11 = vpop.f32.mrf.mxu1 }
 0x433   : > { %v8084_v11 = vadd.f32 %v8029_v3, %v7968_v18  ;;  %v3227_v18 = vsel %vm3021_vm2, %v3160_v26, 0.0 }
 0x434   : > { %v8002_v12 = vpop.f32.mrf.mxu1 }
 0x435   : > { %v3033_v41 = vsel %vm3021_vm2, %v8084_v11, 0.0 }
 0x436   : > { %v2833_v15 = vpop.f32.mrf.mxu1 }
 0x437   : > { %v3222_v15 = vadd.f32 %v3221_v36, %v3220_v28 }
 0x438   : > { %v8004_v42 = vpop.f32.mrf.mxu1 }
 0x43a   : > { %v2838_v13 = vpop.f32.mrf.mxu1 }
 0x43c   : > { %v8006_v51 = vpop.f32.mrf.mxu1 }
 0x43e   : > { %v2841_v14 = vpop.f32.mrf.mxu1 }
 0x43f   : > { %v3225_v14 = vsel %vm3021_vm2, %v3159_v55, 0.0 }
 0x440   : > { %v8008_v59 = vpop.f32.mrf.mxu1 }
 0x442   : > { %v2846_v29 = vpop.f32.mrf.mxu1 }
 0x443   : > { %v3029_v29 = vsel %vm3021_vm2, %v8061_v54, 0.0 }
 0x444   : > { %v8010_v0 = vpop.f32.mrf.mxu1 }
 0x446   : > { %v2849_v1 = vpop.f32.mrf.mxu1 }
 0x447   : > { %v3161_v1 = vmul.f32 %v8072_v34, %v8072_v34 }
 0x448   : > { %v8012_v9 = vpop.f32.mrf.mxu1 }
 0x449   : > { %v3229_v48 = vsel %vm3021_vm2, %v3161_v1, 0.0 }
 0x44a   : > { %v2854_v39 = vpop.f32.mrf.mxu1 }
 0x44b   : > { %v8093_v39 = vadd.f32 %v8029_v3, %v7971_v20 }
 0x44c   : > { %v8014_v10 = vpop.f32.mrf.mxu1 }
 0x44d   : > { %v3163_v32 = vmul.f32 %v8093_v39, %v8093_v39  ;;  %v3035_v55 = vsel %vm3021_vm2, %v8093_v39, 0.0 }
 0x44e   : > { %v2857_v31 = vpop.f32.mrf.mxu1 }
 0x44f   : > { %v3224_v31 = vadd.f32 %v3223_v57, %v3222_v15  ;;  %v3233_v26 = vsel %vm3021_vm2, %v3163_v32, 0.0  ;;  %v8167_v32 = vadd.f32 %v8029_v3, %v7989_v6 }
 0x450   : > { %v8016_v44 = vpop.f32.mrf.mxu1 }
 0x451   : > { %10135 = vst [vmem:[#allocation29_spill] sm:$0xff] %v8167_v32 }
 0x452   : > { %v2862_v58 = vpop.f32.mrf.mxu1 }
 0x453   : > { %v3028_v58 = vadd.f32 %v3027_v7, %v3026_v24  ;;  %v3165_v24 = vmul.f32 %v8113_v46, %v8113_v46 }
 0x454   : > { %v8018_v21 = vpop.f32.mrf.mxu1 }
 0x455   : > { %v3030_v19 = vadd.f32 %v3029_v29, %v3028_v58  ;;  %v3039_v58 = vsel %vm3021_vm2, %v8113_v46, 0.0 }
 0x456   : > { %v2865_v25 = vpop.f32.mrf.mxu1 }
 0x458   : > { %v8020_v22 = vpop.f32.mrf.mxu1 }
 0x45a   : > { %v2870_v27 = vpop.f32.mrf.mxu1 }
 0x45b   : > { %v3031_v27 = vsel %vm3021_vm2, %v8072_v34, 0.0 }
 0x45c   : > { %v8022_v37 = vpop.f32.mrf.mxu1  ;;  %v3032_v36 = vadd.f32 %v3031_v27, %v3030_v19  ;;  %v9589_v27 = vmov 0.0  }
 0x45d   : > { %4640 = vmatprep.subr.mxu0 %v9589_v27  ;;  %4656 = vmatprep.mubr.msk.f32.mxu0 %vm5034_vm3, %v9589_v27 }
 0x45e   : > { %v2873_v56 = vpop.f32.mrf.mxu1  ;;  %v3034_v7 = vadd.f32 %v3033_v41, %v3032_v36  ;;  %4641 = vmatpush3.msra.mxu0 %v8140_v60 }
 0x45f   : > { %v3162_v56 = vmul.f32 %v8084_v11, %v8084_v11  ;;  %4642 = vmatprep.subr.mxu0 %v9589_v27 }
 0x460   : > { %v8024_v61 = vpop.f32.mrf.mxu1  ;;  %v3036_v29 = vadd.f32 %v3035_v55, %v3034_v7  ;;  %v8185_v7 = vadd.f32 %v8029_v3, %v7992_v53  ;;  %v3169_v53 = vmul.f32 %v8167_v32, %v8167_v32 }
 0x462   : > { %v2878_v43 = vpop.f32.mrf.mxu1  ;;  %10136 = vst [vmem:[#allocation31_spill] sm:$0xff] %v8185_v7 }
 0x463   : > { %v8104_v43 = vadd.f32 %v8029_v3, %v7975_v16  ;;  %v3231_v16 = vsel %vm3021_vm2, %v3162_v56, 0.0  ;;  %v8155_v56 = vld [vmem:[%s9422_s12 + $0x30] sm:$0xff] }
 0x464   : > { %v8039_v47 = vpop.f32.mrf.mxu1  ;;  %4643 = vmatpush3.msra.mxu0 %v8155_v56 }
 0x465   : > { %v3164_v28 = vmul.f32 %v8104_v43, %v8104_v43  ;;  %v3037_v15 = vsel %vm3021_vm2, %v8104_v43, 0.0  ;;  %4644 = vmatprep.subr.mxu0 %v9589_v27 }
 0x466   : > { %v2881_v52 = vpop.f32.mrf.mxu1  ;;  %v3038_v19 = vadd.f32 %v3037_v15, %v3036_v29 }
 0x467   : > { %v3226_v52 = vadd.f32 %v3225_v14, %v3224_v31  ;;  %v3235_v31 = vsel %vm3021_vm2, %v3164_v28, 0.0 }
 0x468   : > { %v8053_v45 = vpop.f32.mrf.mxu1 }
 0x46a   : > { %v2886_v8 = vpop.f32.mrf.mxu1 }
 0x46b   : > { %v3228_v8 = vadd.f32 %v3227_v18, %v3226_v52  ;;  %v3166_v18 = vmul.f32 %v8124_v35, %v8124_v35 }
 0x46c   : > { %v8075_v62 = vpop.f32.mrf.mxu1 }
 0x46d   : > { %v3230_v57 = vadd.f32 %v3229_v48, %v3228_v8  ;;  %v3041_v48 = vsel %vm3021_vm2, %v8124_v35, 0.0  ;;  %v8173_v8 = vld [vmem:[%s9422_s12 + $0x28] sm:$0xff]  ;;  %v3239_v28 = vsel %vm3021_vm2, %v3166_v18, 0.0 }
 0x46e   : > { %v2889_v13 = vpop.f32.mrf.mxu1  ;;  %4645 = vmatpush3.msra.mxu0 %v8173_v8 }
 0x46f   : > { %v8133_v13 = vadd.f32 %v8029_v3, %v7983_v33  ;;  %v3232_v14 = vadd.f32 %v3231_v16, %v3230_v57  ;;  %v8149_v33 = vadd.f32 %v8029_v3, %v7987_v63  ;;  %v3237_v63 = vsel %vm3021_vm2, %v3165_v24, 0.0  ;;  %4646 = vmatprep.subr.mxu0 %v9589_v27 }
 0x470   : > { %v8095_v25 = vpop.f32.mrf.mxu1  ;;  %v3040_v16 = vadd.f32 %v3039_v58, %v3038_v19  ;;  %v8207_v58 = vld [vmem:[%s9422_s12 + $0x18] sm:$0xff] }
 0x471   : > { %10133 = vst [vmem:[#allocation23_spill] sm:$0xff] %v8133_v13  ;;  %10134 = vst [vmem:[#allocation26_spill] sm:$0xff] %v8149_v33  ;;  %v3234_v52 = vadd.f32 %v3233_v26, %v3232_v14  ;;  %v3167_v41 = vmul.f32 %v8133_v13, %v8133_v13  ;;  %v3043_v57 = vsel %vm3021_vm2, %v8133_v13, 0.0  ;;  %v3168_v6 = vmul.f32 %v8149_v33, %v8149_v33 }
 0x472   : > { %v2894_v20 = vpop.f32.mrf.mxu1  ;;  %v3042_v15 = vadd.f32 %v3041_v48, %v3040_v16  ;;  %v3045_v29 = vsel %vm3021_vm2, %v8149_v33, 0.0  ;;  %v8219_v48 = vadd.f32 %v8029_v3, %v7996_v2 }
 0x473   : > { %v3236_v36 = vadd.f32 %v3235_v31, %v3234_v52  ;;  %v3241_v14 = vsel %vm3021_vm2, %v3167_v41, 0.0  ;;  %v8201_v31 = vadd.f32 %v8029_v3, %v7994_v40  ;;  %v3170_v40 = vmul.f32 %v8185_v7, %v8185_v7  ;;  %v8225_v41 = vld [vmem:[%s9422_s12 + $0x10] sm:$0xff] }
 0x474   : > { %v8115_v49 = vpop.f32.mrf.mxu1  ;;  %v3044_v52 = vadd.f32 %v3043_v57, %v3042_v15  ;;  %10138 = vst [vmem:[#allocation56_spill] sm:$0xff] %v8219_v48  ;;  %v3245_v57 = vsel %vm3021_vm2, %v3169_v53, 0.0  ;;  %v8241_v15 = vld [vmem:[%s9422_s12 + $0x8] sm:$0xff] }
 0x475   : > { %v3238_v26 = vadd.f32 %v3237_v63, %v3236_v36  ;;  %10137 = vst [vmem:[#allocation54_spill] sm:$0xff] %v8201_v31  ;;  %v3047_v63 = vsel %vm3021_vm2, %v8167_v32, 0.0  ;;  %v3171_v2 = vmul.f32 %v8201_v31, %v8201_v31  ;;  %v3247_v53 = vsel %vm3021_vm2, %v3170_v40, 0.0 }
 0x476   : > { %v2897_v17 = vpop.f32.mrf.mxu1  ;;  %v3046_v16 = vadd.f32 %v3045_v29, %v3044_v52  ;;  %v8253_v52 = vadd.f32 %v8029_v3, %v8000_v23  ;;  %v8303_v32 = vadd.f32 %v8029_v3, %v8006_v51  ;;  %v8316_v51 = vadd.f32 %v8029_v3, %v8008_v59 }
 0x477   : > { %v8191_v17 = vld [vmem:[%s9422_s12 + $0x20] sm:$0xff]  ;;  %v3240_v18 = vadd.f32 %v3239_v28, %v3238_v26  ;;  %v8235_v26 = vadd.f32 %v8029_v3, %v7998_v5  ;;  %v3172_v5 = vmul.f32 %v8219_v48, %v8219_v48 }
 0x478   : > { %v8135_v1 = vpop.f32.mrf.mxu1  ;;  %4647 = vmatpush3.msra.mxu0 %v8191_v17  ;;  %10140 = vst [vmem:[#allocation59_spill] sm:$0xff] %v8253_v52  ;;  %10144 = vst [vmem:[#allocation4_spill] sm:$0xff] %v8303_v32 }
 0x479   : > { %4648 = vmatprep.subr.mxu0 %v9589_v27  ;;  %v3242_v36 = vadd.f32 %v3241_v14, %v3240_v18  ;;  %10139 = vst [vmem:[#allocation57_spill] sm:$0xff] %v8235_v26  ;;  %v3048_v14 = vadd.f32 %v3047_v63, %v3046_v16  ;;  %v3051_v18 = vsel %vm3021_vm2, %v8201_v31, 0.0  ;;  %v3249_v16 = vsel %vm3021_vm2, %v3171_v2, 0.0  ;;  %v8278_v2 = vld [vmem:[%s9419_s9 + $0x18] sm:$0xff]   ;;  %10145 = vst [vmem:[#allocation6_spill] sm:$0xff] %v8316_v51 }
 0x47a   : > { %v2902_v20 = vpop.f32.mrf.mxu1  ;;  %4649 = vmatpush3.msra.mxu0 %v8207_v58  ;;  %v3173_v23 = vmul.f32 %v8235_v26, %v8235_v26  ;;  %v10142_v31 = vmov 0.0   ;;  %4750 = vmatprep.subr.bf16.mxu1 %v8278_v2 }
 0x47b   : > { %v3243_v20 = vsel %vm3021_vm2, %v3168_v6, 0.0  ;;  %v3049_v6 = vsel %vm3021_vm2, %v8185_v7, 0.0  ;;  %4650 = vmatprep.subr.mxu0 %v9589_v27  ;;  %4754 = vmatpush3.bf16.msra.mxu1 %v8278_v2 }
 0x47c   : > { %v8175_v55 = vpop.f32.mrf.mxu1  ;;  %4651 = vmatpush3.msra.mxu0 %v8225_v41 }
 0x47d   : > { %4652 = vmatprep.subr.mxu0 %v9589_v27  ;;  %v8269_v27 = vadd.f32 %v8029_v3, %v8002_v12  ;;  %v3251_v12 = vsel %vm3021_vm2, %v3172_v5, 0.0  ;;  %v3057_v5 = vsel %vm3021_vm2, %v8253_v52, 0.0 }
 0x47e   : > { %v2905_v24 = vpop.f32.mrf.mxu1  ;;  %4653 = vmatpush3.msra.mxu0 %v8241_v15 }
 0x47f   : > { %v3244_v24 = vadd.f32 %v3243_v20, %v3242_v36  ;;  %v8259_v20 = vld [vmem:[%s9422_s12] sm:$0xff]  ;;  %v3050_v36 = vadd.f32 %v3049_v6, %v3048_v14  ;;  %10141 = vst [vmem:[#allocation61_spill] sm:$0xff] %v8269_v27  ;;  %4654 = vmatprep.subr.mxu0 %v10142_v31  ;;  %v3055_v14 = vsel %vm3021_vm2, %v8235_v26, 0.0  ;;  %v3175_v26 = vmul.f32 %v8269_v27, %v8269_v27 }
 0x480   : > { %v8209_v19 = vpop.f32.mrf.mxu1  ;;  %4655 = vmatpush3.msra.mxu0 %v8259_v20 }
 0x481   : > { %v3246_v63 = vadd.f32 %v3245_v57, %v3244_v24  ;;  %v3052_v57 = vadd.f32 %v3051_v18, %v3050_v36  ;;  %v8283_v24 = vld [vmem:[%s9419_s9 + $0x10] sm:$0xff]   ;;  %v8292_v18 = vadd.f32 %v8029_v3, %v8004_v42  ;;  %4659 = vmatprep.subr.mxu0 %v10142_v31 }
 0x482   : > { %v2910_v28 = vpop.f32.mrf.mxu1  ;;  %4751 = vmatprep.subr.bf16.mxu1 %v8283_v24 }
 0x483   : > { %v3053_v28 = vsel %vm3021_vm2, %v8219_v48, 0.0  ;;  %v3248_v7 = vadd.f32 %v3247_v53, %v3246_v63  ;;  %v3174_v53 = vmul.f32 %v8253_v52, %v8253_v52  ;;  %10143 = vst [vmem:[#allocation2_spill] sm:$0xff] %v8292_v18  ;;  %v3253_v48 = vsel %vm3021_vm2, %v3173_v23, 0.0  ;;  %4755 = vmatpush3.bf16.msra.mxu1 %v8283_v24 }
 0x484   : > { %v8243_v29 = vpop.f32.mrf.mxu1  ;;  %v3054_v36 = vadd.f32 %v3053_v28, %v3052_v57  ;;  %v3059_v23 = vsel %vm3021_vm2, %v8269_v27, 0.0  ;;  %v3176_v57 = vmul.f32 %v8292_v18, %v8292_v18 }
 0x485   : > { %v3250_v63 = vadd.f32 %v3249_v16, %v3248_v7  ;;  %v3255_v28 = vsel %vm3021_vm2, %v3174_v53, 0.0  ;;  %v3177_v53 = vmul.f32 %v8303_v32, %v8303_v32 }
 0x486   : > { %v2913_v40 = vpop.f32.mrf.mxu1  ;;  %v3056_v7 = vadd.f32 %v3055_v14, %v3054_v36  ;;  %v3257_v14 = vsel %vm3021_vm2, %v3175_v26, 0.0  ;;  %v8325_v36 = vadd.f32 %v8029_v3, %v8010_v0  ;;  %v3063_v26 = vsel %vm3021_vm2, %v8303_v32, 0.0 }
 0x487   : > { %v3252_v42 = vadd.f32 %v3251_v12, %v3250_v63  ;;  %v3061_v63 = vsel %vm3021_vm2, %v8292_v18, 0.0 }
 0x488   : > { %v8272_v6 = vpop.f32.mrf.mxu1  ;;  %v3058_v52 = vadd.f32 %v3057_v5, %v3056_v7  ;;  %10146 = vst [vmem:[#allocation8_spill] sm:$0xff] %v8325_v36  ;;  %v3178_v5 = vmul.f32 %v8316_v51, %v8316_v51 }
 0x48a   : > { %v2918_v40 = vpop.f32.mrf.mxu1  ;;  %v3060_v59 = vadd.f32 %v3059_v23, %v3058_v52  ;;  %v3065_v52 = vsel %vm3021_vm2, %v8316_v51, 0.0  ;;  %v3179_v23 = vmul.f32 %v8325_v36, %v8325_v36 }
 0x48b   : > { %v3254_v40 = vadd.f32 %v3253_v48, %v3252_v42  ;;  %v3259_v48 = vsel %vm3021_vm2, %v3176_v57, 0.0  ;;  %v8337_v42 = vadd.f32 %v8029_v3, %v8012_v9  ;;  %v8346_v57 = vadd.f32 %v8029_v3, %v8014_v10 }
 0x48c   : > { %v8306_v16 = vpop.f32.mrf.mxu1  ;;  %v3062_v7 = vadd.f32 %v3061_v63, %v3060_v59  ;;  %v3263_v9 = vsel %vm3021_vm2, %v3178_v5, 0.0  ;;  %v8357_v63 = vadd.f32 %v8029_v3, %v8016_v44 }
 0x48d   : > { %v3256_v27 = vadd.f32 %v3255_v28, %v3254_v40  ;;  %10147 = vst [vmem:[#allocation10_spill] sm:$0xff] %v8337_v42  ;;  %v3261_v28 = vsel %vm3021_vm2, %v3177_v53, 0.0  ;;  %10148 = vst [vmem:[#allocation12_spill] sm:$0xff] %v8346_v57  ;;  %v3181_v5 = vmul.f32 %v8346_v57, %v8346_v57 }
 0x48e   : > { %v2921_v12 = vpop.f32.mrf.mxu1  ;;  %v3064_v32 = vadd.f32 %v3063_v26, %v3062_v7  ;;  %10149 = vst [vmem:[#allocation14_spill] sm:$0xff] %v8357_v63  ;;  %v3069_v26 = vsel %vm3021_vm2, %v8337_v42, 0.0 }
 0x48f   : > { %v3258_v0 = vadd.f32 %v3257_v14, %v3256_v27  ;;  %v3067_v27 = vsel %vm3021_vm2, %v8325_v36, 0.0  ;;  %v3180_v14 = vmul.f32 %v8337_v42, %v8337_v42 }
 0x490   : > { %v8328_v33 = vpop.f32.mrf.mxu1  ;;  %v3066_v59 = vadd.f32 %v3065_v52, %v3064_v32  ;;  %v3071_v32 = vsel %vm3021_vm2, %v8346_v57, 0.0  ;;  %v8377_v52 = vadd.f32 %v8029_v3, %v8020_v22 }
 0x491   : > { %v3260_v40 = vadd.f32 %v3259_v48, %v3258_v0  ;;  %v3265_v48 = vsel %vm3021_vm2, %v3179_v23, 0.0  ;;  %v8366_v0 = vadd.f32 %v8029_v3, %v8018_v21  ;;  %v3267_v44 = vsel %vm3021_vm2, %v3180_v14, 0.0 }
 0x492   : > { %v2926_v12 = vpop.f32.mrf.mxu1  ;;  %10151 = vst [vmem:[#allocation21_spill] sm:$0xff] %v8377_v52 }
 0x493   : > { %v3262_v53 = vadd.f32 %v3261_v28, %v3260_v40  ;;  %10150 = vst [vmem:[#allocation15_spill] sm:$0xff] %v8366_v0  ;;  %v3068_v12 = vadd.f32 %v3067_v27, %v3066_v59  ;;  %v3182_v28 = vmul.f32 %v8357_v63, %v8357_v63  ;;  %v3073_v27 = vsel %vm3021_vm2, %v8357_v63, 0.0 }
 0x494   : > { %v8348_v18 = vpop.f32.mrf.mxu1  ;;  %v3183_v14 = vmul.f32 %v8366_v0, %v8366_v0 }
 0x495   : > { %v3264_v7 = vadd.f32 %v3263_v9, %v3262_v53  ;;  %v3070_v40 = vadd.f32 %v3069_v26, %v3068_v12  ;;  %v3269_v9 = vsel %vm3021_vm2, %v3181_v5, 0.0  ;;  %v8386_v53 = vadd.f32 %v8029_v3, %v8022_v37 }
 0x496   : > { %v2929_v10 = vpop.f32.mrf.mxu1  ;;  %v3271_v22 = vsel %vm3021_vm2, %v3182_v28, 0.0  ;;  %v3184_v26 = vmul.f32 %v8377_v52, %v8377_v52  ;;  %v8397_v5 = vadd.f32 %v8029_v3, %v8024_v61 }
 0x497   : > { %v3266_v23 = vadd.f32 %v3265_v48, %v3264_v7  ;;  %10152 = vst [vmem:[#allocation25_spill] sm:$0xff] %v8386_v53  ;;  %v3072_v10 = vadd.f32 %v3071_v32, %v3070_v40  ;;  %v3075_v48 = vsel %vm3021_vm2, %v8366_v0, 0.0  ;;  %v3077_v32 = vsel %vm3021_vm2, %v8377_v52, 0.0 }
 0x498   : > { %v8368_v36 = vpop.f32.mrf.mxu1  ;;  %10153 = vst [vmem:[#allocation28_spill] sm:$0xff] %v8397_v5  ;;  %v3185_v28 = vmul.f32 %v8386_v53, %v8386_v53  ;;  %v3275_v61 = vsel %vm3021_vm2, %v3184_v26, 0.0 }
 0x499   : > { %v3268_v59 = vadd.f32 %v3267_v44, %v3266_v23  ;;  %v3074_v12 = vadd.f32 %v3073_v27, %v3072_v10  ;;  %v3273_v44 = vsel %vm3021_vm2, %v3183_v14, 0.0  ;;  %v8406_v23 = vadd.f32 %v8029_v3, %v8039_v47 }
 0x49a   : > { %v2934_v21 = vpop.f32.mrf.mxu1  ;;  %v3186_v27 = vmul.f32 %v8397_v5, %v8397_v5  ;;  %v8417_v14 = vadd.f32 %v8029_v3, %v8053_v45 }
 0x49b   : > { %v3270_v7 = vadd.f32 %v3269_v9, %v3268_v59  ;;  %10154 = vst [vmem:[#allocation19_spill] sm:$0xff] %v8406_v23  ;;  %v3076_v21 = vadd.f32 %v3075_v48, %v3074_v12  ;;  %v3079_v9 = vsel %vm3021_vm2, %v8386_v53, 0.0  ;;  %v3081_v48 = vsel %vm3021_vm2, %v8397_v5, 0.0 }
 0x49c   : > { %v8388_v57 = vpop.f32.mrf.mxu1  ;;  %10155 = vst [vmem:[#allocation33_spill] sm:$0xff] %v8417_v14  ;;  %v3187_v26 = vmul.f32 %v8406_v23, %v8406_v23  ;;  %v3279_v45 = vsel %vm3021_vm2, %v3186_v27, 0.0 }
 0x49d   : > { %v3272_v40 = vadd.f32 %v3271_v22, %v3270_v7  ;;  %v3078_v10 = vadd.f32 %v3077_v32, %v3076_v21  ;;  %v3277_v22 = vsel %vm3021_vm2, %v3185_v28, 0.0  ;;  %v8426_v7 = vadd.f32 %v8029_v3, %v8075_v62 }
 0x49e   : > { %v2937_v37 = vpop.f32.mrf.mxu1  ;;  %v3188_v32 = vmul.f32 %v8417_v14, %v8417_v14  ;;  %v8437_v28 = vadd.f32 %v8029_v3, %v8095_v25 }
 0x49f   : > { %v3274_v59 = vadd.f32 %v3273_v44, %v3272_v40  ;;  %10156 = vst [vmem:[#allocation35_spill] sm:$0xff] %v8426_v7  ;;  %v3080_v37 = vadd.f32 %v3079_v9, %v3078_v10  ;;  %v3083_v44 = vsel %vm3021_vm2, %v8406_v23, 0.0  ;;  %v3085_v9 = vsel %vm3021_vm2, %v8417_v14, 0.0 }
 0x4a0   : > { %v8408_v0 = vpop.f32.mrf.mxu1  ;;  %v3189_v27 = vmul.f32 %v8426_v7, %v8426_v7  ;;  %v3283_v25 = vsel %vm3021_vm2, %v3188_v32, 0.0 }
 0x4a1   : > { %v3276_v12 = vadd.f32 %v3275_v61, %v3274_v59  ;;  %v3082_v21 = vadd.f32 %v3081_v48, %v3080_v37  ;;  %v3281_v61 = vsel %vm3021_vm2, %v3187_v26, 0.0  ;;  %v8446_v59 = vadd.f32 %v8029_v3, %v8115_v49 }
 0x4a2   : > { %v2942_v47 = vpop.f32.mrf.mxu1  ;;  %v3190_v48 = vmul.f32 %v8437_v28, %v8437_v28  ;;  %v8457_v26 = vadd.f32 %v8029_v3, %v8135_v1 }
 0x4a3   : > { %v3278_v40 = vadd.f32 %v3277_v22, %v3276_v12  ;;  %v3084_v47 = vadd.f32 %v3083_v44, %v3082_v21  ;;  %v3087_v22 = vsel %vm3021_vm2, %v8426_v7, 0.0  ;;  %v3089_v44 = vsel %vm3021_vm2, %v8437_v28, 0.0 }
 0x4a4   : > { %v8428_v53 = vpop.f32.mrf.mxu1  ;;  %v3191_v32 = vmul.f32 %v8446_v59, %v8446_v59  ;;  %v3287_v1 = vsel %vm3021_vm2, %v3190_v48, 0.0 }
 0x4a5   : > { %v3280_v10 = vadd.f32 %v3279_v45, %v3278_v40  ;;  %v3086_v37 = vadd.f32 %v3085_v9, %v3084_v47  ;;  %v3285_v45 = vsel %vm3021_vm2, %v3189_v27, 0.0  ;;  %v8466_v40 = vadd.f32 %v8029_v3, %v8175_v55 }
 0x4a6   : > { %v2945_v62 = vpop.f32.mrf.mxu1  ;;  %v3192_v9 = vmul.f32 %v8457_v26, %v8457_v26  ;;  %v8477_v27 = vadd.f32 %v8029_v3, %v8209_v19 }
 0x4a7   : > { %v3282_v12 = vadd.f32 %v3281_v61, %v3280_v10  ;;  %v3088_v62 = vadd.f32 %v3087_v22, %v3086_v37  ;;  %v3091_v61 = vsel %vm3021_vm2, %v8446_v59, 0.0  ;;  %v3093_v22 = vsel %vm3021_vm2, %v8457_v26, 0.0 }
 0x4a8   : > { %v8448_v23 = vpop.f32.mrf.mxu1  ;;  %v3193_v48 = vmul.f32 %v8466_v40, %v8466_v40  ;;  %v3291_v19 = vsel %vm3021_vm2, %v3192_v9, 0.0 }
 0x4a9   : > { %v3284_v21 = vadd.f32 %v3283_v25, %v3282_v12  ;;  %v3090_v47 = vadd.f32 %v3089_v44, %v3088_v62  ;;  %v3289_v25 = vsel %vm3021_vm2, %v3191_v32, 0.0  ;;  %v8486_v12 = vadd.f32 %v8029_v3, %v8243_v29 }
 0x4aa   : > { %v2950_v49 = vpop.f32.mrf.mxu1  ;;  %v3194_v44 = vmul.f32 %v8477_v27, %v8477_v27  ;;  %v8497_v32 = vadd.f32 %v8029_v3, %v8272_v6 }
 0x4ab   : > { %v3286_v10 = vadd.f32 %v3285_v45, %v3284_v21  ;;  %v3092_v49 = vadd.f32 %v3091_v61, %v3090_v47  ;;  %v3095_v45 = vsel %vm3021_vm2, %v8466_v40, 0.0  ;;  %v3097_v61 = vsel %vm3021_vm2, %v8477_v27, 0.0 }
 0x4ac   : > { %v8468_v7 = vpop.f32.mrf.mxu1  ;;  %v3195_v9 = vmul.f32 %v8486_v12, %v8486_v12  ;;  %v3295_v6 = vsel %vm3021_vm2, %v3194_v44, 0.0 }
 0x4ad   : > { %v3288_v37 = vadd.f32 %v3287_v1, %v3286_v10  ;;  %v3094_v62 = vadd.f32 %v3093_v22, %v3092_v49  ;;  %v3293_v1 = vsel %vm3021_vm2, %v3193_v48, 0.0  ;;  %v8506_v10 = vadd.f32 %v8029_v3, %v8306_v16 }
 0x4ae   : > { %v2953_v55 = vpop.f32.mrf.mxu1  ;;  %v3196_v22 = vmul.f32 %v8497_v32, %v8497_v32  ;;  %v8517_v48 = vadd.f32 %v8029_v3, %v8328_v33 }
 0x4af   : > { %v3290_v21 = vadd.f32 %v3289_v25, %v3288_v37  ;;  %v3096_v55 = vadd.f32 %v3095_v45, %v3094_v62  ;;  %v3099_v25 = vsel %vm3021_vm2, %v8486_v12, 0.0  ;;  %v3101_v45 = vsel %vm3021_vm2, %v8497_v32, 0.0 }
 0x4b0   : > { %v8488_v14 = vpop.f32.mrf.mxu1  ;;  %v3197_v44 = vmul.f32 %v8506_v10, %v8506_v10  ;;  %v3299_v33 = vsel %vm3021_vm2, %v3196_v22, 0.0  ;;  %v8544_v22 = vadd.f32 %v8029_v3, %v8388_v57 }
 0x4b1   : > { %v3292_v47 = vadd.f32 %v3291_v19, %v3290_v21  ;;  %v3098_v49 = vadd.f32 %v3097_v61, %v3096_v55  ;;  %v3297_v19 = vsel %vm3021_vm2, %v3195_v9, 0.0  ;;  %v8526_v21 = vadd.f32 %v8029_v3, %v8348_v18 }
 0x4b2   : > { %v2958_v29 = vpop.f32.mrf.mxu1  ;;  %v3198_v61 = vmul.f32 %v8517_v48, %v8517_v48  ;;  %v8535_v9 = vadd.f32 %v8029_v3, %v8368_v36  ;;  %v3301_v18 = vsel %vm3021_vm2, %v3197_v44, 0.0  ;;  %v8553_v44 = vadd.f32 %v8029_v3, %v8408_v0 }
 0x4b3   : > { %v3294_v37 = vadd.f32 %v3293_v1, %v3292_v47  ;;  %v3100_v29 = vadd.f32 %v3099_v25, %v3098_v49  ;;  %v3103_v1 = vsel %vm3021_vm2, %v8506_v10, 0.0  ;;  %v3199_v25 = vmul.f32 %v8526_v21, %v8526_v21 }
 0x4b4   : > { %v8508_v5 = vpop.f32.mrf.mxu1  ;;  %v3303_v36 = vsel %vm3021_vm2, %v3198_v61, 0.0  ;;  %v8562_v61 = vadd.f32 %v8029_v3, %v8428_v53 }
 0x4b5   : > { %v3296_v62 = vadd.f32 %v3295_v6, %v3294_v37  ;;  %v3102_v55 = vadd.f32 %v3101_v45, %v3100_v29  ;;  %v3105_v6 = vsel %vm3021_vm2, %v8517_v48, 0.0  ;;  %v3200_v45 = vmul.f32 %v8535_v9, %v8535_v9 }
 0x4b6   : > { %v2961_v16 = vpop.f32.mrf.mxu1  ;;  %v3305_v57 = vsel %vm3021_vm2, %v3199_v25, 0.0  ;;  %v8571_v25 = vadd.f32 %v8029_v3, %v8448_v23 }
 0x4b7   : > { %v3298_v47 = vadd.f32 %v3297_v19, %v3296_v62  ;;  %v3104_v49 = vadd.f32 %v3103_v1, %v3102_v55  ;;  %v3107_v19 = vsel %vm3021_vm2, %v8526_v21, 0.0  ;;  %v3201_v1 = vmul.f32 %v8544_v22, %v8544_v22 }
 0x4b8   : > { %v2964_v52 = vpop.f32.mrf.mxu1  ;;  %v3307_v0 = vsel %vm3021_vm2, %v3200_v45, 0.0  ;;  %v8580_v45 = vadd.f32 %v8029_v3, %v8468_v7 }
 0x4b9   : > { %v3300_v37 = vadd.f32 %v3299_v33, %v3298_v47  ;;  %v3106_v29 = vadd.f32 %v3105_v6, %v3104_v49  ;;  %v3109_v33 = vsel %vm3021_vm2, %v8535_v9, 0.0  ;;  %v3202_v6 = vmul.f32 %v8553_v44, %v8553_v44 }
 0x4ba   : > { %v2966_v16 = vpop.f32.mrf.mxu1  ;;  %v3309_v53 = vsel %vm3021_vm2, %v3201_v1, 0.0  ;;  %v8589_v1 = vadd.f32 %v8029_v3, %v8488_v14 }
 0x4bb   : > { %v3302_v62 = vadd.f32 %v3301_v18, %v3300_v37  ;;  %v3108_v55 = vadd.f32 %v3107_v19, %v3106_v29  ;;  %v3111_v18 = vsel %vm3021_vm2, %v8544_v22, 0.0  ;;  %v3203_v19 = vmul.f32 %v8562_v61, %v8562_v61 }
 0x4bc   : > { %v2967_v63 = vpop.f32.mrf.mxu1  ;;  %v3311_v23 = vsel %vm3021_vm2, %v3202_v6, 0.0  ;;  %v8598_v6 = vadd.f32 %v8029_v3, %v8508_v5 }
 0x4bd   : > { %v3304_v47 = vadd.f32 %v3303_v36, %v3302_v62  ;;  %v3110_v49 = vadd.f32 %v3109_v33, %v3108_v55  ;;  %v3113_v36 = vsel %vm3021_vm2, %v8553_v44, 0.0  ;;  %v3204_v33 = vmul.f32 %v8571_v25, %v8571_v25 }
 0x4be   : > { %v2969_v16 = vpop.f32.mrf.mxu1  ;;  %v3313_v7 = vsel %vm3021_vm2, %v3203_v19, 0.0  ;;  %v8606_v19 = vadd.f32 %v8029_v3, %v2964_v52 }
 0x4bf   : > { %v3306_v37 = vadd.f32 %v3305_v57, %v3304_v47  ;;  %v3112_v29 = vadd.f32 %v3111_v18, %v3110_v49  ;;  %v3115_v57 = vsel %vm3021_vm2, %v8562_v61, 0.0  ;;  %v3205_v18 = vmul.f32 %v8580_v45, %v8580_v45 }
 0x4c0   : > { %v2972_v42 = vpop.f32.mrf.mxu1  ;;  %v3315_v14 = vsel %vm3021_vm2, %v3204_v33, 0.0  ;;  %v8614_v33 = vadd.f32 %v8029_v3, %v2967_v63 }
 0x4c1   : > { %v3308_v62 = vadd.f32 %v3307_v0, %v3306_v37  ;;  %v3114_v55 = vadd.f32 %v3113_v36, %v3112_v29  ;;  %v3117_v0 = vsel %vm3021_vm2, %v8571_v25, 0.0  ;;  %v3206_v36 = vmul.f32 %v8589_v1, %v8589_v1 }
 0x4c2   : > { %v2974_v16 = vpop.f32.mrf.mxu1  ;;  %v3317_v5 = vsel %vm3021_vm2, %v3205_v18, 0.0  ;;  %10157 = vst [vmem:[#allocation32_spill] sm:$0xff] %v8614_v33  ;;  %v8622_v18 = vadd.f32 %v8029_v3, %v2972_v42 }
 0x4c3   : > { %v3310_v47 = vadd.f32 %v3309_v53, %v3308_v62  ;;  %v3116_v49 = vadd.f32 %v3115_v57, %v3114_v55  ;;  %v3119_v53 = vsel %vm3021_vm2, %v8580_v45, 0.0  ;;  %v3207_v57 = vmul.f32 %v8598_v6, %v8598_v6 }
 0x4c4   : > { %v2975_v51 = vpop.f32.mrf.mxu1  ;;  %v3319_v52 = vsel %vm3021_vm2, %v3206_v36, 0.0 }
 0x4c5   : > { %v3312_v37 = vadd.f32 %v3311_v23, %v3310_v47  ;;  %v3118_v29 = vadd.f32 %v3117_v0, %v3116_v49  ;;  %v3121_v23 = vsel %vm3021_vm2, %v8589_v1, 0.0  ;;  %v3208_v0 = vmul.f32 %v8606_v19, %v8606_v19 }
 0x4c6   : > { %v2977_v16 = vpop.f32.mrf.mxu1  ;;  %v3321_v63 = vsel %vm3021_vm2, %v3207_v57, 0.0  ;;  %v8630_v36 = vadd.f32 %v8029_v3, %v2975_v51 }
 0x4c7   : > { %v3314_v62 = vadd.f32 %v3313_v7, %v3312_v37  ;;  %v3120_v55 = vadd.f32 %v3119_v53, %v3118_v29  ;;  %v3123_v7 = vsel %vm3021_vm2, %v8598_v6, 0.0  ;;  %v3209_v53 = vmul.f32 %v8614_v33, %v8614_v33 }
 0x4c8   : > { %v2980_v13 = vpop.f32.mrf.mxu1  ;;  %10158 = vst [vmem:[#allocation34_spill] sm:$0xff] %v8630_v36  ;;  %v3323_v42 = vsel %vm3021_vm2, %v3208_v0, 0.0 }
 0x4c9   : > { %v3316_v47 = vadd.f32 %v3315_v14, %v3314_v62  ;;  %v3122_v49 = vadd.f32 %v3121_v23, %v3120_v55  ;;  %v3125_v14 = vsel %vm3021_vm2, %v8606_v19, 0.0  ;;  %v3210_v23 = vmul.f32 %v8622_v18, %v8622_v18 }
 0x4ca   : > { %v2982_v16 = vpop.f32.mrf.mxu1  ;;  %v8638_v57 = vadd.f32 %v8029_v3, %v2980_v13  ;;  %v3325_v51 = vsel %vm3021_vm2, %v3209_v53, 0.0 }
 0x4cb   : > { %v3318_v37 = vadd.f32 %v3317_v5, %v3316_v47  ;;  %v3124_v29 = vadd.f32 %v3123_v7, %v3122_v49  ;;  %v3127_v5 = vsel %vm3021_vm2, %v8614_v33, 0.0  ;;  %v3211_v7 = vmul.f32 %v8630_v36, %v8630_v36 }
 0x4cc   : > { %v2983_v35 = vpop.f32.mrf.mxu1  ;;  %v3327_v13 = vsel %vm3021_vm2, %v3210_v23, 0.0 }
 0x4cd   : > { %v3320_v62 = vadd.f32 %v3319_v52, %v3318_v37  ;;  %v3126_v55 = vadd.f32 %v3125_v14, %v3124_v29  ;;  %v3129_v52 = vsel %vm3021_vm2, %v8622_v18, 0.0  ;;  %v8646_v0 = vadd.f32 %v8029_v3, %v2983_v35 }
 0x4ce   : > { %v2985_v16 = vpop.f32.mrf.mxu1  ;;  %v3212_v14 = vmul.f32 %v8638_v57, %v8638_v57  ;;  %v3329_v35 = vsel %vm3021_vm2, %v3211_v7, 0.0 }
 0x4cf   : > { %v3322_v47 = vadd.f32 %v3321_v63, %v3320_v62  ;;  %10159 = vst [vmem:[#allocation37_spill] sm:$0xff] %v8646_v0  ;;  %v3128_v49 = vadd.f32 %v3127_v5, %v3126_v55  ;;  %v3131_v63 = vsel %vm3021_vm2, %v8630_v36, 0.0  ;;  %v3213_v5 = vmul.f32 %v8646_v0, %v8646_v0 }
 0x4d0   : > { %v2988_v46 = vpop.f32.mrf.mxu1 }
 0x4d1   : > { %v3324_v37 = vadd.f32 %v3323_v42, %v3322_v47  ;;  %v8654_v53 = vadd.f32 %v8029_v3, %v2988_v46  ;;  %v3130_v29 = vadd.f32 %v3129_v52, %v3128_v49  ;;  %v3133_v42 = vsel %vm3021_vm2, %v8638_v57, 0.0 }
 0x4d2   : > { %v2990_v16 = vpop.f32.mrf.mxu1  ;;  %v3331_v46 = vsel %vm3021_vm2, %v3212_v14, 0.0 }
 0x4d3   : > { %v3326_v62 = vadd.f32 %v3325_v51, %v3324_v37  ;;  %v3132_v55 = vadd.f32 %v3131_v63, %v3130_v29  ;;  %v3135_v51 = vsel %vm3021_vm2, %v8646_v0, 0.0  ;;  %v3214_v52 = vmul.f32 %v8654_v53, %v8654_v53 }
 0x4d4   : > { %v2991_v33 = vpop.f32.mrf.mxu1 }
 0x4d5   : > { %v8662_v23 = vadd.f32 %v8029_v3, %v2991_v33  ;;  %v3328_v47 = vadd.f32 %v3327_v13, %v3326_v62  ;;  %v3134_v49 = vadd.f32 %v3133_v42, %v3132_v55  ;;  %v3333_v33 = vsel %vm3021_vm2, %v3213_v5, 0.0 }
 0x4d6   : > { %v2993_v16 = vpop.f32.mrf.mxu1  ;;  %v3137_v13 = vsel %vm3021_vm2, %v8654_v53, 0.0  ;;  %v3335_v0 = vsel %vm3021_vm2, %v3214_v52, 0.0 }
 0x4d7   : > { %10160 = vst [vmem:[#allocation39_spill] sm:$0xff] %v8662_v23  ;;  %v3330_v37 = vadd.f32 %v3329_v35, %v3328_v47  ;;  %v3215_v63 = vmul.f32 %v8662_v23, %v8662_v23  ;;  %v3136_v62 = vadd.f32 %v3135_v51, %v3134_v49 }
 0x4d8   : > { %v2996_v36 = vpop.f32.mrf.mxu1 }
 0x4d9   : > { %v8670_v7 = vadd.f32 %v8029_v3, %v2996_v36  ;;  %v3332_v14 = vadd.f32 %v3331_v46, %v3330_v37  ;;  %v3139_v36 = vsel %vm3021_vm2, %v8662_v23, 0.0  ;;  %v3138_v47 = vadd.f32 %v3137_v13, %v3136_v62 }
 0x4da   : > { %v2998_v16 = vpop.f32.mrf.mxu1 }
 0x4db   : > { %v3216_v35 = vmul.f32 %v8670_v7, %v8670_v7  ;;  %v3334_v5 = vadd.f32 %v3333_v33, %v3332_v14  ;;  %v3337_v16 = vsel %vm3021_vm2, %v3215_v63, 0.0  ;;  %v3141_v46 = vsel %vm3021_vm2, %v8670_v7, 0.0 }
 0x4dc   : > { %v2999_v29 = vpop.f32.mrf.mxu1  ;;  %v3140_v37 = vadd.f32 %v3139_v36, %v3138_v47 }
 0x4dd   : > { %v8683_v42 = vadd.f32 %v8029_v3, %v2999_v29  ;;  %v3336_v52 = vadd.f32 %v3335_v0, %v3334_v5  ;;  %v3339_v23 = vsel %vm3021_vm2, %v3216_v35, 0.0 }
 0x4de   : > { %v3001_v55 = vpop.f32.mrf.mxu1  ;;  %v3142_v14 = vadd.f32 %v3141_v46, %v3140_v37 }
 0x4df   : > { %10161 = vst [vmem:[#allocation36_spill] sm:$0xff] %v8683_v42  ;;  %v3217_v51 = vmul.f32 %v8683_v42, %v8683_v42  ;;  %v3143_v29 = vsel %vm3021_vm2, %v8683_v42, 0.0  ;;  %v3338_v13 = vadd.f32 %v3337_v16, %v3336_v52 }
 0x4e0   : > { %v3004_v49 = vpop.f32.mrf.mxu1  ;;  %v3144_v5 = vadd.f32 %v3143_v29, %v3142_v14 }
 0x4e1   : > { %v8694_v33 = vadd.f32 %v8029_v3, %v3004_v49  ;;  %v3341_v62 = vsel %vm3021_vm2, %v3217_v51, 0.0  ;;  %v3340_v36 = vadd.f32 %v3339_v23, %v3338_v13 }
 0x4e2   : > { %v3006_v63 = vpop.f32.mrf.mxu1 }
 0x4e3   : > { %10162 = vst [vmem:[#allocation38_spill] sm:$0xff] %v8694_v33  ;;  %v3145_v55 = vsel %vm3021_vm2, %v8694_v33, 0.0  ;;  %v3218_v0 = vmul.f32 %v8694_v33, %v8694_v33  ;;  %v3342_v49 = vadd.f32 %v3341_v62, %v3340_v36 }
 0x4e4   : > { %v3007_v35 = vpop.f32.mrf.mxu1  ;;  %v3146_v16 = vadd.f32 %v3145_v55, %v3144_v5 }
 0x4e5   : > { %v3343_v47 = vsel %vm3021_vm2, %v3218_v0, 0.0  ;;  %v8703_v42 = vadd.f32 %v8029_v3, %v3007_v35 }
 0x4e6   : > { %v3009_v46 = vpop.f32.mrf.mxu1  ;;  %v3344_v37 = vadd.f32 %v3343_v47, %v3342_v49 }
 0x4e7   : > { %v3147_v51 = vsel %vm3021_vm2, %v8703_v42, 0.0  ;;  %v3219_v52 = vmul.f32 %v8703_v42, %v8703_v42  ;;  %v10163_v46 = vld [vmem:[#allocation11_spill] sm:$0xff] }
 0x4e8   : > { %v3148_v63 = vadd.f32 %v3147_v51, %v3146_v16  ;;  %v3019_v16 = vld [vmem:[%s9417_s7] sm:$0x1] }
 0x4e9   : > { %v3345_v23 = vsel %vm3021_vm2, %v3219_v52, 0.0 }
 0x4ea   : > { %v3149_v29 = vrot.slane %v3148_v63, 4  ;;  %v3346_v13 = vadd.f32 %v3345_v23, %v3344_v37 }
 0x4ec   : > { %v3150_v14 = vadd.f32 %v3149_v29, %v3148_v63  ;;  %v3347_v33 = vrot.slane %v3346_v13, 4 }
 0x4ee   : > { %v3151_v0 = vrot.slane %v3150_v14, 2  ;;  %v3348_v62 = vadd.f32 %v3347_v33, %v3346_v13 }
 0x4f0   : > { %v3152_v3 = vadd.f32 %v3151_v0, %v3150_v14  ;;  %v3349_v5 = vrot.slane %v3348_v62, 2 }
 0x4f2   : > { %v3153_v35 = vrot.slane %v3152_v3, 1  ;;  %v3350_v47 = vadd.f32 %v3349_v5, %v3348_v62 }
 0x4f4   : > { %v3154_v55 = vadd.f32 %v3153_v35, %v3152_v3  ;;  %v3351_v33 = vrot.slane %v3350_v47, 1 }
 0x4f6   : > { %v3155_v36 = vmul.f32 0.001953125, %v3154_v55 }
 0x4f8   : > { %4657 = vmatmul.mubr.msk.f32.vlgmr.msra.gmra.mxu0 %vm3021_vm2, %v3155_v36 }
 0x4f9   : > { %4660 = vmatpush3.msra.mxu0 %v8140_v60  ;;  %4675 = vmatprep.mubr.msk.f32.mxu0 %vm5034_vm3, %v10142_v31  ;;  %v3352_v60 = vadd.f32 %v3351_v33, %v3350_v47 }
 0x4fa   : > { %4661 = vmatprep.subr.mxu0 %v10142_v31 }
 0x4fb   : > { %4662 = vmatpush3.msra.mxu0 %v8155_v56  ;;  %v3353_v56 = vmul.f32 0.001953125, %v3352_v60 }
 0x4fc   : > { %4663 = vmatprep.subr.mxu0 %v10142_v31 }
 0x4fd   : > { %4664 = vmatpush3.msra.mxu0 %v8173_v8  ;;  %v4824_v8 = vld [vmem:[%s9419_s9 + $0x8] sm:$0xff]  }
 0x4fe   : > { %4665 = vmatprep.subr.mxu0 %v10142_v31  ;;  %4752 = vmatprep.subr.bf16.mxu1 %v4824_v8 }
 0x4ff   : > { %4666 = vmatpush3.msra.mxu0 %v8191_v17  ;;  %4756 = vmatpush3.bf16.msra.mxu1 %v4824_v8  ;;  %v4825_v17 = vld [vmem:[%s9419_s9] sm:$0xff]  }
 0x500   : > { %4667 = vmatprep.subr.mxu0 %v10142_v31  ;;  %4753 = vmatprep.subr.bf16.mxu1 %v4825_v17 }
 0x501   : > { %4668 = vmatpush3.msra.mxu0 %v8207_v58 }
 0x502   : > { %4669 = vmatprep.subr.mxu0 %v10142_v31 }
 0x503   : > { %4670 = vmatpush3.msra.mxu0 %v8225_v41  ;;  %4757 = vmatpush3.bf16.msra.mxu1 %v4825_v17 }
 0x504   : > { %4671 = vmatprep.subr.mxu0 %v10142_v31 }
 0x505   : > { %4672 = vmatpush3.msra.mxu0 %v8241_v15 }
 0x506   : > { %4673 = vmatprep.subr.mxu0 %v10142_v31 }
 0x507   : > { %4674 = vmatpush3.msra.mxu0 %v8259_v20 }
 0x508   : > { %4676 = vmatmul.mubr.msk.f32.vlgmr.msra.gmra.mxu0 %vm3021_vm2, %v3353_v56  ;;  %4678 = vmatprep.subr.bf16.mxu0 %v8278_v2 }
 0x509   : > { %4679 = vmatpush3.bf16.msra.mxu0 %v8278_v2 }
 0x50a   : > { %4680 = vmatprep.subr.bf16.mxu0 %v8283_v24 }
 0x50d   : > { %4681 = vmatpush3.bf16.msra.mxu0 %v8283_v24 }
 0x50e   : > { %4682 = vmatprep.subr.bf16.mxu0 %v4824_v8 }
 0x511   : > { %4683 = vmatpush3.bf16.msra.mxu0 %v4824_v8 }
 0x512   : > { %4684 = vmatprep.subr.bf16.mxu0 %v4825_v17 }
 0x515   : > { %4685 = vmatpush3.bf16.msra.mxu0 %v4825_v17 }
 0x5b8   : > { %v3423_v31 = vpop.f32.mrf.mxu0 }
 0x5b9   : > { %v3500_v15 = vmul.f32 %v3423_v31, %v3423_v31  ;;  %v8743_v51 = vrot.slane %v3423_v31, %v10163_v46  ;;  %v8805_v31 = vld [vmem:[%s9418_s8] ss:$0 sm:$0xff] }
 0x5ba   : > { %v4658_v58 = vpop.f32.mrf.mxu0 }
 0x5bb   : > { %v3542_v37 = vsub.f32 %v8437_v28, %v8743_v51  ;;  %v3543_v63 = vsub.f32 %v8446_v59, %v8743_v51  ;;  %v3544_v23 = vsub.f32 %v8457_v26, %v8743_v51  ;;  %v3545_v29 = vsub.f32 %v8466_v40, %v8743_v51 }
 0x5bc   : > { %v3546_v14 = vsub.f32 %v8477_v27, %v8743_v51  ;;  %v3547_v0 = vsub.f32 %v8486_v12, %v8743_v51  ;;  %v3548_v28 = vsub.f32 %v8497_v32, %v8743_v51  ;;  %v3549_v59 = vsub.f32 %v8506_v10, %v8743_v51 }
 0x5bd   : > { %v3550_v26 = vsub.f32 %v8517_v48, %v8743_v51  ;;  %v3551_v40 = vsub.f32 %v8526_v21, %v8743_v51  ;;  %v3552_v3 = vsub.f32 %v8535_v9, %v8743_v51  ;;  %v3553_v27 = vsub.f32 %v8544_v22, %v8743_v51 }
 0x5be   : > { %v3554_v12 = vsub.f32 %v8553_v44, %v8743_v51  ;;  %v3555_v32 = vsub.f32 %v8562_v61, %v8743_v51  ;;  %v3556_v10 = vsub.f32 %v8571_v25, %v8743_v51  ;;  %v3557_v48 = vsub.f32 %v8580_v45, %v8743_v51 }
 0x5bf   : > { %v3558_v21 = vsub.f32 %v8589_v1, %v8743_v51  ;;  %v3559_v9 = vsub.f32 %v8598_v6, %v8743_v51  ;;  %v3508_v58 = vsub.f32 %v8037_v38, %v8743_v51  ;;  %v3515_v38 = vsub.f32 %v8093_v39, %v8743_v51 }
 0x5c8   : > { %v3496_v41 = vpop.f32.mrf.mxu0 }
 0x5c9   : > { %v3501_v2 = vsub.f32 %v3496_v41, %v3500_v15  ;;  %v3509_v41 = vsub.f32 %v8033_v4, %v8743_v51  ;;  %v3510_v15 = vsub.f32 %v8043_v30, %v8743_v51  ;;  %v3516_v4 = vsub.f32 %v8104_v43, %v8743_v51 }
 0x5ca   : > { %v4677_v20 = vpop.f32.mrf.mxu0 }
 0x5cb   : > { %v3502_v24 = vadd.f32 1e-05, %v3501_v2  ;;  %v3511_v20 = vsub.f32 %v8049_v50, %v8743_v51  ;;  %v3512_v2 = vsub.f32 %v8061_v54, %v8743_v51 }
 0x5cd   : > { %4958 = vrsqrt.f32 %v3502_v24  ;;  %v3513_v24 = vsub.f32 %v8072_v34, %v8743_v51 }
 0x5da   : > { %v4959_v49 = vpop.eup %4958 }
 0x5db   : > { %v3572_v52 = vmul.f32 %v4959_v49, %v3019_v16  ;;  %v3514_v49 = vsub.f32 %v8084_v11, %v8743_v51 }
 0x5dd   : > { %v8754_v13 = vrot.slane %v3572_v52, %v10163_v46 }
 0x5df   : > { %v3611_v22 = vmul.f32 %v8754_v13, %v3542_v37  ;;  %v3612_v35 = vmul.f32 %v8754_v13, %v3543_v63  ;;  %v3613_v44 = vmul.f32 %v8754_v13, %v3544_v23  ;;  %v3614_v61 = vmul.f32 %v8754_v13, %v3545_v29 }
 0x5e0   : > { %v3615_v62 = vmul.f32 %v8754_v13, %v3546_v14  ;;  %v3616_v25 = vmul.f32 %v8754_v13, %v3547_v0  ;;  %v3617_v45 = vmul.f32 %v8754_v13, %v3548_v28  ;;  %v3618_v55 = vmul.f32 %v8754_v13, %v3549_v59 }
 0x5e1   : > { %v3619_v1 = vmul.f32 %v8754_v13, %v3550_v26  ;;  %v3620_v6 = vmul.f32 %v8754_v13, %v3551_v40  ;;  %v3621_v36 = vmul.f32 %v8754_v13, %v3552_v3  ;;  %v3622_v5 = vmul.f32 %v8754_v13, %v3553_v27  ;;  %v10164_v26 = vld [vmem:[#allocation22_spill] sm:$0xff] }
 0x5e2   : > { %v3623_v47 = vmul.f32 %v8754_v13, %v3554_v12  ;;  %v3624_v33 = vmul.f32 %v8754_v13, %v3555_v32  ;;  %v3625_v60 = vmul.f32 %v8754_v13, %v3556_v10  ;;  %v3626_v56 = vmul.f32 %v8754_v13, %v3557_v48  ;;  %v10165_v3 = vld [vmem:[#allocation18_spill] sm:$0xff]  ;;  %v10166_v12 = vld [vmem:[#allocation23_spill] sm:$0xff] }
 0x5e3   : > { %v3627_v8 = vmul.f32 %v8754_v13, %v3558_v21  ;;  %v3628_v17 = vmul.f32 %v8754_v13, %v3559_v9  ;;  %v3681_v30 = vadd.f32 %v8805_v31, %v3611_v22  ;;  %v3682_v16 = vadd.f32 %v8805_v31, %v3612_v35  ;;  %v10167_v10 = vld [vmem:[#allocation26_spill] sm:$0xff]  ;;  %v10168_v21 = vld [vmem:[#allocation29_spill] sm:$0xff]  ;;  %v10169_v22 = vld [vmem:[#allocation31_spill] sm:$0xff] }
 0x5e4   : > { %v8828_v50 = vadd.f32 %v8805_v31, %v3613_v44  ;;  %v8831_v54 = vadd.f32 %v8805_v31, %v3614_v61  ;;  %v3685_v34 = vadd.f32 %v8805_v31, %v3615_v62  ;;  %v3686_v11 = vadd.f32 %v8805_v31, %v3616_v25  ;;  %v10170_v61 = vld [vmem:[#allocation32_spill] sm:$0xff] }
 0x5e5   : > { %v8836_v46 = vadd.f32 %v8805_v31, %v3617_v45  ;;  %v8839_v39 = vadd.f32 %v8805_v31, %v3618_v55  ;;  %v3689_v43 = vadd.f32 %v8805_v31, %v3619_v1  ;;  %v3690_v52 = vadd.f32 %v8805_v31, %v3620_v6  ;;  %v10171_v45 = vld [vmem:[#allocation34_spill] sm:$0xff] }
 0x5e6   : > { %v8844_v37 = vadd.f32 %v8805_v31, %v3621_v36  ;;  %v8847_v63 = vadd.f32 %v8805_v31, %v3622_v5  ;;  %v3693_v23 = vadd.f32 %v8805_v31, %v3623_v47  ;;  %v3694_v29 = vadd.f32 %v8805_v31, %v3624_v33  ;;  %v10172_v5 = vld [vmem:[#allocation37_spill] sm:$0xff]  ;;  %v10173_v33 = vld [vmem:[#allocation39_spill] sm:$0xff] }
 0x5e7   : > { %v8852_v14 = vadd.f32 %v8805_v31, %v3625_v60  ;;  %v8855_v0 = vadd.f32 %v8805_v31, %v3626_v56  ;;  %v3697_v28 = vadd.f32 %v8805_v31, %v3627_v8  ;;  %v3698_v59 = vadd.f32 %v8805_v31, %v3628_v17  ;;  %v10174_v56 = vld [vmem:[#allocation36_spill] sm:$0xff]  ;;  %v10175_v17 = vld [vmem:[#allocation38_spill] sm:$0xff] }
 0x5e8   : > { %v3517_v40 = vsub.f32 %v10164_v26, %v8743_v51  ;;  %v3518_v27 = vsub.f32 %v10165_v3, %v8743_v51  ;;  %v3519_v32 = vsub.f32 %v10166_v12, %v8743_v51  ;;  %v3520_v48 = vsub.f32 %v10167_v10, %v8743_v51 }
 0x5e9   : > { %v3521_v9 = vsub.f32 %v10168_v21, %v8743_v51  ;;  %v3522_v35 = vsub.f32 %v10169_v22, %v8743_v51  ;;  %v3560_v44 = vsub.f32 %v8606_v19, %v8743_v51  ;;  %v3561_v62 = vsub.f32 %v10170_v61, %v8743_v51 }
 0x5ea   : > { %v3562_v25 = vsub.f32 %v8622_v18, %v8743_v51  ;;  %v3563_v55 = vsub.f32 %v10171_v45, %v8743_v51  ;;  %v3579_v1 = vmul.f32 %v8754_v13, %v3510_v15  ;;  %v3580_v6 = vmul.f32 %v8754_v13, %v3511_v20 }
 0x5eb   : > { %v3564_v36 = vsub.f32 %v8638_v57, %v8743_v51  ;;  %v3565_v47 = vsub.f32 %v10172_v5, %v8743_v51  ;;  %v3566_v19 = vsub.f32 %v8654_v53, %v8743_v51  ;;  %v3567_v60 = vsub.f32 %v10173_v33, %v8743_v51 }
 0x5ec   : > { %v3568_v18 = vsub.f32 %v8670_v7, %v8743_v51  ;;  %v3569_v8 = vsub.f32 %v10174_v56, %v8743_v51  ;;  %v3570_v15 = vsub.f32 %v10175_v17, %v8743_v51  ;;  %v3631_v57 = vmul.f32 %v8754_v13, %v3562_v25 }
 0x5ed   : > { %v8896_v20 = vpack.c.bf16 %v3682_v16, %v3681_v30  ;;  %v8898_v26 = vpack.c.bf16 %v3686_v11, %v3685_v34  ;;  %v8900_v3 = vpack.c.bf16 %v3690_v52, %v3689_v43  ;;  %v8902_v53 = vpack.c.bf16 %v3694_v29, %v3693_v23 }
 0x5ee   : > { %v3632_v12 = vmul.f32 %v8754_v13, %v3563_v55  ;;  %v3649_v7 = vadd.f32 %v8805_v31, %v3579_v1  ;;  %v3650_v61 = vadd.f32 %v8805_v31, %v3580_v6  ;;  %v8907_v45 = vpack.c.bf16 %v3698_v59, %v3697_v28 }
 0x5ef   : > { %v3571_v5 = vsub.f32 %v8703_v42, %v8743_v51  ;;  %v3577_v30 = vmul.f32 %v8754_v13, %v3508_v58  ;;  %v3583_v16 = vmul.f32 %v8754_v13, %v3514_v49  ;;  %v3584_v34 = vmul.f32 %v8754_v13, %v3515_v38 }
 0x5f0   : > { %v3578_v11 = vmul.f32 %v8754_v13, %v3509_v41  ;;  %v3581_v43 = vmul.f32 %v8754_v13, %v3512_v2  ;;  %v3635_v52 = vmul.f32 %v8754_v13, %v3566_v19  ;;  %v3636_v23 = vmul.f32 %v8754_v13, %v3567_v60 }
 0x5f1   : > { %v3582_v29 = vmul.f32 %v8754_v13, %v3513_v24  ;;  %v3585_v28 = vmul.f32 %v8754_v13, %v3516_v4  ;;  %v3629_v42 = vmul.f32 %v8754_v13, %v3560_v44  ;;  %v3630_v58 = vmul.f32 %v8754_v13, %v3561_v62 }
 0x5f2   : > { %v3586_v49 = vmul.f32 %v8754_v13, %v3517_v40  ;;  %v3701_v38 = vadd.f32 %v8805_v31, %v3631_v57  ;;  %v3702_v41 = vadd.f32 %v8805_v31, %v3632_v12  ;;  %v8925_v59 = vpack.c.bf16 %v3650_v61, %v3649_v7 }
 0x5f3   : > { %v3633_v2 = vmul.f32 %v8754_v13, %v3564_v36  ;;  %v3634_v25 = vmul.f32 %v8754_v13, %v3565_v47  ;;  %v3653_v24 = vadd.f32 %v8805_v31, %v3583_v16  ;;  %v3654_v4 = vadd.f32 %v8805_v31, %v3584_v34 }
 0x5f4   : > { %v3637_v44 = vmul.f32 %v8754_v13, %v3568_v18  ;;  %v3638_v62 = vmul.f32 %v8754_v13, %v3569_v8  ;;  %v3705_v40 = vadd.f32 %v8805_v31, %v3635_v52  ;;  %v3706_v55 = vadd.f32 %v8805_v31, %v3636_v23 }
 0x5f5   : > { %v3647_v1 = vadd.f32 %v8805_v31, %v3577_v30  ;;  %v3648_v6 = vadd.f32 %v8805_v31, %v3578_v11  ;;  %v3699_v36 = vadd.f32 %v8805_v31, %v3629_v42  ;;  %v3700_v47 = vadd.f32 %v8805_v31, %v3630_v58 }
 0x5f6   : > { %v3587_v19 = vmul.f32 %v8754_v13, %v3518_v27  ;;  %v3588_v33 = vmul.f32 %v8754_v13, %v3519_v32  ;;  %v8941_v60 = vpack.c.bf16 %v3702_v41, %v3701_v38  ;;  %v3744_v18 = vmul.bf16 1056980736, %v8925_v59 }
 0x5f7   : > { %v3651_v56 = vadd.f32 %v8805_v31, %v3581_v43  ;;  %v3652_v8 = vadd.f32 %v8805_v31, %v3582_v29  ;;  %v3655_v17 = vadd.f32 %v8805_v31, %v3585_v28  ;;  %v8947_v57 = vpack.c.bf16 %v3654_v4, %v3653_v24  ;;  %v10177_v4 = vld [vmem:[#allocation56_spill] sm:$0xff] }
 0x5f8   : > { %v3656_v12 = vadd.f32 %v8805_v31, %v3586_v49  ;;  %v3703_v7 = vadd.f32 %v8805_v31, %v3633_v2  ;;  %v3704_v27 = vadd.f32 %v8805_v31, %v3634_v25  ;;  %v8952_v61 = vpack.c.bf16 %v3706_v55, %v3705_v40 }
 0x5f9   : > { %v3707_v32 = vadd.f32 %v8805_v31, %v3637_v44  ;;  %v3708_v30 = vadd.f32 %v8805_v31, %v3638_v62  ;;  %v8956_v16 = vpack.c.bf16 %v3648_v6, %v3647_v1  ;;  %v8958_v34 = vpack.c.bf16 %v3700_v47, %v3699_v36  ;;  %v10178_v62 = vld [vmem:[#allocation57_spill] sm:$0xff] }
 0x5fa   : > { %v3770_v11 = vmul.bf16 1056980736, %v8941_v60  ;;  %4960 = vtanh.bf16 %v3744_v18  ;;  %v8963_v43 = vpack.c.bf16 %v8831_v54, %v8828_v50  ;;  %v8967_v52 = vpack.c.bf16 %v8839_v39, %v8836_v46 }
 0x5fb   : > { %v3589_v23 = vmul.f32 %v8754_v13, %v3520_v48  ;;  %v3590_v29 = vmul.f32 %v8754_v13, %v3521_v9  ;;  %v3746_v28 = vmul.bf16 1056980736, %v8947_v57  ;;  %v8978_v42 = vpack.c.bf16 %v3652_v8, %v3651_v56 }
 0x5fc   : > { %v3639_v50 = vmul.f32 %v8754_v13, %v3570_v15  ;;  %v3640_v54 = vmul.f32 %v8754_v13, %v3571_v5  ;;  %v3772_v46 = vmul.bf16 1056980736, %v8952_v61  ;;  %v8983_v39 = vpack.c.bf16 %v3704_v27, %v3703_v7  ;;  %v10176_v15 = vld [vmem:[#allocation54_spill] sm:$0xff]  ;;  %v10180_v7 = vld [vmem:[#allocation61_spill] sm:$0xff] }
 0x5fd   : > { %v3743_v10 = vmul.bf16 1056980736, %v8956_v16  ;;  %v8986_v48 = vpack.c.bf16 %v3656_v12, %v3655_v17  ;;  %v8990_v21 = vpack.c.bf16 %v8847_v63, %v8844_v37  ;;  %v8994_v9 = vpack.c.bf16 %v8855_v0, %v8852_v14  ;;  %v10179_v17 = vld [vmem:[#allocation59_spill] sm:$0xff] }
 0x5fe   : > { %v3523_v58 = vsub.f32 %v10176_v15, %v8743_v51  ;;  %4962 = vtanh.bf16 %v3770_v11  ;;  %v3769_v5 = vmul.bf16 1056980736, %v8958_v34  ;;  %v8999_v49 = vpack.c.bf16 %v3708_v30, %v3707_v32 }
 0x5ff   : > { %v3657_v38 = vadd.f32 %v8805_v31, %v3587_v19  ;;  %v3658_v41 = vadd.f32 %v8805_v31, %v3588_v33  ;;  %4964 = vtanh.bf16 %v3746_v28  ;;  %v3745_v37 = vmul.bf16 1056980736, %v8978_v42 }
 0x600   : > { %v3709_v63 = vadd.f32 %v8805_v31, %v3639_v50  ;;  %v3710_v14 = vadd.f32 %v8805_v31, %v3640_v54  ;;  %4966 = vtanh.bf16 %v3772_v46  ;;  %v3771_v0 = vmul.bf16 1056980736, %v8983_v39  ;;  %v10182_v50 = vld [vmem:[#allocation4_spill] sm:$0xff] }
 0x601   : > { %v3659_v2 = vadd.f32 %v8805_v31, %v3589_v23  ;;  %v3660_v25 = vadd.f32 %v8805_v31, %v3590_v29  ;;  %4968 = vtanh.bf16 %v3743_v10  ;;  %v3747_v24 = vmul.bf16 1056980736, %v8986_v48  ;;  %v10181_v29 = vld [vmem:[#allocation2_spill] sm:$0xff] }
 0x602   : > { %v3524_v44 = vsub.f32 %v10177_v4, %v8743_v51  ;;  %v3525_v40 = vsub.f32 %v10178_v62, %v8743_v51  ;;  %4970 = vtanh.bf16 %v3769_v5  ;;  %v3773_v55 = vmul.bf16 1056980736, %v8999_v49 }
 0x603   : > { %v3591_v1 = vmul.f32 %v8754_v13, %v3522_v35  ;;  %v3592_v6 = vmul.f32 %v8754_v13, %v3523_v58  ;;  %v9020_v36 = vpack.c.bf16 %v3658_v41, %v3657_v38  ;;  %4972 = vtanh.bf16 %v3745_v37 }
 0x604   : > { %v9022_v47 = vpack.c.bf16 %v3710_v14, %v3709_v63  ;;  %4974 = vtanh.bf16 %v3771_v0  ;;  %v3593_v19 = vmul.f32 %v8754_v13, %v3524_v44  ;;  %v3594_v33 = vmul.f32 %v8754_v13, %v3525_v40  ;;  %v10183_v63 = vld [vmem:[#allocation6_spill] sm:$0xff] }
 0x605   : > { %4976 = vtanh.bf16 %v3747_v24  ;;  %v9026_v18 = vpack.c.bf16 %v3660_v25, %v3659_v2  ;;  %v3661_v22 = vadd.f32 %v8805_v31, %v3591_v1  ;;  %v3662_v35 = vadd.f32 %v8805_v31, %v3592_v6  ;;  %v10184_v24 = vld [vmem:[#allocation8_spill] sm:$0xff]  ;;  %v10185_v44 = vld [vmem:[#allocation10_spill] sm:$0xff] }
 0x606   : > { %4978 = vtanh.bf16 %v3773_v55  ;;  %v3748_v56 = vmul.bf16 1056980736, %v9020_v36  ;;  %v3526_v12 = vsub.f32 %v10179_v17, %v8743_v51  ;;  %v3527_v27 = vsub.f32 %v10180_v7, %v8743_v51  ;;  %v10186_v6 = vld [vmem:[#allocation12_spill] sm:$0xff] }
 0x607   : > { %v3774_v32 = vmul.bf16 1056980736, %v9022_v47  ;;  %v3663_v30 = vadd.f32 %v8805_v31, %v3593_v19  ;;  %v3664_v11 = vadd.f32 %v8805_v31, %v3594_v33  ;;  %v3749_v23 = vmul.bf16 1056980736, %v9026_v18 }
 0x608   : > { %v4961_v8 = vpop.eup %4960  ;;  %v3528_v28 = vsub.f32 %v10181_v29, %v8743_v51  ;;  %v3529_v54 = vsub.f32 %v10182_v50, %v8743_v51  ;;  %v3595_v46 = vmul.f32 %v8754_v13, %v3526_v12  ;;  %v3596_v10 = vmul.f32 %v8754_v13, %v3527_v27 }
 0x609   : > { %v9045_v15 = vpack.c.bf16 %v3662_v35, %v3661_v22  ;;  %4980 = vtanh.bf16 %v3748_v56  ;;  %v3808_v58 = vadd.bf16 1065369472, %v4961_v8  ;;  %v3530_v14 = vsub.f32 %v10183_v63, %v8743_v51 }
 0x60a   : > { %v3597_v38 = vmul.f32 %v8754_v13, %v3528_v28  ;;  %v3598_v41 = vmul.f32 %v8754_v13, %v3529_v54  ;;  %4982 = vtanh.bf16 %v3774_v32  ;;  %v9053_v2 = vpack.c.bf16 %v3664_v11, %v3663_v30 }
 0x60b   : > { %4984 = vtanh.bf16 %v3749_v23  ;;  %v3531_v4 = vsub.f32 %v10184_v24, %v8743_v51  ;;  %v3532_v62 = vsub.f32 %v10185_v44, %v8743_v51  ;;  %v3665_v40 = vadd.f32 %v8805_v31, %v3595_v46 }
 0x60c   : > { %v4963_v5 = vpop.eup %4962  ;;  %v3666_v55 = vadd.f32 %v8805_v31, %v3596_v10  ;;  %v3533_v19 = vsub.f32 %v10186_v6, %v8743_v51  ;;  %v3599_v33 = vmul.f32 %v8754_v13, %v3530_v14  ;;  %v3750_v22 = vmul.bf16 1056980736, %v9045_v15 }
 0x60d   : > { %v9049_v37 = vpop.eup %4964  ;;  %v3834_v0 = vadd.bf16 1065369472, %v4963_v5  ;;  %v3840_v35 = vmul.bf16 1056980736, %v3808_v58  ;;  %v3667_v8 = vadd.f32 %v8805_v31, %v3597_v38  ;;  %v3668_v17 = vadd.f32 %v8805_v31, %v3598_v41 }
 0x60e   : > { %v9055_v25 = vpop.eup %4966  ;;  %v3600_v32 = vmul.f32 %v8754_v13, %v3531_v4  ;;  %v3601_v30 = vmul.f32 %v8754_v13, %v3532_v62  ;;  %v3751_v23 = vmul.bf16 1056980736, %v9053_v2  ;;  %v3602_v28 = vmul.f32 %v8754_v13, %v3533_v19 }
 0x60f   : > { %v4969_v1 = vpop.eup %4968  ;;  %v3866_v12 = vmul.bf16 1056980736, %v3834_v0  ;;  %v9073_v50 = vpack.c.bf16 %v3666_v55, %v3665_v40  ;;  %4986 = vtanh.bf16 %v3750_v22  ;;  %v3872_v58 = vmul.bf16 %v3840_v35, %v8925_v59 }
 0x610   : > { %v4971_v56 = vpop.eup %4970  ;;  %v3807_v7 = vadd.bf16 1065369472, %v4969_v1  ;;  %v9078_v24 = vpack.c.bf16 %v3668_v17, %v3667_v8  ;;  %v3810_v62 = vadd.bf16 1065369472, %v9049_v37  ;;  %4988 = vtanh.bf16 %v3751_v23  ;;  %v10188_v37 = vld [vmem:[#allocation15_spill] sm:$0xff] }
 0x611   : > { %v4973_v27 = vpop.eup %4972  ;;  %v3833_v11 = vadd.bf16 1065369472, %v4971_v56  ;;  %v3898_v63 = vmul.bf16 %v3866_v12, %v8941_v60  ;;  %v3836_v40 = vadd.bf16 1065369472, %v9055_v25  ;;  %v10187_v60 = vld [vmem:[#allocation14_spill] sm:$0xff]  ;;  %v3535_v6 = vsub.f32 %v10188_v37, %v8743_v51 }
 0x612   : > { %v4975_v29 = vpop.eup %4974  ;;  %v3839_v54 = vmul.bf16 1056980736, %v3807_v7  ;;  %v3809_v46 = vadd.bf16 1065369472, %v4973_v27  ;;  %v3534_v1 = vsub.f32 %v10187_v60, %v8743_v51  ;;  %v3669_v19 = vadd.f32 %v8805_v31, %v3599_v33  ;;  %v10189_v33 = vld [vmem:[#allocation21_spill] sm:$0xff] }
 0x613   : > { %v4977_v10 = vpop.eup %4976  ;;  %v3865_v5 = vmul.bf16 1056980736, %v3833_v11  ;;  %v3835_v38 = vadd.bf16 1065369472, %v4975_v29  ;;  %v3752_v25 = vmul.bf16 1056980736, %v9073_v50  ;;  %v3671_v35 = vadd.f32 %v8805_v31, %v3601_v30 }
 0x614   : > { %v4979_v41 = vpop.eup %4978  ;;  %v3871_v14 = vmul.bf16 %v3839_v54, %v8956_v16  ;;  %v3841_v0 = vmul.bf16 1056980736, %v3809_v46  ;;  %v3811_v55 = vadd.bf16 1065369472, %v4977_v10  ;;  %v3672_v56 = vadd.f32 %v8805_v31, %v3602_v28  ;;  %v10190_v7 = vld [vmem:[#allocation25_spill] sm:$0xff] }
 0x615   : > { %v3897_v4 = vmul.bf16 %v3865_v5, %v8958_v34  ;;  %v3867_v44 = vmul.bf16 1056980736, %v3835_v38  ;;  %v3837_v34 = vadd.bf16 1065369472, %v4979_v41  ;;  %v3753_v8 = vmul.bf16 1056980736, %v9078_v24 }
 0x616   : > { %4686 = vmatprep.mubr.msk.bf16.mxu0 %vm3021_vm2, %v3871_v14  ;;  %v3873_v59 = vmul.bf16 %v3841_v0, %v8978_v42  ;;  %v3670_v42 = vadd.f32 %v8805_v31, %v3600_v32  ;;  %v3536_v12 = vsub.f32 %v10189_v33, %v8743_v51  ;;  %v3537_v27 = vsub.f32 %v10190_v7, %v8743_v51 }
 0x617   : > { %4738 = vmatprep.mubr.msk.bf16.mxu1 %vm3021_vm2, %v3897_v4  ;;  %4687 = vmatmul.mubr.msk.bf16.vlgmr.msra.gmra.mxu0 %vm3021_vm2, %v3872_v58  ;;  %v3899_v16 = vmul.bf16 %v3867_v44, %v8983_v39  ;;  %v4981_v22 = vpop.eup %4980  ;;  %v3842_v39 = vmul.bf16 1056980736, %v3810_v62  ;;  %v3868_v32 = vmul.bf16 1056980736, %v3836_v40  ;;  %v3843_v11 = vmul.bf16 1056980736, %v3811_v55 }
 0x618   : > { %4739 = vmatmul.mubr.msk.bf16.vlgmr.msra.gmra.mxu1 %vm3021_vm2, %v3898_v63  ;;  %4690 = vmatprep.mubr.msk.bf16.mxu0 %vm3021_vm2, %v3873_v59  ;;  %v4983_v17 = vpop.eup %4982  ;;  %v3603_v29 = vmul.f32 %v8754_v13, %v3534_v1  ;;  %v3604_v30 = vmul.f32 %v8754_v13, %v3535_v6  ;;  %v3869_v28 = vmul.bf16 1056980736, %v3837_v34  ;;  %v3605_v54 = vmul.f32 %v8754_v13, %v3536_v12  ;;  %v10191_v4 = vld [vmem:[#allocation28_spill] sm:$0xff]  ;;  %v10192_v59 = vld [vmem:[#allocation19_spill] sm:$0xff]  ;;  %v10193_v34 = vld [vmem:[#allocation33_spill] sm:$0xff] }
 0x619   : > { %4742 = vmatprep.mubr.msk.bf16.mxu1 %vm3021_vm2, %v3899_v16  ;;  %v4985_v23 = vpop.eup %4984  ;;  %v3606_v46 = vmul.f32 %v8754_v13, %v3537_v27  ;;  %v9109_v10 = vpack.c.bf16 %v3670_v42, %v3669_v19  ;;  %4990 = vtanh.bf16 %v3752_v25  ;;  %v3874_v58 = vmul.bf16 %v3842_v39, %v8947_v57  ;;  %v10194_v6 = vld [vmem:[#allocation35_spill] sm:$0xff] }
 0x61a   : > { %v3812_v5 = vadd.bf16 1065369472, %v4981_v22  ;;  %4992 = vtanh.bf16 %v3753_v8  ;;  %v9112_v38 = vpack.c.bf16 %v3672_v56, %v3671_v35  ;;  %v3900_v41 = vmul.bf16 %v3868_v32, %v8952_v61 }
 0x61b   : > { %v3875_v63 = vmul.bf16 %v3843_v11, %v8986_v48  ;;  %v3838_v14 = vadd.bf16 1065369472, %v4983_v17  ;;  %v3813_v0 = vadd.bf16 1065369472, %v4985_v23  ;;  %v3538_v44 = vsub.f32 %v10191_v4, %v8743_v51 }
 0x61c   : > { %v3901_v62 = vmul.bf16 %v3869_v28, %v8999_v49  ;;  %v3539_v57 = vsub.f32 %v10192_v59, %v8743_v51  ;;  %v3673_v40 = vadd.f32 %v8805_v31, %v3603_v29  ;;  %v3674_v55 = vadd.f32 %v8805_v31, %v3604_v30 }
 0x61d   : > { %v3754_v61 = vmul.bf16 1056980736, %v9109_v10  ;;  %v4987_v48 = vpop.eup %4986  ;;  %v3675_v60 = vadd.f32 %v8805_v31, %v3605_v54  ;;  %v3676_v1 = vadd.f32 %v8805_v31, %v3606_v46  ;;  %v3844_v49 = vmul.bf16 1056980736, %v3812_v5 }
 0x61e   : > { %v3755_v16 = vmul.bf16 1056980736, %v9112_v38  ;;  %v3540_v37 = vsub.f32 %v10193_v34, %v8743_v51  ;;  %v3541_v19 = vsub.f32 %v10194_v6, %v8743_v51  ;;  %v3870_v42 = vmul.bf16 1056980736, %v3838_v14  ;;  %v4989_v22 = vpop.eup %4988 }
 0x61f   : > { %4691 = vmatmul.mubr.msk.bf16.gmra.mxu0 %vm3021_vm2, %v3874_v58  ;;  %v3845_v25 = vmul.bf16 1056980736, %v3813_v0  ;;  %v3607_v35 = vmul.f32 %v8754_v13, %v3538_v44  ;;  %v3608_v56 = vmul.f32 %v8754_v13, %v3539_v57  ;;  %v9139_v17 = vpack.c.bf16 %v3674_v55, %v3673_v40 }
 0x620   : > { %4743 = vmatmul.mubr.msk.bf16.gmra.mxu1 %vm3021_vm2, %v3900_v41  ;;  %4694 = vmatprep.mubr.msk.bf16.mxu0 %vm3021_vm2, %v3875_v63  ;;  %v3609_v39 = vmul.f32 %v8754_v13, %v3540_v37  ;;  %v3610_v8 = vmul.f32 %v8754_v13, %v3541_v19  ;;  %4994 = vtanh.bf16 %v3754_v61  ;;  %v3876_v33 = vmul.bf16 %v3844_v49, %v9020_v36 }
 0x621   : > { %4746 = vmatprep.mubr.msk.bf16.mxu1 %vm3021_vm2, %v3901_v62  ;;  %v3814_v12 = vadd.bf16 1065369472, %v4987_v48  ;;  %4996 = vtanh.bf16 %v3755_v16  ;;  %v9142_v7 = vpack.c.bf16 %v3676_v1, %v3675_v60  ;;  %v3902_v51 = vmul.bf16 %v3870_v42, %v9022_v47 }
 0x622   : > { %v3877_v27 = vmul.bf16 %v3845_v25, %v9026_v18  ;;  %v3815_v32 = vadd.bf16 1065369472, %v4989_v22  ;;  %v3677_v11 = vadd.f32 %v8805_v31, %v3607_v35  ;;  %v3678_v13 = vadd.f32 %v8805_v31, %v3608_v56 }
 0x623   : > { %v3756_v23 = vmul.bf16 1056980736, %v9139_v17  ;;  %v3679_v36 = vadd.f32 %v8805_v31, %v3609_v39  ;;  %v3680_v29 = vadd.f32 %v8805_v31, %v3610_v8  ;;  %v3846_v47 = vmul.bf16 1056980736, %v3814_v12 }
 0x624   : > { %v3757_v18 = vmul.bf16 1056980736, %v9142_v7  ;;  %v3847_v28 = vmul.bf16 1056980736, %v3815_v32  ;;  %v9155_v46 = vpack.c.bf16 %v3678_v13, %v3677_v11  ;;  %v3760_v55 = vmul.bf16 1056980736, %v8896_v20 }
 0x625   : > { %4998 = vtanh.bf16 %v3756_v23  ;;  %v3878_v58 = vmul.bf16 %v3846_v47, %v9045_v15  ;;  %v3727_v41 = vpack.c.bf16 %v3680_v29, %v3679_v36  ;;  %v3761_v48 = vmul.bf16 1056980736, %v8963_v43 }
 0x626   : > { %5000 = vtanh.bf16 %v3757_v18  ;;  %v3879_v63 = vmul.bf16 %v3847_v28, %v9053_v2  ;;  %v3758_v31 = vmul.bf16 1056980736, %v9155_v46  ;;  %v3762_v37 = vmul.bf16 1056980736, %v8898_v26 }
 0x627   : > { %4695 = vmatmul.mubr.msk.bf16.gmra.mxu0 %vm3021_vm2, %v3876_v33  ;;  %v4991_v30 = vpop.eup %4990  ;;  %v3759_v4 = vmul.bf16 1056980736, %v3727_v41  ;;  %v3763_v19 = vmul.bf16 1056980736, %v8967_v52  ;;  %v3764_v39 = vmul.bf16 1056980736, %v8900_v3 }
 0x628   : > { %4747 = vmatmul.mubr.msk.bf16.gmra.mxu1 %vm3021_vm2, %v3902_v51  ;;  %4698 = vmatprep.mubr.msk.bf16.mxu0 %vm3021_vm2, %v3877_v27  ;;  %v4993_v54 = vpop.eup %4992  ;;  %v3816_v5 = vadd.bf16 1065369472, %v4991_v30  ;;  %5002 = vtanh.bf16 %v3758_v31  ;;  %v3765_v33 = vmul.bf16 1056980736, %v8990_v21  ;;  %v3766_v13 = vmul.bf16 1056980736, %v8902_v53 }
 0x629   : > { %v3817_v14 = vadd.bf16 1065369472, %v4993_v54  ;;  %5004 = vtanh.bf16 %v3759_v4  ;;  %v3767_v36 = vmul.bf16 1056980736, %v8994_v9 }
 0x62a   : > { %v3848_v0 = vmul.bf16 1056980736, %v3816_v5  ;;  %5006 = vtanh.bf16 %v3760_v55 }
 0x62b   : > { %v3849_v62 = vmul.bf16 1056980736, %v3817_v14  ;;  %5008 = vtanh.bf16 %v3761_v48 }
 0x62c   : > { %v3880_v15 = vmul.bf16 %v3848_v0, %v9073_v50  ;;  %5010 = vtanh.bf16 %v3762_v37 }
 0x62d   : > { %v3881_v40 = vmul.bf16 %v3849_v62, %v9078_v24  ;;  %5012 = vtanh.bf16 %v3763_v19 }
 0x62e   : > { %v4995_v44 = vpop.eup %4994  ;;  %5014 = vtanh.bf16 %v3764_v39 }
 0x62f   : > { %4699 = vmatmul.mubr.msk.bf16.gmra.mxu0 %vm3021_vm2, %v3878_v58  ;;  %v4997_v59 = vpop.eup %4996  ;;  %v3818_v57 = vadd.bf16 1065369472, %v4995_v44  ;;  %5016 = vtanh.bf16 %v3765_v33  ;;  %v3768_v58 = vmul.bf16 1056980736, %v8907_v45 }
 0x630   : > { %4702 = vmatprep.mubr.msk.bf16.mxu0 %vm3021_vm2, %v3879_v63  ;;  %v3819_v2 = vadd.bf16 1065369472, %v4997_v59  ;;  %5018 = vtanh.bf16 %v3766_v13 }
 0x631   : > { %v3850_v61 = vmul.bf16 1056980736, %v3818_v57  ;;  %5020 = vtanh.bf16 %v3767_v36 }
 0x632   : > { %v3851_v1 = vmul.bf16 1056980736, %v3819_v2  ;;  %5022 = vtanh.bf16 %v3768_v58 }
 0x633   : > { %v4999_v60 = vpop.eup %4998  ;;  %v3882_v50 = vmul.bf16 %v3850_v61, %v9109_v10 }
 0x634   : > { %v5001_v49 = vpop.eup %5000  ;;  %v3820_v16 = vadd.bf16 1065369472, %v4999_v60  ;;  %v3883_v24 = vmul.bf16 %v3851_v1, %v9112_v38  ;;  %v9208_v1 = vld [vmem:[%s9420_s10] ss:$0 sm:$0xff] }
 0x635   : > { %v3821_v34 = vadd.bf16 1065369472, %v5001_v49 }
 0x636   : > { %v3852_v6 = vmul.bf16 1056980736, %v3820_v16  ;;  %v5003_v42 = vpop.eup %5002 }
 0x637   : > { %4703 = vmatmul.mubr.msk.bf16.gmra.mxu0 %vm3021_vm2, %v3880_v15  ;;  %v3853_v25 = vmul.bf16 1056980736, %v3821_v34  ;;  %v5005_v22 = vpop.eup %5004  ;;  %v3822_v35 = vadd.bf16 1065369472, %v5003_v42 }
 0x638   : > { %4706 = vmatprep.mubr.msk.bf16.mxu0 %vm3021_vm2, %v3881_v40  ;;  %v3884_v10 = vmul.bf16 %v3852_v6, %v9139_v17  ;;  %v3823_v56 = vadd.bf16 1065369472, %v5005_v22  ;;  %v5007_v12 = vpop.eup %5006 }
 0x639   : > { %v3885_v38 = vmul.bf16 %v3853_v25, %v9142_v7  ;;  %v3854_v8 = vmul.bf16 1056980736, %v3822_v35  ;;  %v5009_v27 = vpop.eup %5008  ;;  %v3824_v32 = vadd.bf16 1065369472, %v5007_v12 }
 0x63a   : > { %v3855_v51 = vmul.bf16 1056980736, %v3823_v56  ;;  %v3825_v7 = vadd.bf16 1065369472, %v5009_v27  ;;  %v5011_v29 = vpop.eup %5010 }
 0x63b   : > { %v3886_v17 = vmul.bf16 %v3854_v8, %v9155_v46  ;;  %v3856_v23 = vmul.bf16 1056980736, %v3824_v32  ;;  %v5013_v18 = vpop.eup %5012  ;;  %v3826_v28 = vadd.bf16 1065369472, %v5011_v29 }
 0x63c   : > { %v3887_v11 = vmul.bf16 %v3855_v51, %v3727_v41  ;;  %v3857_v47 = vmul.bf16 1056980736, %v3825_v7  ;;  %v3827_v46 = vadd.bf16 1065369472, %v5013_v18  ;;  %v5015_v41 = vpop.eup %5014 }
 0x63d   : > { %v3888_v30 = vmul.bf16 %v3856_v23, %v8896_v20  ;;  %v3858_v5 = vmul.bf16 1056980736, %v3826_v28  ;;  %v5017_v14 = vpop.eup %5016  ;;  %v3828_v0 = vadd.bf16 1065369472, %v5015_v41 }
 0x63e   : > { %v3889_v54 = vmul.bf16 %v3857_v47, %v8963_v43  ;;  %v3859_v63 = vmul.bf16 1056980736, %v3827_v46  ;;  %v3829_v4 = vadd.bf16 1065369472, %v5017_v14  ;;  %v5019_v44 = vpop.eup %5018 }
 0x63f   : > { %4707 = vmatmul.mubr.msk.bf16.gmra.mxu0 %vm3021_vm2, %v3882_v50  ;;  %v3890_v31 = vmul.bf16 %v3858_v5, %v8898_v26  ;;  %v3860_v43 = vmul.bf16 1056980736, %v3828_v0  ;;  %v5021_v59 = vpop.eup %5020  ;;  %v3830_v57 = vadd.bf16 1065369472, %v5019_v44 }
 0x640   : > { %4710 = vmatprep.mubr.msk.bf16.mxu0 %vm3021_vm2, %v3883_v24  ;;  %v3891_v20 = vmul.bf16 %v3859_v63, %v8967_v52  ;;  %v3861_v62 = vmul.bf16 1056980736, %v3829_v4  ;;  %v3831_v2 = vadd.bf16 1065369472, %v5021_v59  ;;  %v5023_v52 = vpop.eup %5022 }
 0x641   : > { %v3892_v15 = vmul.bf16 %v3860_v43, %v8900_v3  ;;  %v3862_v26 = vmul.bf16 1056980736, %v3830_v57  ;;  %v3832_v48 = vadd.bf16 1065369472, %v5023_v52 }
 0x642   : > { %v3893_v40 = vmul.bf16 %v3861_v62, %v8990_v21  ;;  %v3863_v55 = vmul.bf16 1056980736, %v3831_v2 }
 0x643   : > { %v3894_v61 = vmul.bf16 %v3862_v26, %v8902_v53  ;;  %v3864_v3 = vmul.bf16 1056980736, %v3832_v48 }
 0x644   : > { %v3895_v60 = vmul.bf16 %v3863_v55, %v8994_v9 }
 0x645   : > { %v3896_v21 = vmul.bf16 %v3864_v3, %v8907_v45 }
 0x647   : > { %4711 = vmatmul.mubr.msk.bf16.gmra.mxu0 %vm3021_vm2, %v3884_v10 }
 0x648   : > { %4714 = vmatprep.mubr.msk.bf16.mxu0 %vm3021_vm2, %v3885_v38 }
 0x64f   : > { %4715 = vmatmul.mubr.msk.bf16.gmra.mxu0 %vm3021_vm2, %v3886_v17 }
 0x650   : > { %4718 = vmatprep.mubr.msk.bf16.mxu0 %vm3021_vm2, %v3887_v11 }
 0x657   : > { %4719 = vmatmul.mubr.msk.bf16.gmra.mxu0 %vm3021_vm2, %v3888_v30 }
 0x658   : > { %4722 = vmatprep.mubr.msk.bf16.mxu0 %vm3021_vm2, %v3889_v54 }
 0x65f   : > { %4723 = vmatmul.mubr.msk.bf16.gmra.mxu0 %vm3021_vm2, %v3890_v31 }
 0x660   : > { %4726 = vmatprep.mubr.msk.bf16.mxu0 %vm3021_vm2, %v3891_v20 }
 0x667   : > { %4727 = vmatmul.mubr.msk.bf16.gmra.mxu0 %vm3021_vm2, %v3892_v15 }
 0x668   : > { %4730 = vmatprep.mubr.msk.bf16.mxu0 %vm3021_vm2, %v3893_v40 }
 0x66f   : > { %4731 = vmatmul.mubr.msk.bf16.gmra.mxu0 %vm3021_vm2, %v3894_v61 }
 0x670   : > { %4734 = vmatprep.mubr.msk.bf16.mxu0 %vm3021_vm2, %v3895_v60 }
 0x677   : > { %4735 = vmatmul.mubr.msk.bf16.gmra.mxu0 %vm3021_vm2, %v3896_v21 }
 0x6d7   : > { %v4688_v53 = vpop.f32.mrf.mxu0 }
 0x6d8   : > { %v4081_v45 = vadd.f32 %v4688_v53, %v9208_v1  ;;  %v4740_v9 = vpop.f32.mrf.mxu1 }
 0x6d9   : > { %v4289_v49 = vadd.f32 %v4740_v9, %v9208_v1  ;;  %v4072_v50 = vpop.f32.mrf.mxu0 }
 0x6da   : > { %4330 = vst.msk [vmem:[%s9213_s16 + $0x10] sm:$0xff] %vm4327_vm4, %v4081_v45  ;;  %v4073_v16 = vadd.f32 %v9208_v1, %v4072_v50  ;;  %v4280_v24 = vpop.f32.mrf.mxu1 }
 0x6db   : > { %4382 = vst.msk [vmem:[%s9213_s16 + $0x1b0] sm:$0xff] %vm4327_vm4, %v4289_v49  ;;  %v4281_v34 = vadd.f32 %v9208_v1, %v4280_v24  ;;  %v4689_v37 = vpop.f32.mrf.mxu0 }
 0x6dc   : > { %4328 = vst.msk [vmem:[%s9213_s16] sm:$0xff] %vm4327_vm4, %v4073_v16  ;;  %v4084_v6 = vadd.f32 %v4689_v37, %v9208_v1  ;;  %v4741_v19 = vpop.f32.mrf.mxu1 }
 0x6dd   : > { %4380 = vst.msk [vmem:[%s9213_s16 + $0x1a0] sm:$0xff] %vm4327_vm4, %v4281_v34  ;;  %v4292_v42 = vadd.f32 %v4741_v19, %v9208_v1  ;;  %v4075_v25 = vpop.f32.mrf.mxu0 }
 0x6de   : > { %4331 = vst.msk [vmem:[%s9213_s16 + $0x18] sm:$0xff] %vm4327_vm4, %v4084_v6  ;;  %v4076_v22 = vadd.f32 %v9208_v1, %v4075_v25  ;;  %v4283_v10 = vpop.f32.mrf.mxu1 }
 0x6df   : > { %4383 = vst.msk [vmem:[%s9213_s16 + $0x1b8] sm:$0xff] %vm4327_vm4, %v4292_v42  ;;  %v4284_v35 = vadd.f32 %v9208_v1, %v4283_v10  ;;  %v4692_v38 = vpop.f32.mrf.mxu0 }
 0x6e0   : > { %4329 = vst.msk [vmem:[%s9213_s16 + $0x8] sm:$0xff] %vm4327_vm4, %v4076_v22  ;;  %v4097_v56 = vadd.f32 %v4692_v38, %v9208_v1  ;;  %v4744_v39 = vpop.f32.mrf.mxu1 }
 0x6e1   : > { %4381 = vst.msk [vmem:[%s9213_s16 + $0x1a8] sm:$0xff] %vm4327_vm4, %v4284_v35  ;;  %v4305_v8 = vadd.f32 %v4744_v39, %v9208_v1  ;;  %v4088_v33 = vpop.f32.mrf.mxu0 }
 0x6e2   : > { %4334 = vst.msk [vmem:[%s9213_s16 + $0x30] sm:$0xff] %vm4327_vm4, %v4097_v56  ;;  %v4089_v12 = vadd.f32 %v9208_v1, %v4088_v33  ;;  %v4296_v51 = vpop.f32.mrf.mxu1 }
 0x6e3   : > { %4386 = vst.msk [vmem:[%s9213_s16 + $0x1d0] sm:$0xff] %vm4327_vm4, %v4305_v8  ;;  %v4297_v27 = vadd.f32 %v9208_v1, %v4296_v51  ;;  %v4693_v17 = vpop.f32.mrf.mxu0 }
 0x6e4   : > { %4332 = vst.msk [vmem:[%s9213_s16 + $0x20] sm:$0xff] %vm4327_vm4, %v4089_v12  ;;  %v4100_v32 = vadd.f32 %v4693_v17, %v9208_v1  ;;  %v4745_v11 = vpop.f32.mrf.mxu1 }
 0x6e5   : > { %4384 = vst.msk [vmem:[%s9213_s16 + $0x1c0] sm:$0xff] %vm4327_vm4, %v4297_v27  ;;  %v4308_v7 = vadd.f32 %v4745_v11, %v9208_v1  ;;  %v4091_v13 = vpop.f32.mrf.mxu0 }
 0x6e6   : > { %4335 = vst.msk [vmem:[%s9213_s16 + $0x38] sm:$0xff] %vm4327_vm4, %v4100_v32  ;;  %v4092_v23 = vadd.f32 %v9208_v1, %v4091_v13  ;;  %v4299_v36 = vpop.f32.mrf.mxu1 }
 0x6e7   : > { %4387 = vst.msk [vmem:[%s9213_s16 + $0x1d8] sm:$0xff] %vm4327_vm4, %v4308_v7  ;;  %v4300_v29 = vadd.f32 %v9208_v1, %v4299_v36  ;;  %v4696_v47 = vpop.f32.mrf.mxu0 }
 0x6e8   : > { %4333 = vst.msk [vmem:[%s9213_s16 + $0x28] sm:$0xff] %vm4327_vm4, %v4092_v23  ;;  %v4113_v18 = vadd.f32 %v4696_v47, %v9208_v1  ;;  %v4748_v30 = vpop.f32.mrf.mxu1 }
 0x6e9   : > { %4385 = vst.msk [vmem:[%s9213_s16 + $0x1c8] sm:$0xff] %vm4327_vm4, %v4300_v29  ;;  %v4321_v28 = vadd.f32 %v4748_v30, %v9208_v1  ;;  %v4104_v54 = vpop.f32.mrf.mxu0 }
 0x6ea   : > { %4338 = vst.msk [vmem:[%s9213_s16 + $0x50] sm:$0xff] %vm4327_vm4, %v4113_v18  ;;  %v4105_v46 = vadd.f32 %v9208_v1, %v4104_v54  ;;  %v4312_v58 = vpop.f32.mrf.mxu1 }
 0x6eb   : > { %4390 = vst.msk [vmem:[%s9213_s16 + $0x1f0] sm:$0xff] %vm4327_vm4, %v4321_v28  ;;  %v4313_v5 = vadd.f32 %v9208_v1, %v4312_v58  ;;  %v4697_v41 = vpop.f32.mrf.mxu0 }
 0x6ec   : > { %4336 = vst.msk [vmem:[%s9213_s16 + $0x40] sm:$0xff] %vm4327_vm4, %v4105_v46  ;;  %v4116_v63 = vadd.f32 %v4697_v41, %v9208_v1  ;;  %v4749_v14 = vpop.f32.mrf.mxu1 }
 0x6ed   : > { %4388 = vst.msk [vmem:[%s9213_s16 + $0x1e0] sm:$0xff] %vm4327_vm4, %v4313_v5  ;;  %v4324_v31 = vadd.f32 %v4749_v14, %v9208_v1  ;;  %v4107_v0 = vpop.f32.mrf.mxu0 }
 0x6ee   : > { %4339 = vst.msk [vmem:[%s9213_s16 + $0x58] sm:$0xff] %vm4327_vm4, %v4116_v63  ;;  %v4108_v20 = vadd.f32 %v9208_v1, %v4107_v0  ;;  %v4315_v4 = vpop.f32.mrf.mxu1 }
 0x6ef   : > { %4391 = vst.msk [vmem:[%s9213_s16 + $0x1f8] sm:$0xff] %vm4327_vm4, %v4324_v31  ;;  %v4316_v43 = vadd.f32 %v9208_v1, %v4315_v4  ;;  %v4700_v44 = vpop.f32.mrf.mxu0 }
 0x6f0   : > { %4337 = vst.msk [vmem:[%s9213_s16 + $0x48] sm:$0xff] %vm4327_vm4, %v4108_v20  ;;  %v4129_v62 = vadd.f32 %v4700_v44, %v9208_v1 }
 0x6f1   : > { %4389 = vst.msk [vmem:[%s9213_s16 + $0x1e8] sm:$0xff] %vm4327_vm4, %v4316_v43  ;;  %v4120_v59 = vpop.f32.mrf.mxu0 }
 0x6f2   : > { %4342 = vst.msk [vmem:[%s9213_s16 + $0x70] sm:$0xff] %vm4327_vm4, %v4129_v62  ;;  %v4121_v15 = vadd.f32 %v9208_v1, %v4120_v59 }
 0x6f3   : > { %v4701_v57 = vpop.f32.mrf.mxu0 }
 0x6f4   : > { %4340 = vst.msk [vmem:[%s9213_s16 + $0x60] sm:$0xff] %vm4327_vm4, %v4121_v15  ;;  %v4132_v40 = vadd.f32 %v4701_v57, %v9208_v1 }
 0x6f5   : > { %v4123_v2 = vpop.f32.mrf.mxu0 }
 0x6f6   : > { %4343 = vst.msk [vmem:[%s9213_s16 + $0x78] sm:$0xff] %vm4327_vm4, %v4132_v40  ;;  %v4124_v26 = vadd.f32 %v9208_v1, %v4123_v2 }
 0x6f7   : > { %v4704_v52 = vpop.f32.mrf.mxu0 }
 0x6f8   : > { %4341 = vst.msk [vmem:[%s9213_s16 + $0x68] sm:$0xff] %vm4327_vm4, %v4124_v26  ;;  %v4145_v55 = vadd.f32 %v4704_v52, %v9208_v1 }
 0x6f9   : > { %v4136_v61 = vpop.f32.mrf.mxu0 }
 0x6fa   : > { %4346 = vst.msk [vmem:[%s9213_s16 + $0x90] sm:$0xff] %vm4327_vm4, %v4145_v55  ;;  %v4137_v48 = vadd.f32 %v9208_v1, %v4136_v61 }
 0x6fb   : > { %v4705_v60 = vpop.f32.mrf.mxu0 }
 0x6fc   : > { %4344 = vst.msk [vmem:[%s9213_s16 + $0x80] sm:$0xff] %vm4327_vm4, %v4137_v48  ;;  %v4148_v3 = vadd.f32 %v4705_v60, %v9208_v1 }
 0x6fd   : > { %v4139_v21 = vpop.f32.mrf.mxu0 }
 0x6fe   : > { %4347 = vst.msk [vmem:[%s9213_s16 + $0x98] sm:$0xff] %vm4327_vm4, %v4148_v3  ;;  %v4140_v53 = vadd.f32 %v9208_v1, %v4139_v21 }
 0x6ff   : > { %v4708_v45 = vpop.f32.mrf.mxu0 }
 0x700   : > { %4345 = vst.msk [vmem:[%s9213_s16 + $0x88] sm:$0xff] %vm4327_vm4, %v4140_v53  ;;  %v4161_v9 = vadd.f32 %v4708_v45, %v9208_v1 }
 0x701   : > { %v4152_v49 = vpop.f32.mrf.mxu0 }
 0x702   : > { %4350 = vst.msk [vmem:[%s9213_s16 + $0xb0] sm:$0xff] %vm4327_vm4, %v4161_v9  ;;  %v4153_v50 = vadd.f32 %v9208_v1, %v4152_v49 }
 0x703   : > { %v4709_v16 = vpop.f32.mrf.mxu0 }
 0x704   : > { %4348 = vst.msk [vmem:[%s9213_s16 + $0xa0] sm:$0xff] %vm4327_vm4, %v4153_v50  ;;  %v4164_v24 = vadd.f32 %v4709_v16, %v9208_v1 }
 0x705   : > { %v4155_v34 = vpop.f32.mrf.mxu0 }
 0x706   : > { %4351 = vst.msk [vmem:[%s9213_s16 + $0xb8] sm:$0xff] %vm4327_vm4, %v4164_v24  ;;  %v4156_v37 = vadd.f32 %v9208_v1, %v4155_v34 }
 0x707   : > { %v4712_v6 = vpop.f32.mrf.mxu0 }
 0x708   : > { %4349 = vst.msk [vmem:[%s9213_s16 + $0xa8] sm:$0xff] %vm4327_vm4, %v4156_v37  ;;  %v4177_v19 = vadd.f32 %v4712_v6, %v9208_v1 }
 0x709   : > { %v4168_v42 = vpop.f32.mrf.mxu0 }
 0x70a   : > { %4354 = vst.msk [vmem:[%s9213_s16 + $0xd0] sm:$0xff] %vm4327_vm4, %v4177_v19  ;;  %v4169_v25 = vadd.f32 %v9208_v1, %v4168_v42 }
 0x70b   : > { %v4713_v22 = vpop.f32.mrf.mxu0 }
 0x70c   : > { %4352 = vst.msk [vmem:[%s9213_s16 + $0xc0] sm:$0xff] %vm4327_vm4, %v4169_v25  ;;  %v4180_v10 = vadd.f32 %v4713_v22, %v9208_v1 }
 0x70d   : > { %v4171_v35 = vpop.f32.mrf.mxu0 }
 0x70e   : > { %4355 = vst.msk [vmem:[%s9213_s16 + $0xd8] sm:$0xff] %vm4327_vm4, %v4180_v10  ;;  %v4172_v38 = vadd.f32 %v9208_v1, %v4171_v35 }
 0x70f   : > { %v4716_v56 = vpop.f32.mrf.mxu0 }
 0x710   : > { %4353 = vst.msk [vmem:[%s9213_s16 + $0xc8] sm:$0xff] %vm4327_vm4, %v4172_v38  ;;  %v4193_v39 = vadd.f32 %v4716_v56, %v9208_v1 }
 0x711   : > { %v4184_v8 = vpop.f32.mrf.mxu0 }
 0x712   : > { %4358 = vst.msk [vmem:[%s9213_s16 + $0xf0] sm:$0xff] %vm4327_vm4, %v4193_v39  ;;  %v4185_v33 = vadd.f32 %v9208_v1, %v4184_v8 }
 0x713   : > { %v4717_v12 = vpop.f32.mrf.mxu0 }
 0x714   : > { %4356 = vst.msk [vmem:[%s9213_s16 + $0xe0] sm:$0xff] %vm4327_vm4, %v4185_v33  ;;  %v4196_v51 = vadd.f32 %v4717_v12, %v9208_v1 }
 0x715   : > { %v4187_v27 = vpop.f32.mrf.mxu0 }
 0x716   : > { %4359 = vst.msk [vmem:[%s9213_s16 + $0xf8] sm:$0xff] %vm4327_vm4, %v4196_v51  ;;  %v4188_v17 = vadd.f32 %v9208_v1, %v4187_v27 }
 0x717   : > { %v4720_v32 = vpop.f32.mrf.mxu0 }
 0x718   : > { %4357 = vst.msk [vmem:[%s9213_s16 + $0xe8] sm:$0xff] %vm4327_vm4, %v4188_v17  ;;  %v4209_v11 = vadd.f32 %v4720_v32, %v9208_v1 }
 0x719   : > { %v4200_v7 = vpop.f32.mrf.mxu0 }
 0x71a   : > { %4362 = vst.msk [vmem:[%s9213_s16 + $0x110] sm:$0xff] %vm4327_vm4, %v4209_v11  ;;  %v4201_v13 = vadd.f32 %v9208_v1, %v4200_v7 }
 0x71b   : > { %v4721_v23 = vpop.f32.mrf.mxu0 }
 0x71c   : > { %4360 = vst.msk [vmem:[%s9213_s16 + $0x100] sm:$0xff] %vm4327_vm4, %v4201_v13  ;;  %v4212_v36 = vadd.f32 %v4721_v23, %v9208_v1 }
 0x71d   : > { %v4203_v29 = vpop.f32.mrf.mxu0 }
 0x71e   : > { %4363 = vst.msk [vmem:[%s9213_s16 + $0x118] sm:$0xff] %vm4327_vm4, %v4212_v36  ;;  %v4204_v47 = vadd.f32 %v9208_v1, %v4203_v29 }
 0x71f   : > { %v4724_v18 = vpop.f32.mrf.mxu0 }
 0x720   : > { %4361 = vst.msk [vmem:[%s9213_s16 + $0x108] sm:$0xff] %vm4327_vm4, %v4204_v47  ;;  %v4225_v30 = vadd.f32 %v4724_v18, %v9208_v1 }
 0x721   : > { %v4216_v28 = vpop.f32.mrf.mxu0 }
 0x722   : > { %4366 = vst.msk [vmem:[%s9213_s16 + $0x130] sm:$0xff] %vm4327_vm4, %v4225_v30  ;;  %v4217_v54 = vadd.f32 %v9208_v1, %v4216_v28 }
 0x723   : > { %v4725_v46 = vpop.f32.mrf.mxu0 }
 0x724   : > { %4364 = vst.msk [vmem:[%s9213_s16 + $0x120] sm:$0xff] %vm4327_vm4, %v4217_v54  ;;  %v4228_v58 = vadd.f32 %v4725_v46, %v9208_v1 }
 0x725   : > { %v4219_v5 = vpop.f32.mrf.mxu0 }
 0x726   : > { %4367 = vst.msk [vmem:[%s9213_s16 + $0x138] sm:$0xff] %vm4327_vm4, %v4228_v58  ;;  %v4220_v41 = vadd.f32 %v9208_v1, %v4219_v5 }
 0x727   : > { %v4728_v63 = vpop.f32.mrf.mxu0 }
 0x728   : > { %4365 = vst.msk [vmem:[%s9213_s16 + $0x128] sm:$0xff] %vm4327_vm4, %v4220_v41  ;;  %v4241_v14 = vadd.f32 %v4728_v63, %v9208_v1 }
 0x729   : > { %v4232_v31 = vpop.f32.mrf.mxu0 }
 0x72a   : > { %4370 = vst.msk [vmem:[%s9213_s16 + $0x150] sm:$0xff] %vm4327_vm4, %v4241_v14  ;;  %v4233_v0 = vadd.f32 %v9208_v1, %v4232_v31 }
 0x72b   : > { %v4729_v20 = vpop.f32.mrf.mxu0 }
 0x72c   : > { %4368 = vst.msk [vmem:[%s9213_s16 + $0x140] sm:$0xff] %vm4327_vm4, %v4233_v0  ;;  %v4244_v4 = vadd.f32 %v4729_v20, %v9208_v1 }
 0x72d   : > { %v4235_v43 = vpop.f32.mrf.mxu0 }
 0x72e   : > { %4371 = vst.msk [vmem:[%s9213_s16 + $0x158] sm:$0xff] %vm4327_vm4, %v4244_v4  ;;  %v4236_v44 = vadd.f32 %v9208_v1, %v4235_v43 }
 0x72f   : > { %v4732_v62 = vpop.f32.mrf.mxu0 }
 0x730   : > { %4369 = vst.msk [vmem:[%s9213_s16 + $0x148] sm:$0xff] %vm4327_vm4, %v4236_v44  ;;  %v4257_v59 = vadd.f32 %v4732_v62, %v9208_v1 }
 0x731   : > { %v4248_v15 = vpop.f32.mrf.mxu0 }
 0x732   : > { %4374 = vst.msk [vmem:[%s9213_s16 + $0x170] sm:$0xff] %vm4327_vm4, %v4257_v59  ;;  %v4249_v57 = vadd.f32 %v9208_v1, %v4248_v15 }
 0x733   : > { %v4733_v40 = vpop.f32.mrf.mxu0 }
 0x734   : > { %4372 = vst.msk [vmem:[%s9213_s16 + $0x160] sm:$0xff] %vm4327_vm4, %v4249_v57  ;;  %v4260_v2 = vadd.f32 %v4733_v40, %v9208_v1 }
 0x735   : > { %v4251_v26 = vpop.f32.mrf.mxu0 }
 0x736   : > { %4375 = vst.msk [vmem:[%s9213_s16 + $0x178] sm:$0xff] %vm4327_vm4, %v4260_v2  ;;  %v4252_v52 = vadd.f32 %v9208_v1, %v4251_v26 }
 0x737   : > { %v4736_v55 = vpop.f32.mrf.mxu0 }
 0x738   : > { %4373 = vst.msk [vmem:[%s9213_s16 + $0x168] sm:$0xff] %vm4327_vm4, %v4252_v52  ;;  %v4273_v61 = vadd.f32 %v4736_v55, %v9208_v1 }
 0x739   : > { %v4264_v48 = vpop.f32.mrf.mxu0 }
 0x73a   : > { %4378 = vst.msk [vmem:[%s9213_s16 + $0x190] sm:$0xff] %vm4327_vm4, %v4273_v61  ;;  %v4265_v60 = vadd.f32 %v9208_v1, %v4264_v48 }
 0x73b   : > { %v4737_v3 = vpop.f32.mrf.mxu0 }
 0x73c   : > { %4376 = vst.msk [vmem:[%s9213_s16 + $0x180] sm:$0xff] %vm4327_vm4, %v4265_v60  ;;  %v4276_v21 = vadd.f32 %v4737_v3, %v9208_v1 }
 0x73d   : > { %v4267_v53 = vpop.f32.mrf.mxu0 }
 0x73e   : > { %4379 = vst.msk [vmem:[%s9213_s16 + $0x198] sm:$0xff] %vm4327_vm4, %v4276_v21  ;;  %v4268_v45 = vadd.f32 %v9208_v1, %v4267_v53 }
 0x740   : > { %4377 = vst.msk [vmem:[%s9213_s16 + $0x188] sm:$0xff] %vm4327_vm4, %v4268_v45 }
 0x741 PF: > { %s23_s25 = sadd.s32 1, %s5030_s25  }
 0x742   : > { %p20_p4 = scmp.ge.s32.totalorder %s23_s25, 4  }
 0x744   :  { %22 = sbr.rel (!%p20_p4) target bundleno = 1 (0x1), region = 102 }

</bundles_post_ra>
